<compile_context>
chip_gen: v7x
topology: tpu7x:2x2x1
jax: 0.10.0
libtpu: 0.0.40
codegen_flags: <defaults>
</compile_context>

<pallas_src>
import functools

import jax
import jax.numpy as jnp
from jax.experimental import pallas as pl
from jax.experimental.pallas import tpu as pltpu


def _fused_cnn_kernel(x_ref, w1_ref, w2_ref, w3_ref, w4_ref, w5_ref, o_ref,
                      *, H, W):
    """Fused conv-relu x4 + conv for one image.

    x_ref : (1, 1, H*W)   single-channel input, flattened spatial on lanes
    w1_ref: (32, 9)       conv1 weight slab  (Cout, 9*Cin), Cin=1
    w2..4 : (32, 288)     conv2-4 weight slabs (Cout, 9*Cin), Cin=32
    w5_ref: (1, 288)      conv5 weight slab
    o_ref : (1, 1, H*W)   single-channel output
    """
    HW = H * W
    # Lane-aligned zero pad on both sides of the flattened spatial axis.
    # Must cover the largest flat shift |dy*W + dx| = W + 1; rounding to a
    # multiple of 128 keeps the concatenation lane-tile aligned.
    LPAD = pl.cdiv(W + 1, 128) * 128

    # W-boundary masks (the H boundary is handled for free by the zero pad).
    w_idx = jax.lax.broadcasted_iota(jnp.int32, (1, HW), 1) % W
    ok_dx_m1 = w_idx >= 1          # tap dx = -1 valid iff w - 1 >= 0
    ok_dx_p1 = w_idx <= W - 2      # tap dx = +1 valid iff w + 1 <= W - 1

    def shifted_taps(a):
        """a: (Cin, HW) f32 -> list of 9 shifted (Cin, HW) taps.

        Tap order is (dy, dx) for dy, dx in (-1, 0, 1), matching the
        (kh*3 + kw)*Cin + c column order of the weight slabs.
        """
        cin = a.shape[0]
        zpad = jnp.zeros((cin, LPAD), jnp.float32)
        apad = jnp.concatenate([zpad, a, zpad], axis=1)   # (Cin, HW + 2*LPAD)
        taps = []
        for dy in (-1, 0, 1):
            for dx in (-1, 0, 1):
                k = dy * W + dx
                tap = apad[:, LPAD + k: LPAD + k + HW]    # static lane slice
                if dx == -1:
                    tap = jnp.where(ok_dx_m1, tap, 0.0)
                elif dx == 1:
                    tap = jnp.where(ok_dx_p1, tap, 0.0)
                taps.append(tap)
        return taps

    # ---- layer 1 (Cin = 1): 9 VPU multiply-accumulates, no tiny matmul ----
    x0 = x_ref[0].astype(jnp.float32)                     # (1, HW)
    cout1 = w1_ref.shape[0]
    a = jnp.zeros((cout1, HW), jnp.float32)
    for t, tap in enumerate(shifted_taps(x0)):
        a = a + w1_ref[:, t:t + 1] * tap                  # (32,1)*(1,HW)
    a = jnp.maximum(a, 0.0)

    # ---- layers 2..5: one im2col matmul each (K = 9*Cin = 288) ----
    def conv3x3_mxu(act, w_ref, relu):
        patches = jnp.concatenate(shifted_taps(act), axis=0)   # (9*Cin, HW)
        y = jnp.dot(w_ref[...], patches,
                    preferred_element_type=jnp.float32)        # (Cout, HW)
        return jnp.maximum(y, 0.0) if relu else y

    a = conv3x3_mxu(a, w2_ref, relu=True)
    a = conv3x3_mxu(a, w3_ref, relu=True)
    a = conv3x3_mxu(a, w4_ref, relu=True)
    a = conv3x3_mxu(a, w5_ref, relu=False)                # (1, HW)

    o_ref[0] = a.astype(o_ref.dtype)


def _weight_slab(w_oihw):
    """(Cout, Cin, 3, 3) -> (Cout, 9*Cin), column index = (kh*3+kw)*Cin + c."""
    cout, cin = w_oihw.shape[0], w_oihw.shape[1]
    return jnp.transpose(w_oihw, (0, 2, 3, 1)).reshape(cout, 9 * cin)


def five_layer_cnn_maml_forward(x_nchw, weights):
    """Forward pass of five_layerCNN_MAML (conv-relu x4, conv), fully fused."""
    N, C, H, W = x_nchw.shape
    assert C == 1, "five_layerCNN_MAML expects a single input channel"
    HW = H * W

    x_flat = x_nchw.reshape(N, 1, HW)                 # no NCHW->NHWC transpose
    slabs = [_weight_slab(w) for w in weights]        # hoisted weight layout

    kernel = functools.partial(_fused_cnn_kernel, H=H, W=W)
    out_flat = pl.pallas_call(
        kernel,
        out_shape=jax.ShapeDtypeStruct((N, 1, HW), x_nchw.dtype),
        grid=(N,),
        in_specs=[
            pl.BlockSpec((1, 1, HW), lambda n: (n, 0, 0)),
            pl.BlockSpec(slabs[0].shape, lambda n: (0, 0)),
            pl.BlockSpec(slabs[1].shape, lambda n: (0, 0)),
            pl.BlockSpec(slabs[2].shape, lambda n: (0, 0)),
            pl.BlockSpec(slabs[3].shape, lambda n: (0, 0)),
            pl.BlockSpec(slabs[4].shape, lambda n: (0, 0)),
        ],
        out_specs=pl.BlockSpec((1, 1, HW), lambda n: (n, 0, 0)),
        compiler_params=pltpu.CompilerParams(
            dimension_semantics=("parallel",)),       # v7x: 2 TCs split batch
    )(x_flat, *slabs)
    return out_flat.reshape(N, 1, H, W)


def init_weights(key):
    """Deterministic weights matching nn.Conv2d shapes (OIHW, bias=False)."""
    shapes = [
        (32, 1, 3, 3),    # conv1
        (32, 32, 3, 3),   # conv2
        (32, 32, 3, 3),   # conv3
        (32, 32, 3, 3),   # conv4
        (1, 32, 3, 3),    # conv5
    ]
    keys = jax.random.split(key, len(shapes))
    return [0.1 * jax.random.normal(k, s, jnp.float32)
            for k, s in zip(keys, shapes)]


def _reference_forward(x_nchw, weights):
    """Pure-JAX reference (lax.conv) for correctness checking."""
    x = x_nchw
    for i, w in enumerate(weights):
        x = jax.lax.conv_general_dilated(
            x, w, window_strides=(1, 1), padding=((1, 1), (1, 1)),
            dimension_numbers=("NCHW", "OIHW", "NCHW"))
        if i < 4:
            x = jnp.maximum(x, 0.0)
    return x


if __name__ == "__main__":
    key = jax.random.PRNGKey(0)
    k_w, k_x = jax.random.split(key)
    weights = init_weights(k_w)

    # module requires 1 input channel; small spatial size
    x = jax.random.normal(k_x, (2, 1, 16, 16), jnp.float32)

    out = jax.jit(five_layer_cnn_maml_forward)(x, weights)
    out = jax.block_until_ready(out)

    ref = _reference_forward(x, weights)
    assert out.shape == (2, 1, 16, 16)
    assert jnp.allclose(out, ref, rtol=1e-4, atol=1e-4), "mismatch vs reference"

    print("KERNEL_OK")
</pallas_src>

<mosaic_0001>
module attributes {stable_mosaic.version = 11 : i64} {
  func.func @_fused_cnn_kernel(%arg0: i32, %arg1: memref<1x1x256xf32, #tpu.memory_space<vmem>>, %arg2: memref<32x9xf32, #tpu.memory_space<vmem>>, %arg3: memref<32x288xf32, #tpu.memory_space<vmem>>, %arg4: memref<32x288xf32, #tpu.memory_space<vmem>>, %arg5: memref<32x288xf32, #tpu.memory_space<vmem>>, %arg6: memref<1x288xf32, #tpu.memory_space<vmem>>, %arg7: memref<1x1x256xf32, #tpu.memory_space<vmem>>) attributes {dimension_semantics = [#tpu.dimension_semantics<parallel>], iteration_bounds = array<i64: 2>, scalar_prefetch = 0 : i64, scratch_operands = 0 : i64, tpu.core_type = #tpu.core_type<tc>, window_params = [{transform_indices = @transform_0, window_bounds = array<i64: 1, 1, 256>}, {pipeline_mode = #tpu.pipeline_mode<synchronous>, transform_indices = @transform_1, window_bounds = array<i64: 32, 9>}, {pipeline_mode = #tpu.pipeline_mode<synchronous>, transform_indices = @transform_2, window_bounds = array<i64: 32, 288>}, {pipeline_mode = #tpu.pipeline_mode<synchronous>, transform_indices = @transform_3, window_bounds = array<i64: 32, 288>}, {pipeline_mode = #tpu.pipeline_mode<synchronous>, transform_indices = @transform_4, window_bounds = array<i64: 32, 288>}, {pipeline_mode = #tpu.pipeline_mode<synchronous>, transform_indices = @transform_5, window_bounds = array<i64: 1, 288>}, {transform_indices = @transform_6, window_bounds = array<i64: 1, 1, 256>}]} {
    %0 = tpu.iota {dimensions = array<i32: 1>} : vector<1x256xi32>
    %c16_i32 = arith.constant 16 : i32
    %c0_i32 = arith.constant 0 : i32
    %1 = arith.cmpi eq, %c16_i32, %c0_i32 : i32
    %c1_i32 = arith.constant 1 : i32
    %2 = arith.select %1, %c1_i32, %c16_i32 : i32
    %3 = vector.broadcast %2 : i32 to vector<1x256xi32>
    %4 = arith.remsi %0, %3 : vector<1x256xi32>
    %c0_i32_0 = arith.constant 0 : i32
    %5 = vector.broadcast %c0_i32_0 : i32 to vector<1x256xi32>
    %6 = arith.cmpi ne, %4, %5 : vector<1x256xi32>
    %c0_i32_1 = arith.constant 0 : i32
    %7 = vector.broadcast %c0_i32_1 : i32 to vector<1x256xi32>
    %8 = arith.cmpi slt, %4, %7 : vector<1x256xi32>
    %c0_i32_2 = arith.constant 0 : i32
    %9 = arith.cmpi slt, %2, %c0_i32_2 : i32
    %10 = vector.broadcast %9 : i1 to vector<1x256xi1>
    %11 = vector.broadcast %10 : vector<1x256xi1> to vector<1x256xi1>
    %12 = arith.xori %8, %11 : vector<1x256xi1>
    %13 = arith.andi %12, %6 : vector<1x256xi1>
    %14 = vector.broadcast %2 : i32 to vector<1x256xi32>
    %15 = arith.addi %4, %14 : vector<1x256xi32>
    %16 = arith.select %13, %15, %4 : vector<1x256xi1>, vector<1x256xi32>
    %c1_i32_3 = arith.constant 1 : i32
    %17 = vector.broadcast %c1_i32_3 : i32 to vector<1x256xi32>
    %18 = arith.cmpi sge, %16, %17 : vector<1x256xi32>
    %c14_i32 = arith.constant 14 : i32
    %19 = vector.broadcast %c14_i32 : i32 to vector<1x256xi32>
    %20 = arith.cmpi sle, %16, %19 : vector<1x256xi32>
    %c0 = arith.constant 0 : index
    %c0_4 = arith.constant 0 : index
    %c0_5 = arith.constant 0 : index
    %21 = vector.load %arg1[%c0, %c0_4, %c0_5] : memref<1x1x256xf32, #tpu.memory_space<vmem>>, vector<1x1x256xf32>
    %22 = vector.shape_cast %21 : vector<1x1x256xf32> to vector<1x256xf32>
    %cst = arith.constant 0.000000e+00 : f32
    %23 = vector.broadcast %cst : f32 to vector<32x256xf32>
    %cst_6 = arith.constant 0.000000e+00 : f32
    %24 = vector.broadcast %cst_6 : f32 to vector<1x128xf32>
    %25 = tpu.concatenate %24, %22, %24 in 1 : vector<1x128xf32>, vector<1x256xf32>, vector<1x128xf32> -> vector<1x512xf32>
    %26 = vector.extract_strided_slice %25 {offsets = [0, 111], sizes = [1, 256], strides = [1, 1]} : vector<1x512xf32> to vector<1x256xf32>
    %cst_7 = arith.constant 0.000000e+00 : f32
    %27 = vector.broadcast %cst_7 : f32 to vector<1x256xf32>
    %28 = arith.select %18, %26, %27 : vector<1x256xi1>, vector<1x256xf32>
    %29 = vector.extract_strided_slice %25 {offsets = [0, 112], sizes = [1, 256], strides = [1, 1]} : vector<1x512xf32> to vector<1x256xf32>
    %30 = vector.extract_strided_slice %25 {offsets = [0, 113], sizes = [1, 256], strides = [1, 1]} : vector<1x512xf32> to vector<1x256xf32>
    %cst_8 = arith.constant 0.000000e+00 : f32
    %31 = vector.broadcast %cst_8 : f32 to vector<1x256xf32>
    %32 = arith.select %20, %30, %31 : vector<1x256xi1>, vector<1x256xf32>
    %33 = vector.extract_strided_slice %25 {offsets = [0, 127], sizes = [1, 256], strides = [1, 1]} : vector<1x512xf32> to vector<1x256xf32>
    %cst_9 = arith.constant 0.000000e+00 : f32
    %34 = vector.broadcast %cst_9 : f32 to vector<1x256xf32>
    %35 = arith.select %18, %33, %34 : vector<1x256xi1>, vector<1x256xf32>
    %36 = vector.extract_strided_slice %25 {offsets = [0, 128], sizes = [1, 256], strides = [1, 1]} : vector<1x512xf32> to vector<1x256xf32>
    %37 = vector.extract_strided_slice %25 {offsets = [0, 129], sizes = [1, 256], strides = [1, 1]} : vector<1x512xf32> to vector<1x256xf32>
    %cst_10 = arith.constant 0.000000e+00 : f32
    %38 = vector.broadcast %cst_10 : f32 to vector<1x256xf32>
    %39 = arith.select %20, %37, %38 : vector<1x256xi1>, vector<1x256xf32>
    %40 = vector.extract_strided_slice %25 {offsets = [0, 143], sizes = [1, 256], strides = [1, 1]} : vector<1x512xf32> to vector<1x256xf32>
    %cst_11 = arith.constant 0.000000e+00 : f32
    %41 = vector.broadcast %cst_11 : f32 to vector<1x256xf32>
    %42 = arith.select %18, %40, %41 : vector<1x256xi1>, vector<1x256xf32>
    %43 = vector.extract_strided_slice %25 {offsets = [0, 144], sizes = [1, 256], strides = [1, 1]} : vector<1x512xf32> to vector<1x256xf32>
    %44 = vector.extract_strided_slice %25 {offsets = [0, 145], sizes = [1, 256], strides = [1, 1]} : vector<1x512xf32> to vector<1x256xf32>
    %cst_12 = arith.constant 0.000000e+00 : f32
    %45 = vector.broadcast %cst_12 : f32 to vector<1x256xf32>
    %46 = arith.select %20, %44, %45 : vector<1x256xi1>, vector<1x256xf32>
    %c0_13 = arith.constant 0 : index
    %c0_14 = arith.constant 0 : index
    %47 = vector.load %arg2[%c0_13, %c0_14] : memref<32x9xf32, #tpu.memory_space<vmem>>, vector<32x1xf32>
    %48 = vector.broadcast %47 : vector<32x1xf32> to vector<32x256xf32>
    %49 = vector.broadcast %28 : vector<1x256xf32> to vector<32x256xf32>
    %50 = arith.mulf %48, %49 : vector<32x256xf32>
    %51 = arith.addf %23, %50 : vector<32x256xf32>
    %c0_15 = arith.constant 0 : index
    %c1 = arith.constant 1 : index
    %52 = vector.load %arg2[%c0_15, %c1] : memref<32x9xf32, #tpu.memory_space<vmem>>, vector<32x1xf32>
    %53 = vector.broadcast %52 : vector<32x1xf32> to vector<32x256xf32>
    %54 = vector.broadcast %29 : vector<1x256xf32> to vector<32x256xf32>
    %55 = arith.mulf %53, %54 : vector<32x256xf32>
    %56 = arith.addf %51, %55 : vector<32x256xf32>
    %c0_16 = arith.constant 0 : index
    %c2 = arith.constant 2 : index
    %57 = vector.load %arg2[%c0_16, %c2] : memref<32x9xf32, #tpu.memory_space<vmem>>, vector<32x1xf32>
    %58 = vector.broadcast %57 : vector<32x1xf32> to vector<32x256xf32>
    %59 = vector.broadcast %32 : vector<1x256xf32> to vector<32x256xf32>
    %60 = arith.mulf %58, %59 : vector<32x256xf32>
    %61 = arith.addf %56, %60 : vector<32x256xf32>
    %c0_17 = arith.constant 0 : index
    %c3 = arith.constant 3 : index
    %62 = vector.load %arg2[%c0_17, %c3] : memref<32x9xf32, #tpu.memory_space<vmem>>, vector<32x1xf32>
    %63 = vector.broadcast %62 : vector<32x1xf32> to vector<32x256xf32>
    %64 = vector.broadcast %35 : vector<1x256xf32> to vector<32x256xf32>
    %65 = arith.mulf %63, %64 : vector<32x256xf32>
    %66 = arith.addf %61, %65 : vector<32x256xf32>
    %c0_18 = arith.constant 0 : index
    %c4 = arith.constant 4 : index
    %67 = vector.load %arg2[%c0_18, %c4] : memref<32x9xf32, #tpu.memory_space<vmem>>, vector<32x1xf32>
    %68 = vector.broadcast %67 : vector<32x1xf32> to vector<32x256xf32>
    %69 = vector.broadcast %36 : vector<1x256xf32> to vector<32x256xf32>
    %70 = arith.mulf %68, %69 : vector<32x256xf32>
    %71 = arith.addf %66, %70 : vector<32x256xf32>
    %c0_19 = arith.constant 0 : index
    %c5 = arith.constant 5 : index
    %72 = vector.load %arg2[%c0_19, %c5] : memref<32x9xf32, #tpu.memory_space<vmem>>, vector<32x1xf32>
    %73 = vector.broadcast %72 : vector<32x1xf32> to vector<32x256xf32>
    %74 = vector.broadcast %39 : vector<1x256xf32> to vector<32x256xf32>
    %75 = arith.mulf %73, %74 : vector<32x256xf32>
    %76 = arith.addf %71, %75 : vector<32x256xf32>
    %c0_20 = arith.constant 0 : index
    %c6 = arith.constant 6 : index
    %77 = vector.load %arg2[%c0_20, %c6] : memref<32x9xf32, #tpu.memory_space<vmem>>, vector<32x1xf32>
    %78 = vector.broadcast %77 : vector<32x1xf32> to vector<32x256xf32>
    %79 = vector.broadcast %42 : vector<1x256xf32> to vector<32x256xf32>
    %80 = arith.mulf %78, %79 : vector<32x256xf32>
    %81 = arith.addf %76, %80 : vector<32x256xf32>
    %c0_21 = arith.constant 0 : index
    %c7 = arith.constant 7 : index
    %82 = vector.load %arg2[%c0_21, %c7] : memref<32x9xf32, #tpu.memory_space<vmem>>, vector<32x1xf32>
    %83 = vector.broadcast %82 : vector<32x1xf32> to vector<32x256xf32>
    %84 = vector.broadcast %43 : vector<1x256xf32> to vector<32x256xf32>
    %85 = arith.mulf %83, %84 : vector<32x256xf32>
    %86 = arith.addf %81, %85 : vector<32x256xf32>
    %c0_22 = arith.constant 0 : index
    %c8 = arith.constant 8 : index
    %87 = vector.load %arg2[%c0_22, %c8] : memref<32x9xf32, #tpu.memory_space<vmem>>, vector<32x1xf32>
    %88 = vector.broadcast %87 : vector<32x1xf32> to vector<32x256xf32>
    %89 = vector.broadcast %46 : vector<1x256xf32> to vector<32x256xf32>
    %90 = arith.mulf %88, %89 : vector<32x256xf32>
    %91 = arith.addf %86, %90 : vector<32x256xf32>
    %cst_23 = arith.constant 0.000000e+00 : f32
    %92 = vector.broadcast %cst_23 : f32 to vector<32x256xf32>
    %93 = arith.maximumf %91, %92 : vector<32x256xf32>
    %cst_24 = arith.constant 0.000000e+00 : f32
    %94 = vector.broadcast %cst_24 : f32 to vector<32x128xf32>
    %95 = tpu.concatenate %94, %93, %94 in 1 : vector<32x128xf32>, vector<32x256xf32>, vector<32x128xf32> -> vector<32x512xf32>
    %96 = vector.extract_strided_slice %95 {offsets = [0, 111], sizes = [32, 256], strides = [1, 1]} : vector<32x512xf32> to vector<32x256xf32>
    %cst_25 = arith.constant 0.000000e+00 : f32
    %97 = vector.shape_cast %18 : vector<1x256xi1> to vector<1x256xi1>
    %98 = vector.broadcast %97 : vector<1x256xi1> to vector<32x256xi1>
    %99 = vector.broadcast %cst_25 : f32 to vector<32x256xf32>
    %100 = arith.select %98, %96, %99 : vector<32x256xi1>, vector<32x256xf32>
    %101 = vector.extract_strided_slice %95 {offsets = [0, 112], sizes = [32, 256], strides = [1, 1]} : vector<32x512xf32> to vector<32x256xf32>
    %102 = vector.extract_strided_slice %95 {offsets = [0, 113], sizes = [32, 256], strides = [1, 1]} : vector<32x512xf32> to vector<32x256xf32>
    %cst_26 = arith.constant 0.000000e+00 : f32
    %103 = vector.shape_cast %20 : vector<1x256xi1> to vector<1x256xi1>
    %104 = vector.broadcast %103 : vector<1x256xi1> to vector<32x256xi1>
    %105 = vector.broadcast %cst_26 : f32 to vector<32x256xf32>
    %106 = arith.select %104, %102, %105 : vector<32x256xi1>, vector<32x256xf32>
    %107 = vector.extract_strided_slice %95 {offsets = [0, 127], sizes = [32, 256], strides = [1, 1]} : vector<32x512xf32> to vector<32x256xf32>
    %cst_27 = arith.constant 0.000000e+00 : f32
    %108 = vector.shape_cast %18 : vector<1x256xi1> to vector<1x256xi1>
    %109 = vector.broadcast %108 : vector<1x256xi1> to vector<32x256xi1>
    %110 = vector.broadcast %cst_27 : f32 to vector<32x256xf32>
    %111 = arith.select %109, %107, %110 : vector<32x256xi1>, vector<32x256xf32>
    %112 = vector.extract_strided_slice %95 {offsets = [0, 128], sizes = [32, 256], strides = [1, 1]} : vector<32x512xf32> to vector<32x256xf32>
    %113 = vector.extract_strided_slice %95 {offsets = [0, 129], sizes = [32, 256], strides = [1, 1]} : vector<32x512xf32> to vector<32x256xf32>
    %cst_28 = arith.constant 0.000000e+00 : f32
    %114 = vector.shape_cast %20 : vector<1x256xi1> to vector<1x256xi1>
    %115 = vector.broadcast %114 : vector<1x256xi1> to vector<32x256xi1>
    %116 = vector.broadcast %cst_28 : f32 to vector<32x256xf32>
    %117 = arith.select %115, %113, %116 : vector<32x256xi1>, vector<32x256xf32>
    %118 = vector.extract_strided_slice %95 {offsets = [0, 143], sizes = [32, 256], strides = [1, 1]} : vector<32x512xf32> to vector<32x256xf32>
    %cst_29 = arith.constant 0.000000e+00 : f32
    %119 = vector.shape_cast %18 : vector<1x256xi1> to vector<1x256xi1>
    %120 = vector.broadcast %119 : vector<1x256xi1> to vector<32x256xi1>
    %121 = vector.broadcast %cst_29 : f32 to vector<32x256xf32>
    %122 = arith.select %120, %118, %121 : vector<32x256xi1>, vector<32x256xf32>
    %123 = vector.extract_strided_slice %95 {offsets = [0, 144], sizes = [32, 256], strides = [1, 1]} : vector<32x512xf32> to vector<32x256xf32>
    %124 = vector.extract_strided_slice %95 {offsets = [0, 145], sizes = [32, 256], strides = [1, 1]} : vector<32x512xf32> to vector<32x256xf32>
    %cst_30 = arith.constant 0.000000e+00 : f32
    %125 = vector.shape_cast %20 : vector<1x256xi1> to vector<1x256xi1>
    %126 = vector.broadcast %125 : vector<1x256xi1> to vector<32x256xi1>
    %127 = vector.broadcast %cst_30 : f32 to vector<32x256xf32>
    %128 = arith.select %126, %124, %127 : vector<32x256xi1>, vector<32x256xf32>
    %129 = tpu.concatenate %100, %101, %106, %111, %112, %117, %122, %123, %128 in 0 : vector<32x256xf32>, vector<32x256xf32>, vector<32x256xf32>, vector<32x256xf32>, vector<32x256xf32>, vector<32x256xf32>, vector<32x256xf32>, vector<32x256xf32>, vector<32x256xf32> -> vector<288x256xf32>
    %c0_31 = arith.constant 0 : index
    %c0_32 = arith.constant 0 : index
    %130 = vector.load %arg3[%c0_31, %c0_32] : memref<32x288xf32, #tpu.memory_space<vmem>>, vector<32x288xf32>
    %cst_33 = arith.constant dense<0.000000e+00> : vector<32x256xf32>
    %131 = tpu.matmul %130, %129, %cst_33 {dimension_numbers = #tpu.dot_dimension_numbers<[1], [0], [0], [1], [0, 0, 1, 1], [], []>} : vector<32x288xf32>, vector<288x256xf32>, vector<32x256xf32> -> vector<32x256xf32>
    %cst_34 = arith.constant 0.000000e+00 : f32
    %132 = vector.broadcast %cst_34 : f32 to vector<32x256xf32>
    %133 = arith.maximumf %131, %132 : vector<32x256xf32>
    %cst_35 = arith.constant 0.000000e+00 : f32
    %134 = vector.broadcast %cst_35 : f32 to vector<32x128xf32>
    %135 = tpu.concatenate %134, %133, %134 in 1 : vector<32x128xf32>, vector<32x256xf32>, vector<32x128xf32> -> vector<32x512xf32>
    %136 = vector.extract_strided_slice %135 {offsets = [0, 111], sizes = [32, 256], strides = [1, 1]} : vector<32x512xf32> to vector<32x256xf32>
    %cst_36 = arith.constant 0.000000e+00 : f32
    %137 = vector.shape_cast %18 : vector<1x256xi1> to vector<1x256xi1>
    %138 = vector.broadcast %137 : vector<1x256xi1> to vector<32x256xi1>
    %139 = vector.broadcast %cst_36 : f32 to vector<32x256xf32>
    %140 = arith.select %138, %136, %139 : vector<32x256xi1>, vector<32x256xf32>
    %141 = vector.extract_strided_slice %135 {offsets = [0, 112], sizes = [32, 256], strides = [1, 1]} : vector<32x512xf32> to vector<32x256xf32>
    %142 = vector.extract_strided_slice %135 {offsets = [0, 113], sizes = [32, 256], strides = [1, 1]} : vector<32x512xf32> to vector<32x256xf32>
    %cst_37 = arith.constant 0.000000e+00 : f32
    %143 = vector.shape_cast %20 : vector<1x256xi1> to vector<1x256xi1>
    %144 = vector.broadcast %143 : vector<1x256xi1> to vector<32x256xi1>
    %145 = vector.broadcast %cst_37 : f32 to vector<32x256xf32>
    %146 = arith.select %144, %142, %145 : vector<32x256xi1>, vector<32x256xf32>
    %147 = vector.extract_strided_slice %135 {offsets = [0, 127], sizes = [32, 256], strides = [1, 1]} : vector<32x512xf32> to vector<32x256xf32>
    %cst_38 = arith.constant 0.000000e+00 : f32
    %148 = vector.shape_cast %18 : vector<1x256xi1> to vector<1x256xi1>
    %149 = vector.broadcast %148 : vector<1x256xi1> to vector<32x256xi1>
    %150 = vector.broadcast %cst_38 : f32 to vector<32x256xf32>
    %151 = arith.select %149, %147, %150 : vector<32x256xi1>, vector<32x256xf32>
    %152 = vector.extract_strided_slice %135 {offsets = [0, 128], sizes = [32, 256], strides = [1, 1]} : vector<32x512xf32> to vector<32x256xf32>
    %153 = vector.extract_strided_slice %135 {offsets = [0, 129], sizes = [32, 256], strides = [1, 1]} : vector<32x512xf32> to vector<32x256xf32>
    %cst_39 = arith.constant 0.000000e+00 : f32
    %154 = vector.shape_cast %20 : vector<1x256xi1> to vector<1x256xi1>
    %155 = vector.broadcast %154 : vector<1x256xi1> to vector<32x256xi1>
    %156 = vector.broadcast %cst_39 : f32 to vector<32x256xf32>
    %157 = arith.select %155, %153, %156 : vector<32x256xi1>, vector<32x256xf32>
    %158 = vector.extract_strided_slice %135 {offsets = [0, 143], sizes = [32, 256], strides = [1, 1]} : vector<32x512xf32> to vector<32x256xf32>
    %cst_40 = arith.constant 0.000000e+00 : f32
    %159 = vector.shape_cast %18 : vector<1x256xi1> to vector<1x256xi1>
    %160 = vector.broadcast %159 : vector<1x256xi1> to vector<32x256xi1>
    %161 = vector.broadcast %cst_40 : f32 to vector<32x256xf32>
    %162 = arith.select %160, %158, %161 : vector<32x256xi1>, vector<32x256xf32>
    %163 = vector.extract_strided_slice %135 {offsets = [0, 144], sizes = [32, 256], strides = [1, 1]} : vector<32x512xf32> to vector<32x256xf32>
    %164 = vector.extract_strided_slice %135 {offsets = [0, 145], sizes = [32, 256], strides = [1, 1]} : vector<32x512xf32> to vector<32x256xf32>
    %cst_41 = arith.constant 0.000000e+00 : f32
    %165 = vector.shape_cast %20 : vector<1x256xi1> to vector<1x256xi1>
    %166 = vector.broadcast %165 : vector<1x256xi1> to vector<32x256xi1>
    %167 = vector.broadcast %cst_41 : f32 to vector<32x256xf32>
    %168 = arith.select %166, %164, %167 : vector<32x256xi1>, vector<32x256xf32>
    %169 = tpu.concatenate %140, %141, %146, %151, %152, %157, %162, %163, %168 in 0 : vector<32x256xf32>, vector<32x256xf32>, vector<32x256xf32>, vector<32x256xf32>, vector<32x256xf32>, vector<32x256xf32>, vector<32x256xf32>, vector<32x256xf32>, vector<32x256xf32> -> vector<288x256xf32>
    %c0_42 = arith.constant 0 : index
    %c0_43 = arith.constant 0 : index
    %170 = vector.load %arg4[%c0_42, %c0_43] : memref<32x288xf32, #tpu.memory_space<vmem>>, vector<32x288xf32>
    %cst_44 = arith.constant dense<0.000000e+00> : vector<32x256xf32>
    %171 = tpu.matmul %170, %169, %cst_44 {dimension_numbers = #tpu.dot_dimension_numbers<[1], [0], [0], [1], [0, 0, 1, 1], [], []>} : vector<32x288xf32>, vector<288x256xf32>, vector<32x256xf32> -> vector<32x256xf32>
    %cst_45 = arith.constant 0.000000e+00 : f32
    %172 = vector.broadcast %cst_45 : f32 to vector<32x256xf32>
    %173 = arith.maximumf %171, %172 : vector<32x256xf32>
    %cst_46 = arith.constant 0.000000e+00 : f32
    %174 = vector.broadcast %cst_46 : f32 to vector<32x128xf32>
    %175 = tpu.concatenate %174, %173, %174 in 1 : vector<32x128xf32>, vector<32x256xf32>, vector<32x128xf32> -> vector<32x512xf32>
    %176 = vector.extract_strided_slice %175 {offsets = [0, 111], sizes = [32, 256], strides = [1, 1]} : vector<32x512xf32> to vector<32x256xf32>
    %cst_47 = arith.constant 0.000000e+00 : f32
    %177 = vector.shape_cast %18 : vector<1x256xi1> to vector<1x256xi1>
    %178 = vector.broadcast %177 : vector<1x256xi1> to vector<32x256xi1>
    %179 = vector.broadcast %cst_47 : f32 to vector<32x256xf32>
    %180 = arith.select %178, %176, %179 : vector<32x256xi1>, vector<32x256xf32>
    %181 = vector.extract_strided_slice %175 {offsets = [0, 112], sizes = [32, 256], strides = [1, 1]} : vector<32x512xf32> to vector<32x256xf32>
    %182 = vector.extract_strided_slice %175 {offsets = [0, 113], sizes = [32, 256], strides = [1, 1]} : vector<32x512xf32> to vector<32x256xf32>
    %cst_48 = arith.constant 0.000000e+00 : f32
    %183 = vector.shape_cast %20 : vector<1x256xi1> to vector<1x256xi1>
    %184 = vector.broadcast %183 : vector<1x256xi1> to vector<32x256xi1>
    %185 = vector.broadcast %cst_48 : f32 to vector<32x256xf32>
    %186 = arith.select %184, %182, %185 : vector<32x256xi1>, vector<32x256xf32>
    %187 = vector.extract_strided_slice %175 {offsets = [0, 127], sizes = [32, 256], strides = [1, 1]} : vector<32x512xf32> to vector<32x256xf32>
    %cst_49 = arith.constant 0.000000e+00 : f32
    %188 = vector.shape_cast %18 : vector<1x256xi1> to vector<1x256xi1>
    %189 = vector.broadcast %188 : vector<1x256xi1> to vector<32x256xi1>
    %190 = vector.broadcast %cst_49 : f32 to vector<32x256xf32>
    %191 = arith.select %189, %187, %190 : vector<32x256xi1>, vector<32x256xf32>
    %192 = vector.extract_strided_slice %175 {offsets = [0, 128], sizes = [32, 256], strides = [1, 1]} : vector<32x512xf32> to vector<32x256xf32>
    %193 = vector.extract_strided_slice %175 {offsets = [0, 129], sizes = [32, 256], strides = [1, 1]} : vector<32x512xf32> to vector<32x256xf32>
    %cst_50 = arith.constant 0.000000e+00 : f32
    %194 = vector.shape_cast %20 : vector<1x256xi1> to vector<1x256xi1>
    %195 = vector.broadcast %194 : vector<1x256xi1> to vector<32x256xi1>
    %196 = vector.broadcast %cst_50 : f32 to vector<32x256xf32>
    %197 = arith.select %195, %193, %196 : vector<32x256xi1>, vector<32x256xf32>
    %198 = vector.extract_strided_slice %175 {offsets = [0, 143], sizes = [32, 256], strides = [1, 1]} : vector<32x512xf32> to vector<32x256xf32>
    %cst_51 = arith.constant 0.000000e+00 : f32
    %199 = vector.shape_cast %18 : vector<1x256xi1> to vector<1x256xi1>
    %200 = vector.broadcast %199 : vector<1x256xi1> to vector<32x256xi1>
    %201 = vector.broadcast %cst_51 : f32 to vector<32x256xf32>
    %202 = arith.select %200, %198, %201 : vector<32x256xi1>, vector<32x256xf32>
    %203 = vector.extract_strided_slice %175 {offsets = [0, 144], sizes = [32, 256], strides = [1, 1]} : vector<32x512xf32> to vector<32x256xf32>
    %204 = vector.extract_strided_slice %175 {offsets = [0, 145], sizes = [32, 256], strides = [1, 1]} : vector<32x512xf32> to vector<32x256xf32>
    %cst_52 = arith.constant 0.000000e+00 : f32
    %205 = vector.shape_cast %20 : vector<1x256xi1> to vector<1x256xi1>
    %206 = vector.broadcast %205 : vector<1x256xi1> to vector<32x256xi1>
    %207 = vector.broadcast %cst_52 : f32 to vector<32x256xf32>
    %208 = arith.select %206, %204, %207 : vector<32x256xi1>, vector<32x256xf32>
    %209 = tpu.concatenate %180, %181, %186, %191, %192, %197, %202, %203, %208 in 0 : vector<32x256xf32>, vector<32x256xf32>, vector<32x256xf32>, vector<32x256xf32>, vector<32x256xf32>, vector<32x256xf32>, vector<32x256xf32>, vector<32x256xf32>, vector<32x256xf32> -> vector<288x256xf32>
    %c0_53 = arith.constant 0 : index
    %c0_54 = arith.constant 0 : index
    %210 = vector.load %arg5[%c0_53, %c0_54] : memref<32x288xf32, #tpu.memory_space<vmem>>, vector<32x288xf32>
    %cst_55 = arith.constant dense<0.000000e+00> : vector<32x256xf32>
    %211 = tpu.matmul %210, %209, %cst_55 {dimension_numbers = #tpu.dot_dimension_numbers<[1], [0], [0], [1], [0, 0, 1, 1], [], []>} : vector<32x288xf32>, vector<288x256xf32>, vector<32x256xf32> -> vector<32x256xf32>
    %cst_56 = arith.constant 0.000000e+00 : f32
    %212 = vector.broadcast %cst_56 : f32 to vector<32x256xf32>
    %213 = arith.maximumf %211, %212 : vector<32x256xf32>
    %cst_57 = arith.constant 0.000000e+00 : f32
    %214 = vector.broadcast %cst_57 : f32 to vector<32x128xf32>
    %215 = tpu.concatenate %214, %213, %214 in 1 : vector<32x128xf32>, vector<32x256xf32>, vector<32x128xf32> -> vector<32x512xf32>
    %216 = vector.extract_strided_slice %215 {offsets = [0, 111], sizes = [32, 256], strides = [1, 1]} : vector<32x512xf32> to vector<32x256xf32>
    %cst_58 = arith.constant 0.000000e+00 : f32
    %217 = vector.shape_cast %18 : vector<1x256xi1> to vector<1x256xi1>
    %218 = vector.broadcast %217 : vector<1x256xi1> to vector<32x256xi1>
    %219 = vector.broadcast %cst_58 : f32 to vector<32x256xf32>
    %220 = arith.select %218, %216, %219 : vector<32x256xi1>, vector<32x256xf32>
    %221 = vector.extract_strided_slice %215 {offsets = [0, 112], sizes = [32, 256], strides = [1, 1]} : vector<32x512xf32> to vector<32x256xf32>
    %222 = vector.extract_strided_slice %215 {offsets = [0, 113], sizes = [32, 256], strides = [1, 1]} : vector<32x512xf32> to vector<32x256xf32>
    %cst_59 = arith.constant 0.000000e+00 : f32
    %223 = vector.shape_cast %20 : vector<1x256xi1> to vector<1x256xi1>
    %224 = vector.broadcast %223 : vector<1x256xi1> to vector<32x256xi1>
    %225 = vector.broadcast %cst_59 : f32 to vector<32x256xf32>
    %226 = arith.select %224, %222, %225 : vector<32x256xi1>, vector<32x256xf32>
    %227 = vector.extract_strided_slice %215 {offsets = [0, 127], sizes = [32, 256], strides = [1, 1]} : vector<32x512xf32> to vector<32x256xf32>
    %cst_60 = arith.constant 0.000000e+00 : f32
    %228 = vector.shape_cast %18 : vector<1x256xi1> to vector<1x256xi1>
    %229 = vector.broadcast %228 : vector<1x256xi1> to vector<32x256xi1>
    %230 = vector.broadcast %cst_60 : f32 to vector<32x256xf32>
    %231 = arith.select %229, %227, %230 : vector<32x256xi1>, vector<32x256xf32>
    %232 = vector.extract_strided_slice %215 {offsets = [0, 128], sizes = [32, 256], strides = [1, 1]} : vector<32x512xf32> to vector<32x256xf32>
    %233 = vector.extract_strided_slice %215 {offsets = [0, 129], sizes = [32, 256], strides = [1, 1]} : vector<32x512xf32> to vector<32x256xf32>
    %cst_61 = arith.constant 0.000000e+00 : f32
    %234 = vector.shape_cast %20 : vector<1x256xi1> to vector<1x256xi1>
    %235 = vector.broadcast %234 : vector<1x256xi1> to vector<32x256xi1>
    %236 = vector.broadcast %cst_61 : f32 to vector<32x256xf32>
    %237 = arith.select %235, %233, %236 : vector<32x256xi1>, vector<32x256xf32>
    %238 = vector.extract_strided_slice %215 {offsets = [0, 143], sizes = [32, 256], strides = [1, 1]} : vector<32x512xf32> to vector<32x256xf32>
    %cst_62 = arith.constant 0.000000e+00 : f32
    %239 = vector.shape_cast %18 : vector<1x256xi1> to vector<1x256xi1>
    %240 = vector.broadcast %239 : vector<1x256xi1> to vector<32x256xi1>
    %241 = vector.broadcast %cst_62 : f32 to vector<32x256xf32>
    %242 = arith.select %240, %238, %241 : vector<32x256xi1>, vector<32x256xf32>
    %243 = vector.extract_strided_slice %215 {offsets = [0, 144], sizes = [32, 256], strides = [1, 1]} : vector<32x512xf32> to vector<32x256xf32>
    %244 = vector.extract_strided_slice %215 {offsets = [0, 145], sizes = [32, 256], strides = [1, 1]} : vector<32x512xf32> to vector<32x256xf32>
    %cst_63 = arith.constant 0.000000e+00 : f32
    %245 = vector.shape_cast %20 : vector<1x256xi1> to vector<1x256xi1>
    %246 = vector.broadcast %245 : vector<1x256xi1> to vector<32x256xi1>
    %247 = vector.broadcast %cst_63 : f32 to vector<32x256xf32>
    %248 = arith.select %246, %244, %247 : vector<32x256xi1>, vector<32x256xf32>
    %249 = tpu.concatenate %220, %221, %226, %231, %232, %237, %242, %243, %248 in 0 : vector<32x256xf32>, vector<32x256xf32>, vector<32x256xf32>, vector<32x256xf32>, vector<32x256xf32>, vector<32x256xf32>, vector<32x256xf32>, vector<32x256xf32>, vector<32x256xf32> -> vector<288x256xf32>
    %c0_64 = arith.constant 0 : index
    %c0_65 = arith.constant 0 : index
    %250 = vector.load %arg6[%c0_64, %c0_65] : memref<1x288xf32, #tpu.memory_space<vmem>>, vector<1x288xf32>
    %cst_66 = arith.constant dense<0.000000e+00> : vector<1x256xf32>
    %251 = tpu.matmul %250, %249, %cst_66 {dimension_numbers = #tpu.dot_dimension_numbers<[1], [0], [0], [1], [0, 0, 1, 1], [], []>} : vector<1x288xf32>, vector<288x256xf32>, vector<1x256xf32> -> vector<1x256xf32>
    %c0_67 = arith.constant 0 : index
    %c0_68 = arith.constant 0 : index
    %c0_69 = arith.constant 0 : index
    %252 = vector.load %arg7[%c0_67, %c0_68, %c0_69] : memref<1x1x256xf32, #tpu.memory_space<vmem>>, vector<1x1x256xf32>
    %253 = vector.shape_cast %252 : vector<1x1x256xf32> to vector<1x256xf32>
    %254 = vector.shape_cast %251 : vector<1x256xf32> to vector<1x1x256xf32>
    tpu.vector_store %arg7[%c0_67, %c0_68, %c0_69], %254 {strides = array<i32>} : memref<1x1x256xf32, #tpu.memory_space<vmem>>, vector<1x1x256xf32>,
    return
  }
  func.func @transform_0(%arg0: i32) -> (i32, i32, i32) {
    %c0_i32 = arith.constant 0 : i32
    %c0_i32_0 = arith.constant 0 : i32
    %c0_i32_1 = arith.constant 0 : i32
    return %arg0, %c0_i32, %c0_i32_0 : i32, i32, i32
  }
  func.func @transform_1(%arg0: i32) -> (i32, i32) {
    %c0_i32 = arith.constant 0 : i32
    %c0_i32_0 = arith.constant 0 : i32
    %c0_i32_1 = arith.constant 0 : i32
    return %c0_i32, %c0_i32_0 : i32, i32
  }
  func.func @transform_2(%arg0: i32) -> (i32, i32) {
    %c0_i32 = arith.constant 0 : i32
    %c0_i32_0 = arith.constant 0 : i32
    %c0_i32_1 = arith.constant 0 : i32
    return %c0_i32, %c0_i32_0 : i32, i32
  }
  func.func @transform_3(%arg0: i32) -> (i32, i32) {
    %c0_i32 = arith.constant 0 : i32
    %c0_i32_0 = arith.constant 0 : i32
    %c0_i32_1 = arith.constant 0 : i32
    return %c0_i32, %c0_i32_0 : i32, i32
  }
  func.func @transform_4(%arg0: i32) -> (i32, i32) {
    %c0_i32 = arith.constant 0 : i32
    %c0_i32_0 = arith.constant 0 : i32
    %c0_i32_1 = arith.constant 0 : i32
    return %c0_i32, %c0_i32_0 : i32, i32
  }
  func.func @transform_5(%arg0: i32) -> (i32, i32) {
    %c0_i32 = arith.constant 0 : i32
    %c0_i32_0 = arith.constant 0 : i32
    %c0_i32_1 = arith.constant 0 : i32
    return %c0_i32, %c0_i32_0 : i32, i32
  }
  func.func @transform_6(%arg0: i32) -> (i32, i32, i32) {
    %c0_i32 = arith.constant 0 : i32
    %c0_i32_0 = arith.constant 0 : i32
    %c0_i32_1 = arith.constant 0 : i32
    return %arg0, %c0_i32, %c0_i32_0 : i32, i32, i32
  }
}

</mosaic_0001>

<bundles_post_ra>
// kernel: five_layer_cnn_maml_forward.1
= control target key start
LH: loop header
LB: loop body
LE: loop exit
PB: predicated region body
PF: predicated region fallthrough
CT: control target
= control target key end

     0   :  { %s4350_s21 = smov 0   ;;  %s5983_s0 = inlined_call_operand.vmem [shape: f32[2,1,256], index: 0, kind: input, shape index: {}]   ;;  %s5984_s1 = inlined_call_operand.vmem [shape: f32[32,9], index: 1, kind: input, shape index: {}]   ;;  %s5985_s2 = inlined_call_operand.vmem [shape: f32[32,288], index: 2, kind: input, shape index: {}]   ;;  %s5986_s3 = inlined_call_operand.vmem [shape: f32[32,288], index: 3, kind: input, shape index: {}]   ;;  %s5987_s4 = inlined_call_operand.vmem [shape: f32[32,288], index: 4, kind: input, shape index: {}]   ;;  %s5988_s5 = inlined_call_operand.vmem [shape: f32[1,288], index: 5, kind: input, shape index: {}]   ;;  %s5989_s6 = inlined_call_operand.vmem [shape: f32[2,1,256], index: 6, kind: output, shape index: {}]  }
   0x1 LB: > { %s2973_s22 = sadd.s32 4294967295, %s4294_s21   ;;  %p2977_p0 = scmp.ge.s32.totalorder %s4294_s21, 1  ;;  %s4294_s21 = sphi %s4350_s21, %s16_s21  }
   0x2   : > { %p211_p1 = scmp.lt.s32.totalorder %s4294_s21, 3 }
   0x4   : > { %p212_p2 = pnand %p2977_p0, %p211_p1 }
   0x6   : > { %215 = sbr.rel (%p212_p2) target bundleno = 2016 (0x7e0), region = 44 }
   0xd   : > { %v4361_v0 = vld [vmem:[%s5984_s1 + $0x10] sm:$0xff]  ;;  %v4366_v1 = vld [vmem:[%s5984_s1] sm:$0xff]  ;;  %v4296_v2 = vmov 1   ;;  %v4373_v3 = vld [vmem:[%s5984_s1 + $0x18] sm:$0xff]  ;;  %v5992_v5 = vmov 0.0   ;;  %p239_p3 = scmp.lt.s32.totalorder %s2973_s22, 1  ;;  %v5990_v7 = vlaneseq }
   0xe   : > { %3625 = vset.pattern.permute.xlu1 %v4296_v2  ;;  %3624 = vset.pattern.permute.xlu0 %v4296_v2  ;;  %v4378_v4 = vld [vmem:[%s5984_s1 + $0x8] sm:$0xff]  ;;  %v4298_v6 = vmov 7   ;;  %v4299_v9 = vmov 0   ;;  %v4300_v12 = vmov 2   ;;  %s4301_s11 = smov 17   ;;  %s4302_s12 = smov 15  }
   0xf   : > { %426 = vperm.xlu1 %3625, %v4361_v0   ;;  %418 = vperm.xlu0 %3624, %v4366_v1   ;;  %s6046_s22 = smov (!%p239_p3, %s2973_s22), 1  ;;  %v4391_v8 = vshrl.u32 %v5990_v7, 7  ;;  %v4303_v16 = vmov 3   ;;  %s4304_s13 = smov 1   ;;  %v4305_v17 = vmov 4   ;;  %v4307_v18 = vmov 5  }
  0x10   : > { %1348 = vmatprep.mubr.f32.mxu1 %v5992_v5  ;;  %s2978_s7 = sshll.u32 %s6046_s22, 1  ;;  %s4306_s14 = smov 127   ;;  %v4308_v19 = vmov 6   ;;  %v4310_v20 = vmov 8   ;;  %vm297_vm0 = vcmask 138240   ;;  %vm310_vm3 = vcmask 121856  }
  0x11   : > { %6008 = vst [vmem:[#allocation2_spill] sm:$0xff] %v4391_v8  ;;  %s242_s10 = scalar_lea.vmem %s5983_s0, %s2978_s7  ;;  %v5991_v10 = vsub.s32 1, %v4391_v8  ;;  %v4409_v14 = vsub.s32 0, %v4391_v8  ;;  %s4309_s15 = smov 113   ;;  %vm323_vm6 = vcmask 7168   ;;  %vm492_vm7 = vcmask 130048  }
  0x12   : > { %v278_v11 = vld [vmem:[%s242_s10] sm:$0x3]  ;;  %s4311_s16 = smov 16   ;;  %s4312_s17 = smov 111   ;;  %vm336_vm8 = vcmask 1039360   ;;  %vm349_vm9 = vcmask 924672  }
  0x13   : > { %430 = vperm.xlu1 %3625, %v4373_v3   ;;  %422 = vperm.xlu0 %3624, %v4378_v4   ;;  %v4405_v13 = vrot.slane %v278_v11, %v5991_v10  ;;  %v4415_v15 = vrot.slane %v278_v11, %v4409_v14  ;;  %s4313_s18 = smov 112   ;;  %vm362_vm10 = vcmask 908288   ;;  %vm773_vm11 = vcmask 916480  }
  0x15   : > { %v4464_v21 = vrot.slane %v4415_v15, %v4409_v14  ;;  %v4468_v24 = vrot.slane %v4405_v13, %v4409_v14 }
  0x17   : > { %3627 = vset.pattern.permute.xlu1 %v4298_v6  ;;  %3626 = vset.pattern.permute.xlu0 %v4298_v6 }
  0x18   : > { %714 = vperm.xlu1 %3627, %v4378_v4   ;;  %710 = vperm.xlu0 %3626, %v4366_v1  }
  0x1c   : > { %718 = vperm.xlu1 %3627, %v4361_v0   ;;  %722 = vperm.xlu0 %3626, %v4373_v3  }
  0x20   : > { %3628 = vset.pattern.permute.xlu1 %v4299_v9  ;;  %3629 = vset.pattern.permute.xlu0 %v4299_v9 }
  0x21   : > { %375 = vperm.xlu1 %3628, %v4366_v1   ;;  %380 = vperm.xlu0 %3629, %v4378_v4  }
  0x25   : > { %3630 = vset.pattern.permute.xlu1 %v4300_v12  ;;  %291 = vrot.lane.b32.xlu0 %v5992_v5, %s4301_s11 }
  0x26   : > { %518 = vperm.xlu1 %3630, %v4366_v1  }
  0x29   : > { %295 = vrot.lane.b32.xlu0 %v4405_v13, %s4301_s11 }
  0x2a   : > { %522 = vperm.xlu1 %3630, %v4378_v4  }
  0x2d   : > { %390 = vperm.xlu0 %3629, %v4373_v3  }
  0x2e   : > { %293 = vrot.lane.b32.xlu1 %v4415_v15, %s4301_s11 }
  0x2f   : > { %3631 = vset.pattern.permute.xlu1 %v4299_v9 }
  0x31   : > { %308 = vrot.lane.b32.xlu0 %v4405_v13, %s4302_s12 }
  0x32   : > { %385 = vperm.xlu1 %3631, %v4361_v0   ;;  %3634 = vset.pattern.permute.xlu0 %v4300_v12 }
  0x35   : > { %530 = vperm.xlu0 %3634, %v4373_v3  }
  0x36   : > { %3632 = vset.pattern.permute.xlu1 %v4303_v16 }
  0x37   : > { %558 = vperm.xlu1 %3632, %v4366_v1  }
  0x39   : > { %3635 = vset.pattern.permute.xlu0 %v4303_v16 }
  0x3a   : > { %562 = vperm.xlu0 %3635, %v4378_v4  }
  0x3b   : > { %304 = vrot.lane.b32.xlu1 %v5992_v5, %s4302_s12 }
  0x3c   : > { %3633 = vset.pattern.permute.xlu1 %v4300_v12 }
  0x3e   : > { %317 = vrot.lane.b32.xlu0 %v5992_v5, %s4304_s13 }
  0x3f   : > { %306 = vrot.lane.b32.xlu1 %v4415_v15, %s4302_s12 }
  0x42   : > { %321 = vrot.lane.b32.xlu0 %v4405_v13, %s4304_s13 }
  0x43   : > { %526 = vperm.xlu1 %3633, %v4361_v0  }
  0x46   : > { %570 = vperm.xlu0 %3635, %v4373_v3  }
  0x47   : > { %3636 = vset.pattern.permute.xlu1 %v4305_v17 }
  0x48   : > { %598 = vperm.xlu1 %3636, %v4366_v1  }
  0x4a   : > { %3639 = vset.pattern.permute.xlu0 %v4305_v17 }
  0x4b   : > { %606 = vperm.xlu0 %3639, %v4361_v0  }
  0x4c   : > { %602 = vperm.xlu1 %3636, %v4378_v4  }
  0x4f   : > { %334 = vrot.lane.b32.xlu0 %v5992_v5, %s4306_s14 }
  0x50   : > { %319 = vrot.lane.b32.xlu1 %v4415_v15, %s4304_s13  ;;  %3643 = vset.pattern.permute.xlu0 %v4307_v18 }
  0x51   : > { %3637 = vset.pattern.permute.xlu1 %v4303_v16 }
  0x53   : > { %642 = vperm.xlu0 %3643, %v4373_v3  }
  0x54   : > { %566 = vperm.xlu1 %3637, %v4361_v0  }
  0x57   : > { %3644 = vset.pattern.permute.xlu0 %v4308_v19 }
  0x58   : > { %3638 = vset.pattern.permute.xlu1 %v4307_v18  ;;  %674 = vperm.xlu0 %3644, %v4378_v4  }
  0x59   : > { %630 = vperm.xlu1 %3638, %v4366_v1  }
  0x5c   : > { %347 = vrot.lane.b32.xlu0 %v5992_v5, %s4309_s15 }
  0x5d   : > { %634 = vperm.xlu1 %3638, %v4378_v4  }
  0x61   : > { %3640 = vset.pattern.permute.xlu1 %v4305_v17 }
  0x62   : > { %610 = vperm.xlu1 %3640, %v4373_v3  }
  0x66   : > { %3641 = vset.pattern.permute.xlu1 %v4308_v19 }
  0x67   : > { %670 = vperm.xlu1 %3641, %v4366_v1  }
  0x6b   : > { %330 = vrot.lane.b32.xlu1 %v4415_v15, %s4306_s14 }
  0x6c   : > { %3642 = vset.pattern.permute.xlu1 %v4307_v18 }
  0x6f   : > { %332 = vrot.lane.b32.xlu1 %v4405_v13, %s4306_s14 }
  0x73   : > { %638 = vperm.xlu1 %3642, %v4361_v0  }
  0x77   : > { %343 = vrot.lane.b32.xlu1 %v4415_v15, %s4309_s15 }
  0x78   : > { %3645 = vset.pattern.permute.xlu1 %v4308_v19 }
  0x7b   : > { %345 = vrot.lane.b32.xlu1 %v4405_v13, %s4309_s15 }
  0x7f   : > { %678 = vperm.xlu1 %3645, %v4361_v0  }
  0x83   : > { %3646 = vset.pattern.permute.xlu1 %v4310_v20 }
  0x8e   : > { %v419_v22 = vpop.permute.xlu0 %418  ;;  %v427_v23 = vpop.permute.xlu1 %426 }
  0x8f   : > { %v444_v25 = vmul.f32 0.0, %v419_v22  ;;  %v445_v26 = vmul.f32 %v4464_v21, %v419_v22  ;;  %v446_v29 = vmul.f32 %v4468_v24, %v419_v22  ;;  %v450_v34 = vmul.f32 0.0, %v427_v23 }
  0x90   : > { %v451_v35 = vmul.f32 %v4464_v21, %v427_v23  ;;  %v452_v37 = vmul.f32 %v4468_v24, %v427_v23 }
  0x91   : > { %468 = vrot.lane.b32.xlu1 %v444_v25, %s4311_s16  ;;  %470 = vrot.lane.b32.xlu0 %v445_v26, %s4311_s16 }
  0x92   : > { %v423_v27 = vpop.permute.xlu0 %422  ;;  %v431_v28 = vpop.permute.xlu1 %430 }
  0x93   : > { %v447_v30 = vmul.f32 0.0, %v423_v27  ;;  %v448_v32 = vmul.f32 %v4464_v21, %v423_v27  ;;  %v449_v33 = vmul.f32 %v4468_v24, %v423_v27  ;;  %v453_v38 = vmul.f32 0.0, %v431_v28 }
  0x94   : > { %v454_v40 = vmul.f32 %v4464_v21, %v431_v28  ;;  %v455_v41 = vmul.f32 %v4468_v24, %v431_v28 }
  0x95   : > { %472 = vrot.lane.b32.xlu1 %v446_v29, %s4311_s16  ;;  %474 = vrot.lane.b32.xlu0 %v447_v30, %s4311_s16 }
  0x97   : > { %v715_v31 = vpop.permute.xlu1 %714  ;;  %v711_v43 = vpop.permute.xlu0 %710 }
  0x98   : > { %v725_v49 = vmul.f32 %v711_v43, %v4464_v21  ;;  %v727_v50 = vmul.f32 0.0, %v711_v43  ;;  %v726_v53 = vmul.f32 %v711_v43, %v4468_v24  ;;  %v729_v55 = vmul.f32 %v715_v31, %v4468_v24 }
  0x99   : > { %476 = vrot.lane.b32.xlu1 %v448_v32, %s4311_s16  ;;  %478 = vrot.lane.b32.xlu0 %v449_v33, %s4311_s16  ;;  %v728_v58 = vmul.f32 %v715_v31, %v4464_v21  ;;  %v730_v61 = vmul.f32 0.0, %v715_v31 }
  0x9b   : > { %v719_v36 = vpop.permute.xlu1 %718  ;;  %v723_v45 = vpop.permute.xlu0 %722 }
  0x9c   : > { %v731_v59 = vmul.f32 %v719_v36, %v4464_v21  ;;  %v733_v62 = vmul.f32 0.0, %v719_v36  ;;  %v735_v2 = vmul.f32 %v723_v45, %v4468_v24  ;;  %v734_v6 = vmul.f32 %v723_v45, %v4464_v21 }
  0x9d   : > { %480 = vrot.lane.b32.xlu1 %v450_v34, %s4311_s16  ;;  %482 = vrot.lane.b32.xlu0 %v451_v35, %s4311_s16  ;;  %v736_v12 = vmul.f32 0.0, %v723_v45 }
  0xa0   : > { %v4484_v39 = vpop.permute.xlu1 %375  ;;  %v4509_v48 = vpop.permute.xlu0 %380 }
  0xa1   : > { %484 = vrot.lane.b32.xlu1 %v452_v37, %s4311_s16  ;;  %486 = vrot.lane.b32.xlu0 %v453_v38, %s4311_s16 }
  0xa4   : > { %v4516_v52 = vpop.permute.xlu0 %291 }
  0xa5   : > { %v4490_v42 = vpop.permute.xlu1 %518  ;;  %488 = vrot.lane.b32.xlu1 %v454_v40, %s4311_s16  ;;  %490 = vrot.lane.b32.xlu0 %v455_v41, %s4311_s16  ;;  %6009 = vst [vmem:[#allocation3_spill] sm:$0xff] %v4516_v52  ;;  %v248_v41 = vand.u32 127, %v5990_v7 }
  0xa8   : > { %v296_v56 = vpop.permute.xlu0 %295 }
  0xa9   : > { %v4494_v44 = vpop.permute.xlu1 %522  ;;  %799 = vperm.xlu1 %3646, %v4366_v1   ;;  %682 = vperm.xlu0 %3644, %v4373_v3   ;;  %v732_v1 = vmul.f32 %v719_v36, %v4468_v24 }
  0xac   : > { %v4534_v63 = vpop.permute.xlu0 %390 }
  0xad   : > { %v4498_v46 = vpop.permute.xlu1 %293  ;;  %803 = vperm.xlu1 %3646, %v4378_v4   ;;  %356 = vrot.lane.b32.xlu0 %v4415_v15, %s4312_s17 }
  0xae   : > { %3647 = vset.pattern.permute.xlu0 %v4310_v20 }
  0xb1   : > { %358 = vrot.lane.b32.xlu1 %v4405_v13, %s4312_s17  ;;  %360 = vrot.lane.b32.xlu0 %v5992_v5, %s4312_s17  ;;  %v4507_v47 = vpop.permute.xlu1 %385 }
  0xb5   : > { %807 = vperm.xlu1 %3646, %v4361_v0   ;;  %811 = vperm.xlu0 %3647, %v4373_v3   ;;  %v309_v3 = vpop.permute.xlu0 %308 }
  0xb6   : > { %v4514_v51 = vpop.permute.xlu1 %558 }
  0xb9   : > { %749 = vrot.lane.b32.xlu1 %v725_v49, %s4313_s18  ;;  %753 = vrot.lane.b32.xlu0 %v727_v50, %s4313_s18  ;;  %v4548_v9 = vpop.permute.xlu0 %530  ;;  %v249_v49 = vadd.s32 128, %v248_v41  ;;  %v254_v50 = vand.u32 15, %v248_v41 }
  0xba   : > { %v4521_v54 = vpop.permute.xlu1 %304 }
  0xbb   : > { %6010 = vst [vmem:[#allocation4_spill] sm:$0xff] %v4521_v54  ;;  %vm4598_vm1 = vcmp.ge.s32.totalorder %v254_v50, 1  ;;  %vm4615_vm4 = vcmp.le.s32.totalorder %v254_v50, 14 }
  0xbc   : > { %vm4972_vm13 = vmpackc.low %vm4598_vm1, %vm4598_vm1 }
  0xbd   : > { %751 = vrot.lane.b32.xlu1 %v726_v53, %s4313_s18  ;;  %757 = vrot.lane.b32.xlu0 %v729_v55, %s4313_s18  ;;  %v4551_v13 = vpop.permute.xlu0 %562  ;;  %v261_v53 = vand.u32 15, %v249_v49  ;;  %vm5020_vm15 = vmpackc.low %vm4615_vm4, %vm4615_vm4 }
  0xbe   : > { %v4526_v57 = vpop.permute.xlu1 %306 }
  0xbf   : > { %vm4605_vm2 = vcmp.ge.s32.totalorder %v261_v53, 1  ;;  %v311_v41 = vsel %vm310_vm3, %v4521_v54, %v4526_v57  ;;  %vm4626_vm5 = vcmp.le.s32.totalorder %v261_v53, 14 }
  0xc0   : > { %vm4959_vm12 = vmpackc.low %vm4605_vm2, %vm4605_vm2 }
  0xc1   : > { %755 = vrot.lane.b32.xlu1 %v728_v58, %s4313_s18  ;;  %761 = vrot.lane.b32.xlu0 %v731_v59, %s4313_s18  ;;  %v4557_v17 = vpop.permute.xlu0 %317  ;;  %vm5010_vm14 = vmpackc.low %vm4626_vm5, %vm4626_vm5 }
  0xc2   : > { %v4532_v60 = vpop.permute.xlu1 %526  ;;  %6011 = vst [vmem:[#allocation5_spill] sm:$0xff] %v4557_v17 }
  0xc5   : > { %759 = vrot.lane.b32.xlu1 %v730_v61, %s4313_s18  ;;  %765 = vrot.lane.b32.xlu0 %v733_v62, %s4313_s18  ;;  %v322_v19 = vpop.permute.xlu0 %321  ;;  %v298_v61 = vsel %vm297_vm0, %v4516_v52, %v4498_v46 }
  0xc7   : > { %v4538_v0 = vpop.permute.xlu1 %598 }
  0xc9   : > { %763 = vrot.lane.b32.xlu1 %v732_v1, %s4313_s18  ;;  %769 = vrot.lane.b32.xlu0 %v735_v2, %s4313_s18  ;;  %v4563_v22 = vpop.permute.xlu0 %570  ;;  %v299_v1 = vsel %vm297_vm0, %v4498_v46, %v296_v56  ;;  %v302_v2 = vsel %vm4598_vm1, %v298_v61, 0.0  ;;  %v312_v56 = vsel %vm310_vm3, %v4526_v57, %v309_v3 }
  0xca   : > { %v396_v50 = vrot.slane %v302_v2, %v4409_v14  ;;  %v316_v10 = vsel %vm4626_vm5, %v312_v56, 0.0 }
  0xcb   : > { %v4544_v4 = vpop.permute.xlu1 %602  ;;  %v540_v56 = vrot.slane %v316_v10, %v4409_v14 }
  0xcc   : > { %v4641_v5 = vmul.f32 %v396_v50, %v4534_v63  ;;  %v405_v54 = vmul.f32 %v396_v50, %v4507_v47  ;;  %v403_v10 = vmul.f32 %v396_v50, %v4509_v48 }
  0xcd   : > { %767 = vrot.lane.b32.xlu1 %v734_v6, %s4313_s18  ;;  %v4567_v25 = vpop.permute.xlu0 %606  ;;  %v303_v6 = vsel %vm4605_vm2, %v299_v1, 0.0  ;;  %v315_v1 = vsel %vm4615_vm4, %v311_v41, 0.0 }
  0xce   : > { %v400_v61 = vrot.slane %v303_v6, %v4409_v14  ;;  %v536_v57 = vrot.slane %v315_v1, %v4409_v14 }
  0xcf   : > { %v320_v11 = vpop.permute.xlu1 %319 }
  0xd0   : > { %v324_v53 = vsel %vm323_vm6, %v4557_v17, %v320_v11  ;;  %v325_v3 = vsel %vm323_vm6, %v320_v11, %v322_v19  ;;  %v4650_v41 = vmul.f32 %v400_v61, %v4534_v63  ;;  %v401_v11 = vmul.f32 %v396_v50, %v4484_v39 }
  0xd1   : > { %771 = vrot.lane.b32.xlu1 %v736_v12, %s4313_s18  ;;  %v4573_v28 = vpop.permute.xlu0 %334  ;;  %v328_v1 = vsel %vm4598_vm1, %v324_v53, 0.0  ;;  %v402_v19 = vmul.f32 %v400_v61, %v4484_v39  ;;  %v406_v52 = vmul.f32 %v400_v61, %v4507_v47  ;;  %v329_v63 = vsel %vm4605_vm2, %v325_v3, 0.0 }
  0xd2   : > { %v4675_v47 = vmul.f32 %v540_v56, %v4548_v9  ;;  %v545_v3 = vmul.f32 %v536_v57, %v4532_v60  ;;  %v546_v50 = vmul.f32 %v540_v56, %v4532_v60 }
  0xd3   : > { %v4553_v15 = vpop.permute.xlu1 %566 }
  0xd5   : > { %v4577_v30 = vpop.permute.xlu0 %642 }
  0xd6   : > { %6013 = vst [vmem:[#allocation7_spill] sm:$0xff] %v4577_v30 }
  0xd8   : > { %v4555_v16 = vpop.permute.xlu1 %630 }
  0xd9   : > { %v4583_v33 = vpop.permute.xlu0 %674 }
  0xdc   : > { %v4559_v18 = vpop.permute.xlu1 %634 }
  0xdd   : > { %v4587_v35 = vpop.permute.xlu0 %347 }
  0xde   : > { %6015 = vst [vmem:[#allocation9_spill] sm:$0xff] %v4587_v35 }
  0xe1   : > { %v4561_v20 = vpop.permute.xlu1 %610 }
  0xe6   : > { %v4565_v23 = vpop.permute.xlu1 %670 }
  0xea   : > { %v4569_v26 = vpop.permute.xlu1 %330 }
  0xee   : > { %v4571_v27 = vpop.permute.xlu1 %332 }
  0xef   : > { %v338_v60 = vsel %vm336_vm8, %v4571_v27, %v4573_v28 }
  0xf2   : > { %v4575_v29 = vpop.permute.xlu1 %638 }
  0xf3   : > { %6012 = vst [vmem:[#allocation6_spill] sm:$0xff] %v4575_v29 }
  0xf6   : > { %v4579_v31 = vpop.permute.xlu1 %343 }
  0xfa   : > { %v4581_v32 = vpop.permute.xlu1 %345 }
  0xfe   : > { %v4585_v34 = vpop.permute.xlu1 %678 }
  0xff   : > { %6014 = vst [vmem:[#allocation8_spill] sm:$0xff] %v4585_v34 }
 0x103   : > { %v469_v36 = vpop.permute.xlu1 %468  ;;  %v471_v37 = vpop.permute.xlu0 %470 }
 0x104   : > { %v493_v8 = vsel %vm492_vm7, %v469_v36, %v471_v37  ;;  %v404_v36 = vmul.f32 %v400_v61, %v4509_v48  ;;  %v4680_v48 = vrot.slane %v328_v1, %v4409_v14  ;;  %v543_v61 = vmul.f32 %v536_v57, %v4494_v44 }
 0x107   : > { %v473_v38 = vpop.permute.xlu1 %472  ;;  %v475_v40 = vpop.permute.xlu0 %474 }
 0x108   : > { %v494_v17 = vsel %vm492_vm7, %v471_v37, %v473_v38  ;;  %v4666_v37 = vmul.f32 %v536_v57, %v4548_v9  ;;  %v509_v38 = vadd.f32 %v493_v8, %v401_v11  ;;  %v4683_v8 = vrot.slane %v329_v63, %v4409_v14 }
 0x109   : > { %v510_v30 = vadd.f32 %v494_v17, %v402_v19  ;;  %v541_v17 = vmul.f32 %v536_v57, %v4490_v42  ;;  %v337_v9 = vsel %vm336_vm8, %v4569_v26, %v4571_v27  ;;  %v613_v19 = vmul.f32 %v4538_v0, %v4464_v21 }
 0x10a   : > { %v544_v57 = vmul.f32 %v540_v56, %v4494_v44  ;;  %v614_v26 = vmul.f32 %v4538_v0, %v4468_v24  ;;  %v4706_v27 = vmul.f32 %v4567_v25, %v4464_v21  ;;  %v341_v44 = vsel %vm4615_vm4, %v337_v9, 0.0 }
 0x10b   : > { %v4590_v43 = vpop.permute.xlu1 %476  ;;  %v4592_v45 = vpop.permute.xlu0 %478  ;;  %v549_v63 = vadd.f32 %v541_v17, %v509_v38  ;;  %v582_v0 = vmul.f32 %v4683_v8, %v4514_v51  ;;  %v351_v17 = vsel %vm349_vm9, %v4581_v32, %v4587_v35 }
 0x10c   : > { %v495_v53 = vsel %vm492_vm7, %v475_v40, %v4590_v43  ;;  %v542_v40 = vmul.f32 %v540_v56, %v4490_v42  ;;  %v496_v11 = vsel %vm492_vm7, %v4590_v43, %v4592_v45  ;;  %v4710_v43 = vmul.f32 %v4567_v25, %v4468_v24 }
 0x10d   : > { %v511_v1 = vadd.f32 %v495_v53, %v403_v10  ;;  %v581_v45 = vmul.f32 %v4680_v48, %v4514_v51  ;;  %v512_v56 = vadd.f32 %v496_v11, %v404_v36  ;;  %v615_v10 = vmul.f32 %v4544_v4, %v4464_v21 }
 0x10e   : > { %v550_v42 = vadd.f32 %v542_v40, %v510_v30  ;;  %v342_v30 = vsel %vm4626_vm5, %v338_v60, 0.0  ;;  %v350_v25 = vsel %vm349_vm9, %v4579_v31, %v4581_v32  ;;  %v616_v31 = vmul.f32 %v4544_v4, %v4468_v24 }
 0x10f   : > { %v4594_v55 = vpop.permute.xlu1 %480  ;;  %v4596_v58 = vpop.permute.xlu0 %482  ;;  %v551_v38 = vadd.f32 %v543_v61, %v511_v1  ;;  %v589_v40 = vadd.f32 %v581_v45, %v549_v63  ;;  %v4739_v61 = vrot.slane %v341_v44, %v4409_v14  ;;  %v583_v32 = vmul.f32 %v4680_v48, %v4551_v13 }
 0x110   : > { %v497_v53 = vsel %vm492_vm7, %v4594_v55, %v4596_v58  ;;  %v590_v9 = vadd.f32 %v582_v0, %v550_v42  ;;  %v4742_v55 = vrot.slane %v342_v30, %v4409_v14  ;;  %v4748_v1 = vmul.f32 %v4680_v48, %v4563_v22 }
 0x111   : > { %v513_v11 = vadd.f32 %v497_v53, %v405_v54  ;;  %v354_v4 = vsel %vm4598_vm1, %v350_v25, 0.0  ;;  %v355_v63 = vsel %vm4605_vm2, %v351_v17, 0.0  ;;  %v591_v42 = vadd.f32 %v583_v32, %v551_v38 }
 0x112   : > { %v622_v44 = vadd.f32 %v614_v26, %v590_v9  ;;  %v621_v54 = vadd.f32 %v613_v19, %v589_v40  ;;  %v4775_v26 = vrot.slane %v354_v4, %v4409_v14  ;;  %v4778_v25 = vrot.slane %v355_v63, %v4409_v14 }
 0x113   : > { %v4622_v49 = vpop.permute.xlu1 %484  ;;  %v4624_v7 = vpop.permute.xlu0 %486  ;;  %v553_v38 = vadd.f32 %v545_v3, %v513_v11  ;;  %v623_v17 = vadd.f32 %v615_v10, %v591_v42  ;;  %v585_v40 = vmul.f32 %v4680_v48, %v4553_v15  ;;  %v586_v3 = vmul.f32 %v4683_v8, %v4553_v15 }
 0x114   : > { %v498_v51 = vsel %vm492_vm7, %v4596_v58, %v4622_v49  ;;  %v584_v58 = vmul.f32 %v4683_v8, %v4551_v13  ;;  %v552_v49 = vadd.f32 %v544_v57, %v512_v56  ;;  %v4765_v57 = vmul.f32 %v4683_v8, %v4563_v22 }
 0x115   : > { %v514_v45 = vadd.f32 %v498_v51, %v406_v52  ;;  %v653_v52 = vmul.f32 %v4739_v61, %v4555_v16  ;;  %v655_v10 = vmul.f32 %v4739_v61, %v4559_v18  ;;  %v694_v15 = vmul.f32 %v4778_v25, %v4565_v23 }
 0x116   : > { %v592_v19 = vadd.f32 %v584_v58, %v552_v49  ;;  %v693_v58 = vmul.f32 %v4775_v26, %v4565_v23  ;;  %v656_v23 = vmul.f32 %v4742_v55, %v4559_v18  ;;  %vm1182_vm1 = vcmask 261120  }
 0x117   : > { %v4645_v2 = vpop.permute.xlu1 %488  ;;  %v4647_v6 = vpop.permute.xlu0 %490  ;;  %v554_v22 = vadd.f32 %v546_v50, %v514_v45  ;;  %v619_v50 = vmul.f32 %v4561_v20, %v4464_v21  ;;  %v593_v21 = vadd.f32 %v585_v40, %v553_v38  ;;  %v663_v49 = vadd.f32 %v655_v10, %v623_v17 }
 0x118   : > { %v499_v56 = vsel %vm492_vm7, %v4624_v7, %v4645_v2  ;;  %v624_v11 = vadd.f32 %v616_v31, %v592_v19 }
 0x119   : > { %v594_v8 = vadd.f32 %v586_v3, %v554_v22  ;;  %v625_v38 = vadd.f32 %v4706_v27, %v593_v21 }
 0x11a   : > { %v664_v19 = vadd.f32 %v656_v23, %v624_v11 }
 0x128   : > { %v4670_v34 = vpop.permute.xlu1 %799  ;;  %v4672_v39 = vpop.permute.xlu0 %682 }
 0x129   : > { %6024 = vst [vmem:[#allocation10_spill] sm:$0xff] %v4672_v39 }
 0x12c   : > { %v4700_v39 = vpop.permute.xlu1 %803  ;;  %v357_v29 = vpop.permute.xlu0 %356 }
 0x130   : > { %v359_v36 = vpop.permute.xlu1 %358  ;;  %v4734_v60 = vpop.permute.xlu0 %360 }
 0x131   : > { %v363_v30 = vsel %vm362_vm10, %v357_v29, %v359_v36  ;;  %v364_v35 = vsel %vm362_vm10, %v359_v36, %v4734_v60  ;;  %v654_v29 = vmul.f32 %v4742_v55, %v4555_v16  ;;  %v515_v16 = vadd.f32 %v499_v56, %v4641_v5 }
 0x132   : > { %v367_v53 = vsel %vm4615_vm4, %v363_v30, 0.0  ;;  %v368_v7 = vsel %vm4626_vm5, %v364_v35, 0.0  ;;  %v661_v36 = vadd.f32 %v653_v52, %v621_v54  ;;  %v500_v35 = vsel %vm492_vm7, %v4645_v2, %v4647_v6 }
 0x133   : > { %v662_v32 = vadd.f32 %v654_v29, %v622_v44  ;;  %v4797_v48 = vrot.slane %v367_v53, %v4409_v14  ;;  %v4800_v5 = vrot.slane %v368_v7, %v4409_v14  ;;  %v555_v2 = vadd.f32 %v4666_v37, %v515_v16  ;;  %v6025_v16 = vld [vmem:[#allocation6_spill] sm:$0xff] }
 0x134   : > { %v4757_v0 = vpop.permute.xlu1 %807  ;;  %v4761_v13 = vpop.permute.xlu0 %811  ;;  %v516_v6 = vadd.f32 %v500_v35, %v4650_v41  ;;  %v701_v63 = vadd.f32 %v693_v58, %v661_v36  ;;  %v695_v54 = vmul.f32 %v4775_v26, %v4583_v33  ;;  %v626_v52 = vadd.f32 %v4710_v43, %v594_v8 }
 0x135   : > { %v702_v42 = vadd.f32 %v694_v15, %v662_v32  ;;  %v822_v37 = vmul.f32 %v4797_v48, %v4670_v34  ;;  %v823_v41 = vmul.f32 %v4800_v5, %v4670_v34  ;;  %v595_v22 = vadd.f32 %v4748_v1, %v555_v2 }
 0x136   : > { %v703_v29 = vadd.f32 %v695_v54, %v663_v49  ;;  %v556_v53 = vadd.f32 %v4675_v47, %v516_v6  ;;  %v658_v34 = vmul.f32 %v4742_v55, %v6025_v16  ;;  %v824_v36 = vmul.f32 %v4797_v48, %v4700_v39  ;;  %v6026_v49 = vld [vmem:[#allocation8_spill] sm:$0xff] }
 0x137   : > { %v620_v8 = vmul.f32 %v4561_v20, %v4468_v24  ;;  %v697_v11 = vmul.f32 %v4775_v26, %v6026_v49  ;;  %v698_v2 = vmul.f32 %v4778_v25, %v6026_v49 }
 0x138   : > { %v750_v9 = vpop.permute.xlu1 %749  ;;  %v754_v51 = vpop.permute.xlu0 %753  ;;  %v666_v35 = vadd.f32 %v658_v34, %v626_v52  ;;  %v596_v10 = vadd.f32 %v4765_v57, %v556_v53  ;;  %v827_v52 = vmul.f32 %v4800_v5, %v4757_v0 }
 0x13a   : > { %v706_v20 = vadd.f32 %v698_v2, %v666_v35  ;;  %v829_v35 = vmul.f32 %v4800_v5, %v4761_v13 }
 0x13c   : > { %v752_v4 = vpop.permute.xlu1 %751  ;;  %v758_v45 = vpop.permute.xlu0 %757 }
 0x13d   : > { %v774_v44 = vsel %vm773_vm11, %v750_v9, %v752_v4  ;;  %v775_v30 = vsel %vm773_vm11, %v752_v4, %v754_v51  ;;  %v657_v9 = vmul.f32 %v4739_v61, %v6025_v16  ;;  %v696_v51 = vmul.f32 %v4778_v25, %v4583_v33  ;;  %v6027_v4 = vld [vmem:[#allocation7_spill] sm:$0xff] }
 0x13e   : > { %v790_v56 = vadd.f32 %v774_v44, %v701_v63  ;;  %v791_v31 = vadd.f32 %v775_v30, %v702_v42  ;;  %v627_v33 = vadd.f32 %v619_v50, %v595_v22  ;;  %v659_v57 = vmul.f32 %v4739_v61, %v6027_v4  ;;  %v6028_v30 = vld [vmem:[#allocation10_spill] sm:$0xff] }
 0x13f   : > { %v704_v32 = vadd.f32 %v696_v51, %v664_v19  ;;  %v665_v3 = vadd.f32 %v657_v9, %v625_v38  ;;  %v825_v50 = vmul.f32 %v4800_v5, %v4700_v39  ;;  %v699_v54 = vmul.f32 %v4775_v26, %v6028_v30 }
 0x140   : > { %v830_v7 = vadd.f32 %v822_v37, %v790_v56  ;;  %v831_v18 = vadd.f32 %v823_v41, %v791_v31  ;;  %v756_v17 = vpop.permute.xlu1 %755  ;;  %v762_v40 = vpop.permute.xlu0 %761  ;;  %v667_v56 = vadd.f32 %v659_v57, %v627_v33  ;;  %v628_v31 = vadd.f32 %v620_v8, %v596_v10 }
 0x141   : > { %v776_v43 = vsel %vm773_vm11, %v756_v17, %v758_v45  ;;  %v705_v24 = vadd.f32 %v697_v11, %v665_v3  ;;  %v826_v61 = vmul.f32 %v4797_v48, %v4757_v0  ;;  %v660_v38 = vmul.f32 %v4742_v55, %v6027_v4 }
 0x142   : > { %v4829_v27 = vmax.f32 %v830_v7, 0.0  ;;  %v4831_v1 = vmax.f32 %v831_v18, 0.0  ;;  %v792_v47 = vadd.f32 %v776_v43, %v703_v29  ;;  %v700_v22 = vmul.f32 %v4778_v25, %v6028_v30 }
 0x143   : > { %v668_v55 = vadd.f32 %v660_v38, %v628_v31  ;;  %v828_v51 = vmul.f32 %v4797_v48, %v4761_v13  ;;  %v6029_v48 = vmov 0.0  }
 0x144   : > { %v832_v58 = vadd.f32 %v824_v36, %v792_v47  ;;  %v760_v15 = vpop.permute.xlu1 %759  ;;  %v4838_v21 = vpack.i.bf16 %v4831_v1, %v4829_v27  ;;  %v766_v44 = vpop.permute.xlu0 %765  ;;  %v3773_v57 = vpack.i.bf16 %v6029_v48, %v4831_v1 }
 0x145   : > { %v777_v6 = vsel %vm773_vm11, %v758_v45, %v760_v15  ;;  %v708_v36 = vadd.f32 %v700_v22, %v668_v55 }
 0x146   : > { %v4849_v63 = vmax.f32 %v832_v58, 0.0  ;;  %v793_v42 = vadd.f32 %v777_v6, %v704_v32  ;;  %3649 = vrot.lane.b32.xlu0 %v4838_v21, %s4301_s11 }
 0x148   : > { %v833_v23 = vadd.f32 %v825_v50, %v793_v42  ;;  %v764_v45 = vpop.permute.xlu1 %763  ;;  %v3233_v41 = vpack.c.bf16 %v4849_v63, %v4829_v27  ;;  %v770_v18 = vpop.permute.xlu0 %769  ;;  %v3733_v2 = vpack.i.bf16 %v4849_v63, %v4829_v27 }
 0x149   : > { %v778_v37 = vsel %vm773_vm11, %v762_v40, %v764_v45  ;;  %v779_v39 = vsel %vm773_vm11, %v764_v45, %v766_v44  ;;  %v707_v40 = vadd.f32 %v699_v54, %v667_v56  ;;  %v1171_v44 = vld [vmem:[%s5985_s2 + $0x8] sm:$0xff] }
 0x14a   : > { %v4865_v29 = vmax.f32 %v833_v23, 0.0  ;;  %v794_v26 = vadd.f32 %v778_v37, %v705_v24  ;;  %v795_v19 = vadd.f32 %v779_v39, %v706_v20  ;;  %1259 = vmatprep.mubr.f32.mxu0 %v1171_v44  ;;  %v6032_v39 = vld [vmem:[#allocation3_spill] sm:$0xff] }
 0x14c   : > { %v834_v53 = vadd.f32 %v826_v61, %v794_v26  ;;  %v835_v7 = vadd.f32 %v827_v52, %v795_v19  ;;  %v768_v17 = vpop.permute.xlu1 %767  ;;  %v3653_v16 = vpack.i.bf16 %v4865_v29, %v4849_v63  ;;  %v3231_v25 = vpack.c.bf16 %v4865_v29, %v4831_v1 }
 0x14d   : > { %v780_v0 = vsel %vm773_vm11, %v768_v17, %v770_v18  ;;  %v3728_v4 = vpack.i.bf16 %v4865_v29, %v4831_v1  ;;  %v3778_v42 = vpack.i.bf16 %v4829_v27, %v4865_v29 }
 0x14e   : > { %v4874_v9 = vmax.f32 %v834_v53, 0.0  ;;  %v4876_v34 = vmax.f32 %v835_v7, 0.0  ;;  %v796_v43 = vadd.f32 %v780_v0, %v707_v40  ;;  %3654 = vrot.lane.b32.xlu1 %v3653_v16, %s4301_s11 }
 0x150   : > { %v772_v47 = vpop.permute.xlu1 %771  ;;  %v3658_v32 = vpack.i.bf16 %v4876_v34, %v4874_v9  ;;  %v836_v10 = vadd.f32 %v828_v51, %v796_v43  ;;  %v3678_v49 = vpack.i.bf16 %v4874_v9, %v6029_v48  ;;  %v3788_v50 = vpack.i.bf16 %v4876_v34, %v4849_v63 }
 0x151   : > { %v781_v3 = vsel %vm773_vm11, %v770_v18, %v772_v47 }
 0x152   : > { %v797_v58 = vadd.f32 %v781_v3, %v708_v36  ;;  %3659 = vrot.lane.b32.xlu0 %v3658_v32, %s4301_s11  ;;  %v4889_v33 = vmax.f32 %v836_v10, 0.0 }
 0x154   : > { %v837_v15 = vadd.f32 %v829_v35, %v797_v58  ;;  %v3683_v5 = vpack.i.bf16 %v4889_v33, %v4876_v34  ;;  %v3743_v6 = vpack.i.bf16 %v4889_v33, %v4874_v9 }
 0x156   : > { %v4891_v8 = vmax.f32 %v837_v15, 0.0  ;;  %3669 = vrot.lane.b32.xlu0 %v4838_v21, %s4311_s16 }
 0x158   : > { %v3663_v11 = vpack.i.bf16 %v4891_v8, %v4889_v33  ;;  %v3235_v13 = vpack.c.bf16 %v4891_v8, %v4876_v34  ;;  %v3798_v24 = vpack.i.bf16 %v4874_v9, %v4891_v8 }
 0x15a   : > { %3679 = vrot.lane.b32.xlu0 %v3678_v49, %s4311_s16  ;;  %3664 = vrot.lane.b32.xlu1 %v3663_v11, %s4301_s11 }
 0x15e   : > { %1118 = vrot.lane.b32.xlu0 %v4891_v8, %s4311_s16  ;;  %3674 = vrot.lane.b32.xlu1 %v3653_v16, %s4311_s16 }
 0x162   : > { %3694 = vrot.lane.b32.xlu0 %v3653_v16, %s4302_s12  ;;  %3684 = vrot.lane.b32.xlu1 %v3683_v5, %s4311_s16 }
 0x166   : > { %3704 = vrot.lane.b32.xlu0 %v3663_v11, %s4302_s12  ;;  %3689 = vrot.lane.b32.xlu1 %v4838_v21, %s4302_s12 }
 0x16a   : > { %3714 = vrot.lane.b32.xlu0 %v3653_v16, %s4304_s13  ;;  %3699 = vrot.lane.b32.xlu1 %v3658_v32, %s4302_s12 }
 0x16e   : > { %3724 = vrot.lane.b32.xlu0 %v3663_v11, %s4304_s13  ;;  %3709 = vrot.lane.b32.xlu1 %v4838_v21, %s4304_s13  ;;  %v3738_v21 = vpack.i.bf16 %v4891_v8, %v4876_v34 }
 0x172   : > { %3734 = vrot.lane.b32.xlu0 %v3733_v2, %s4306_s14  ;;  %3719 = vrot.lane.b32.xlu1 %v3658_v32, %s4304_s13 }
 0x176   : > { %3744 = vrot.lane.b32.xlu0 %v3743_v6, %s4306_s14  ;;  %3729 = vrot.lane.b32.xlu1 %v3728_v4, %s4306_s14 }
 0x17a   : > { %3754 = vrot.lane.b32.xlu0 %v3733_v2, %s4309_s15  ;;  %3739 = vrot.lane.b32.xlu1 %v3738_v21, %s4306_s14 }
 0x17e   : > { %3764 = vrot.lane.b32.xlu0 %v3743_v6, %s4309_s15  ;;  %3749 = vrot.lane.b32.xlu1 %v3728_v4, %s4309_s15 }
 0x182   : > { %3774 = vrot.lane.b32.xlu0 %v3773_v57, %s4313_s18  ;;  %3759 = vrot.lane.b32.xlu1 %v3738_v21, %s4309_s15 }
 0x186   : > { %3784 = vrot.lane.b32.xlu0 %v3733_v2, %s4312_s17  ;;  %3769 = vrot.lane.b32.xlu1 %v3728_v4, %s4312_s17 }
 0x18a   : > { %3794 = vrot.lane.b32.xlu0 %v3738_v21, %s4312_s17  ;;  %3779 = vrot.lane.b32.xlu1 %v3778_v42, %s4313_s18 }
 0x18e   : > { %3804 = vrot.lane.b32.xlu0 %v3743_v6, %s4312_s17  ;;  %3789 = vrot.lane.b32.xlu1 %v3788_v50, %s4313_s18 }
 0x192   : > { %3799 = vrot.lane.b32.xlu1 %v3798_v24, %s4313_s18 }
 0x196   : > { %1150 = vrot.lane.b32.xlu1 %v4889_v33, %s4313_s18 }
 0x1b8   : > { %v3650_v20 = vpop.permute.xlu0 %3649 }
 0x1b9   : > { %v3652_v30 = vunpack.i.h.bf16 %v3650_v20  ;;  %v3651_v54 = vunpack.i.l.bf16 %v3650_v20 }
 0x1bb   : > { %v875_v61 = vsel %vm297_vm0, %v3651_v54, %v3652_v30  ;;  %v874_v52 = vsel %vm297_vm0, %v6032_v39, %v3651_v54 }
 0x1c0   : > { %v3655_v23 = vpop.permute.xlu1 %3654 }
 0x1c1   : > { %v3657_v45 = vunpack.i.h.bf16 %v3655_v23  ;;  %v3656_v56 = vunpack.i.l.bf16 %v3655_v23 }
 0x1c3   : > { %v877_v37 = vsel %vm297_vm0, %v3656_v56, %v3657_v45  ;;  %v876_v26 = vsel %vm297_vm0, %v6032_v39, %v3656_v56 }
 0x1c4   : > { %v3660_v19 = vpop.permute.xlu0 %3659  ;;  %v3187_v38 = vpack.c.bf16 %v877_v37, %v875_v61  ;;  %v3190_v22 = vpack.c.bf16 %v876_v26, %v874_v52 }
 0x1c5   : > { %v3662_v7 = vunpack.i.h.bf16 %v3660_v19  ;;  %v3661_v18 = vunpack.i.l.bf16 %v3660_v19 }
 0x1c6   : > { %3189 = vmatprep.subr.msk.bf16.mxu0 %vm4959_vm12, %v3187_v38  ;;  %v6035_v38 = vld [vmem:[#allocation4_spill] sm:$0xff] }
 0x1c7   : > { %3192 = vmatpush1.bf16.msk.msra.mxu0 %vm4972_vm13, %v3190_v22  ;;  %v878_v0 = vsel %vm297_vm0, %v6032_v39, %v3661_v18  ;;  %v879_v43 = vsel %vm297_vm0, %v3661_v18, %v3662_v7  ;;  %v6044_v18 = vlaneseq }
 0x1c8   : > { %v3670_v53 = vpop.permute.xlu0 %3669 }
 0x1c9   : > { %v3672_v55 = vunpack.i.h.bf16 %v3670_v53  ;;  %v3671_v51 = vunpack.i.l.bf16 %v3670_v53 }
 0x1cb   : > { %v1121_v11 = vsel %vm492_vm7, %v3671_v51, %v3672_v55 }
 0x1cc   : > { %v3665_v17 = vpop.permute.xlu1 %3664  ;;  %v3680_v40 = vpop.permute.xlu0 %3679 }
 0x1cd   : > { %v3667_v59 = vunpack.i.h.bf16 %v3665_v17  ;;  %v3666_v16 = vunpack.i.l.bf16 %v3665_v17  ;;  %v4986_v32 = vunpack.i.l.bf16 %v3680_v40  ;;  %v3682_v50 = vunpack.i.h.bf16 %v3680_v40 }
 0x1cf   : > { %v880_v47 = vsel %vm297_vm0, %v6032_v39, %v3666_v16  ;;  %v881_v36 = vsel %vm297_vm0, %v3666_v16, %v3667_v59  ;;  %v1120_v2 = vsel %vm492_vm7, %v4986_v32, %v3671_v51  ;;  %v1124_v19 = vsel %vm492_vm7, %v4986_v32, %v3682_v50 }
 0x1d0   : > { %v3675_v3 = vpop.permute.xlu1 %3674  ;;  %v1119_v35 = vpop.permute.xlu0 %1118  ;;  %v3193_v10 = vpack.c.bf16 %v881_v36, %v879_v43  ;;  %v3196_v58 = vpack.c.bf16 %v880_v47, %v878_v0 }
 0x1d1   : > { %v3677_v15 = vunpack.i.h.bf16 %v3675_v3  ;;  %v3676_v49 = vunpack.i.l.bf16 %v3675_v3 }
 0x1d2   : > { %3195 = vmatprep.subr.msk.bf16.mxu0 %vm4959_vm12, %v3193_v10 }
 0x1d3   : > { %3198 = vmatpush1.bf16.msk.msra.mxu0 %vm4972_vm13, %v3196_v58  ;;  %v1123_v5 = vsel %vm492_vm7, %v3676_v49, %v3677_v15  ;;  %v1122_v6 = vsel %vm492_vm7, %v4986_v32, %v3676_v49 }
 0x1d4   : > { %v3685_v4 = vpop.permute.xlu1 %3684  ;;  %v3695_v21 = vpop.permute.xlu0 %3694  ;;  %v3199_v57 = vpack.c.bf16 %v1123_v5, %v1121_v11  ;;  %v3201_v42 = vpack.c.bf16 %v1122_v6, %v1120_v2 }
 0x1d5   : > { %v3687_v44 = vunpack.i.h.bf16 %v3685_v4  ;;  %v3686_v24 = vunpack.i.l.bf16 %v3685_v4  ;;  %v3697_v20 = vunpack.i.h.bf16 %v3695_v21  ;;  %v3696_v30 = vunpack.i.l.bf16 %v3695_v21  ;;  %v6040_v21 = vld [vmem:[#allocation5_spill] sm:$0xff] }
 0x1d6   : > { %3200 = vmatprep.subr.bf16.mxu0 %v3199_v57 }
 0x1d7   : > { %3202 = vmatpush1.bf16.msra.mxu0 %v3201_v42  ;;  %v1125_v54 = vsel %vm492_vm7, %v3682_v50, %v3686_v24  ;;  %v1127_v23 = vsel %vm492_vm7, %v3687_v44, %v1119_v35  ;;  %v1126_v37 = vsel %vm492_vm7, %v4986_v32, %v3687_v44  ;;  %v920_v22 = vsel %vm310_vm3, %v6035_v38, %v3696_v30 }
 0x1d8   : > { %v3690_v45 = vpop.permute.xlu1 %3689  ;;  %v3705_v56 = vpop.permute.xlu0 %3704  ;;  %v3203_v61 = vpack.c.bf16 %v1127_v23, %v1125_v54  ;;  %v921_v53 = vsel %vm310_vm3, %v3696_v30, %v3697_v20  ;;  %v3205_v7 = vpack.c.bf16 %v1126_v37, %v1124_v19 }
 0x1d9   : > { %v3692_v52 = vunpack.i.h.bf16 %v3690_v45  ;;  %v3691_v26 = vunpack.i.l.bf16 %v3690_v45  ;;  %v3707_v59 = vunpack.i.h.bf16 %v3705_v56  ;;  %v3706_v16 = vunpack.i.l.bf16 %v3705_v56 }
 0x1da   : > { %3204 = vmatprep.subr.bf16.mxu0 %v3203_v61 }
 0x1db   : > { %v918_v17 = vsel %vm310_vm3, %v6035_v38, %v3691_v26  ;;  %v919_v40 = vsel %vm310_vm3, %v3691_v26, %v3692_v52  ;;  %3206 = vmatpush1.bf16.msra.mxu0 %v3205_v7  ;;  %v924_v10 = vsel %vm310_vm3, %v6035_v38, %v3706_v16  ;;  %v925_v58 = vsel %vm310_vm3, %v3706_v16, %v3707_v59 }
 0x1dc   : > { %v3700_v0 = vpop.permute.xlu1 %3699  ;;  %v3715_v43 = vpop.permute.xlu0 %3714  ;;  %v3207_v55 = vpack.c.bf16 %v921_v53, %v919_v40  ;;  %v3210_v51 = vpack.c.bf16 %v920_v22, %v918_v17 }
 0x1dd   : > { %v3702_v47 = vunpack.i.h.bf16 %v3700_v0  ;;  %v3701_v36 = vunpack.i.l.bf16 %v3700_v0  ;;  %v3717_v3 = vunpack.i.h.bf16 %v3715_v43  ;;  %v3716_v35 = vunpack.i.l.bf16 %v3715_v43 }
 0x1de   : > { %3209 = vmatprep.subr.msk.bf16.mxu0 %vm5010_vm14, %v3207_v55 }
 0x1df   : > { %v922_v12 = vsel %vm310_vm3, %v6035_v38, %v3701_v36  ;;  %v923_v15 = vsel %vm310_vm3, %v3701_v36, %v3702_v47  ;;  %3212 = vmatpush1.bf16.msk.msra.mxu0 %vm5020_vm15, %v3210_v51  ;;  %v960_v57 = vsel %vm323_vm6, %v6040_v21, %v3716_v35  ;;  %v961_v42 = vsel %vm323_vm6, %v3716_v35, %v3717_v3 }
 0x1e0   : > { %v3710_v49 = vpop.permute.xlu1 %3709  ;;  %v3725_v11 = vpop.permute.xlu0 %3724  ;;  %v3213_v5 = vpack.c.bf16 %v925_v58, %v923_v15  ;;  %v3216_v2 = vpack.c.bf16 %v924_v10, %v922_v12  ;;  %v3237_v58 = vpack.c.bf16 %v4889_v33, %v4874_v9 }
 0x1e1   : > { %v3712_v6 = vunpack.i.h.bf16 %v3710_v49  ;;  %v3711_v4 = vunpack.i.l.bf16 %v3710_v49  ;;  %v3727_v24 = vunpack.i.h.bf16 %v3725_v11  ;;  %v3726_v20 = vunpack.i.l.bf16 %v3725_v11 }
 0x1e2   : > { %3215 = vmatprep.subr.msk.bf16.mxu0 %vm5010_vm14, %v3213_v5 }
 0x1e3   : > { %v958_v50 = vsel %vm323_vm6, %v6040_v21, %v3711_v4  ;;  %v959_v44 = vsel %vm323_vm6, %v3711_v4, %v3712_v6  ;;  %3218 = vmatpush1.bf16.msk.msra.mxu0 %vm5020_vm15, %v3216_v2  ;;  %v964_v37 = vsel %vm323_vm6, %v6040_v21, %v3726_v20  ;;  %v965_v52 = vsel %vm323_vm6, %v3726_v20, %v3727_v24  ;;  %v6041_v2 = vld [vmem:[#allocation9_spill] sm:$0xff] }
 0x1e4   : > { %v3720_v30 = vpop.permute.xlu1 %3719  ;;  %v3735_v54 = vpop.permute.xlu0 %3734  ;;  %v3219_v23 = vpack.c.bf16 %v961_v42, %v959_v44  ;;  %v3222_v45 = vpack.c.bf16 %v960_v57, %v958_v50 }
 0x1e5   : > { %v3722_v56 = vunpack.i.h.bf16 %v3720_v30  ;;  %v3721_v61 = vunpack.i.l.bf16 %v3720_v30  ;;  %v3736_v43 = vunpack.i.l.bf16 %v3735_v54  ;;  %v3737_v10 = vunpack.i.h.bf16 %v3735_v54 }
 0x1e6   : > { %3221 = vmatprep.subr.msk.bf16.mxu0 %vm4959_vm12, %v3219_v23 }
 0x1e7   : > { %v962_v26 = vsel %vm323_vm6, %v6040_v21, %v3721_v61  ;;  %v963_v19 = vsel %vm323_vm6, %v3721_v61, %v3722_v56  ;;  %3224 = vmatpush1.bf16.msk.msra.mxu0 %vm4972_vm13, %v3222_v45 }
 0x1e8   : > { %v3730_v22 = vpop.permute.xlu1 %3729  ;;  %v3745_v53 = vpop.permute.xlu0 %3744  ;;  %v3225_v7 = vpack.c.bf16 %v965_v52, %v963_v19  ;;  %v3228_v17 = vpack.c.bf16 %v964_v37, %v962_v26 }
 0x1e9   : > { %v3732_v40 = vunpack.i.h.bf16 %v3730_v22  ;;  %v3731_v59 = vunpack.i.l.bf16 %v3730_v22  ;;  %v3747_v29 = vunpack.i.h.bf16 %v3745_v53 }
 0x1ea   : > { %3227 = vmatprep.subr.msk.bf16.mxu0 %vm4959_vm12, %v3225_v7 }
 0x1eb   : > { %3230 = vmatpush1.bf16.msk.msra.mxu0 %vm4972_vm13, %v3228_v17  ;;  %v1001_v55 = vsel %vm336_vm8, %v3732_v40, %v4573_v28  ;;  %v999_v51 = vsel %vm336_vm8, %v3731_v59, %v4573_v28  ;;  %v998_v1 = vsel %vm336_vm8, %v3736_v43, %v3731_v59  ;;  %v1000_v12 = vsel %vm336_vm8, %v3737_v10, %v3732_v40 }
 0x1ec   : > { %v3740_v16 = vpop.permute.xlu1 %3739  ;;  %v3755_v0 = vpop.permute.xlu0 %3754  ;;  %3232 = vmatprep.subr.bf16.mxu0 %v3231_v25  ;;  %v3746_v25 = vunpack.i.l.bf16 %v3745_v53  ;;  %v3239_v27 = vpack.c.bf16 %v1001_v55, %v999_v51  ;;  %v3242_v5 = vpack.c.bf16 %v1000_v12, %v998_v1 }
 0x1ed   : > { %v3742_v47 = vunpack.i.h.bf16 %v3740_v16  ;;  %v3741_v36 = vunpack.i.l.bf16 %v3740_v16  ;;  %v3757_v9 = vunpack.i.h.bf16 %v3755_v0  ;;  %v3756_v33 = vunpack.i.l.bf16 %v3755_v0 }
 0x1ef   : > { %3234 = vmatpush1.bf16.msra.mxu0 %v3233_v41  ;;  %v1005_v63 = vsel %vm336_vm8, %v3742_v47, %v4573_v28  ;;  %v1002_v41 = vsel %vm336_vm8, %v3746_v25, %v3741_v36  ;;  %v1003_v34 = vsel %vm336_vm8, %v3741_v36, %v4573_v28  ;;  %v1004_v8 = vsel %vm336_vm8, %v3747_v29, %v3742_v47 }
 0x1f0   : > { %v3750_v3 = vpop.permute.xlu1 %3749  ;;  %v3765_v35 = vpop.permute.xlu0 %3764  ;;  %3236 = vmatprep.subr.bf16.mxu0 %v3235_v13  ;;  %v3245_v57 = vpack.c.bf16 %v1005_v63, %v1003_v34  ;;  %v3248_v42 = vpack.c.bf16 %v1004_v8, %v1002_v41 }
 0x1f1   : > { %v3752_v15 = vunpack.i.h.bf16 %v3750_v3  ;;  %v3751_v49 = vunpack.i.l.bf16 %v3750_v3  ;;  %v3767_v50 = vunpack.i.h.bf16 %v3765_v35  ;;  %v3766_v44 = vunpack.i.l.bf16 %v3765_v35 }
 0x1f3   : > { %3238 = vmatpush1.bf16.msra.mxu0 %v3237_v58  ;;  %v1041_v6 = vsel %vm349_vm9, %v3752_v15, %v6041_v2  ;;  %v1039_v4 = vsel %vm349_vm9, %v3751_v49, %v6041_v2  ;;  %v1038_v37 = vsel %vm349_vm9, %v3756_v33, %v3751_v49  ;;  %v1040_v52 = vsel %vm349_vm9, %v3757_v9, %v3752_v15 }
 0x1f4   : > { %v3760_v13 = vpop.permute.xlu1 %3759  ;;  %v5081_v11 = vpop.permute.xlu0 %3774  ;;  %3241 = vmatprep.subr.msk.bf16.mxu0 %vm5010_vm14, %v3239_v27  ;;  %v3251_v19 = vpack.c.bf16 %v1041_v6, %v1039_v4  ;;  %v3254_v29 = vpack.c.bf16 %v1040_v52, %v1038_v37 }
 0x1f5   : > { %v3762_v24 = vunpack.i.h.bf16 %v3760_v13  ;;  %v3761_v20 = vunpack.i.l.bf16 %v3760_v13  ;;  %v5096_v26 = vunpack.i.h.bf16 %v5081_v11  ;;  %v3776_v51 = vunpack.i.l.bf16 %v5081_v11 }
 0x1f7   : > { %3244 = vmatpush1.bf16.msk.msra.mxu0 %vm5020_vm15, %v3242_v5  ;;  %v1045_v40 = vsel %vm349_vm9, %v3762_v24, %v6041_v2  ;;  %v1043_v59 = vsel %vm349_vm9, %v3761_v20, %v6041_v2  ;;  %v1042_v35 = vsel %vm349_vm9, %v3766_v44, %v3761_v20  ;;  %v1044_v10 = vsel %vm349_vm9, %v3767_v50, %v3762_v24 }
 0x1f8   : > { %v3770_v30 = vpop.permute.xlu1 %3769  ;;  %v3785_v54 = vpop.permute.xlu0 %3784  ;;  %3247 = vmatprep.subr.msk.bf16.mxu0 %vm5010_vm14, %v3245_v57  ;;  %v3257_v12 = vpack.c.bf16 %v1045_v40, %v1043_v59  ;;  %v1155_v13 = vsel %vm773_vm11, %v3776_v51, %v5096_v26  ;;  %v3260_v11 = vpack.c.bf16 %v1044_v10, %v1042_v35  ;;  %v1177_v40 = vld [vmem:[%s5985_s2 + $0x38] sm:$0xff] }
 0x1f9   : > { %v3772_v23 = vunpack.i.h.bf16 %v3770_v30  ;;  %v3771_v45 = vunpack.i.l.bf16 %v3770_v30  ;;  %v3787_v56 = vunpack.i.h.bf16 %v3785_v54  ;;  %v3786_v61 = vunpack.i.l.bf16 %v3785_v54  ;;  %v1172_v30 = vld [vmem:[%s5985_s2 + $0x10] sm:$0xff]  ;;  %v1181_v59 = vld [vmem:[%s5985_s2 + $0x58] sm:$0xff] }
 0x1fb   : > { %v1079_v22 = vsel %vm362_vm10, %v3771_v45, %v4734_v60  ;;  %v1081_v53 = vsel %vm362_vm10, %v3772_v23, %v4734_v60  ;;  %v1078_v7 = vsel %vm362_vm10, %v3786_v61, %v3771_v45  ;;  %v1080_v17 = vsel %vm362_vm10, %v3787_v56, %v3772_v23  ;;  %3250 = vmatpush1.bf16.msk.msra.mxu0 %vm5020_vm15, %v3248_v42 }
 0x1fc   : > { %v3780_v16 = vpop.permute.xlu1 %3779  ;;  %v3795_v0 = vpop.permute.xlu0 %3794  ;;  %v3271_v43 = vpack.c.bf16 %v1081_v53, %v1079_v22  ;;  %v3274_v55 = vpack.c.bf16 %v1080_v17, %v1078_v7  ;;  %3253 = vmatprep.subr.msk.bf16.mxu0 %vm4959_vm12, %v3251_v19  ;;  %v1175_v19 = vld [vmem:[%s5985_s2 + $0x28] sm:$0xff]  ;;  %v1170_v22 = vld [vmem:[%s5985_s2] sm:$0xff]  ;;  %v1173_v17 = vld [vmem:[%s5985_s2 + $0x18] sm:$0xff] }
 0x1fd   : > { %v3781_v47 = vunpack.i.l.bf16 %v3780_v16  ;;  %v3797_v36 = vunpack.i.h.bf16 %v3795_v0  ;;  %v3796_v3 = vunpack.i.l.bf16 %v3795_v0  ;;  %v3782_v1 = vunpack.i.h.bf16 %v3780_v16  ;;  %v1174_v53 = vld [vmem:[%s5985_s2 + $0x20] sm:$0xff]  ;;  %v1176_v16 = vld [vmem:[%s5985_s2 + $0x30] sm:$0xff] }
 0x1fe   : > { %3273 = vmatprep.subr.msk.bf16.mxu1 %vm5010_vm14, %v3271_v43  ;;  %v1178_v7 = vld [vmem:[%s5985_s2 + $0x40] sm:$0xff]  ;;  %v1180_v0 = vld [vmem:[%s5985_s2 + $0x50] sm:$0xff]  ;;  %v1179_v43 = vld [vmem:[%s5985_s2 + $0x48] sm:$0xff] }
 0x1ff   : > { %v1085_v25 = vsel %vm362_vm10, %v3797_v36, %v4734_v60  ;;  %v1083_v58 = vsel %vm362_vm10, %v3796_v3, %v4734_v60  ;;  %3276 = vmatpush1.bf16.msk.msra.mxu1 %vm5020_vm15, %v3274_v55  ;;  %v1157_v15 = vsel %vm773_vm11, %v3781_v47, %v5096_v26  ;;  %3256 = vmatpush1.bf16.msk.msra.mxu0 %vm4972_vm13, %v3254_v29 }
 0x200   : > { %v3790_v49 = vpop.permute.xlu1 %3789  ;;  %v3805_v27 = vpop.permute.xlu0 %3804  ;;  %v3277_v63 = vpack.c.bf16 %v1085_v25, %v1083_v58  ;;  %3259 = vmatprep.subr.msk.bf16.mxu0 %vm4959_vm12, %v3257_v12  ;;  %v3263_v9 = vpack.c.bf16 %v1157_v15, %v1155_v13  ;;  %v1154_v33 = vsel %vm773_vm11, %v3782_v1, %v3776_v51 }
 0x201   : > { %v3791_v41 = vunpack.i.l.bf16 %v3790_v49  ;;  %v3807_v34 = vunpack.i.h.bf16 %v3805_v27  ;;  %v3806_v8 = vunpack.i.l.bf16 %v3805_v27  ;;  %v3792_v5 = vunpack.i.h.bf16 %v3790_v49 }
 0x202   : > { %3279 = vmatprep.subr.msk.bf16.mxu1 %vm5010_vm14, %v3277_v63 }
 0x203   : > { %v1082_v6 = vsel %vm362_vm10, %v3806_v8, %v3796_v3  ;;  %v1084_v4 = vsel %vm362_vm10, %v3807_v34, %v3797_v36  ;;  %v1156_v57 = vsel %vm773_vm11, %v3791_v41, %v3781_v47  ;;  %3262 = vmatpush1.bf16.msk.msra.mxu0 %vm4972_vm13, %v3260_v11  ;;  %v1159_v54 = vsel %vm773_vm11, %v3792_v5, %v5096_v26 }
 0x204   : > { %v3280_v42 = vpack.c.bf16 %v1084_v4, %v1082_v6  ;;  %v3800_v50 = vpop.permute.xlu1 %3799  ;;  %v3265_v44 = vpack.c.bf16 %v1156_v57, %v1154_v33  ;;  %3264 = vmatprep.subr.bf16.mxu0 %v3263_v9 }
 0x205   : > { %v3802_v24 = vunpack.i.h.bf16 %v3800_v50  ;;  %v3801_v20 = vunpack.i.l.bf16 %v3800_v50 }
 0x206   : > { %3282 = vmatpush1.bf16.msk.msra.mxu1 %vm5020_vm15, %v3280_v42 }
 0x207   : > { %v1161_v23 = vsel %vm773_vm11, %v3801_v20, %v5096_v26  ;;  %3266 = vmatpush1.bf16.msra.mxu0 %v3265_v44  ;;  %v1158_v61 = vsel %vm773_vm11, %v3802_v24, %v3792_v5 }
 0x208   : > { %v1151_v45 = vpop.permute.xlu1 %1150  ;;  %v3267_v56 = vpack.c.bf16 %v1161_v23, %v1159_v54 }
 0x209   : > { %v1160_v37 = vsel %vm773_vm11, %v1151_v45, %v3801_v20  ;;  %3028 = vmatmul.mubr.msk.f32.vlgmr.msra.gmra.mrb[0].mxu1 %vm1182_vm1, %v1172_v30 }
 0x20a   : > { %v3269_v52 = vpack.c.bf16 %v1160_v37, %v1158_v61  ;;  %3268 = vmatprep.subr.bf16.mxu0 %v3267_v56  ;;  %1354 = vmatprep.mubr.f32.mxu1 %v6029_v48 }
 0x20c   : > { %3270 = vmatpush1.bf16.msra.mxu0 %v3269_v52 }
 0x20d   : > { %3029 = vmatmul.mubr.msk.f32.gmra.mrb[2].mxu1 %vm1182_vm1, %v1175_v19 }
 0x20e   : > { %1360 = vmatprep.mubr.f32.mxu1 %v6029_v48 }
 0x20f   : > { %1260 = vmatmul.mubr.f32.vlgmr.msra.gmra.mrb[0].mxu0 %v1170_v22 }
 0x210   : > { %1265 = vmatprep.mubr.f32.mxu0 %v1174_v53 }
 0x211   : > { %3030 = vmatmul.mubr.msk.f32.gmra.mrb[4].mxu1 %vm1182_vm1, %v1178_v7 }
 0x212   : > { %1366 = vmatprep.mubr.f32.mxu1 %v6029_v48 }
 0x213   : > { %1266 = vmatmul.mubr.f32.gmra.mrb[2].mxu0 %v1173_v17  ;;  %v1694_v17 = vld [vmem:[%s5986_s3 + $0x8] sm:$0xff] }
 0x214   : > { %1271 = vmatprep.mubr.f32.mxu0 %v1177_v40 }
 0x215   : > { %3031 = vmatmul.mubr.msk.f32.gmra.mrb[6].mxu1 %vm1182_vm1, %v1181_v59 }
 0x216   : > { %1781 = vmatprep.mubr.f32.mxu1 %v1694_v17 }
 0x217   : > { %1272 = vmatmul.mubr.f32.gmra.mrb[4].mxu0 %v1176_v16 }
 0x218   : > { %1277 = vmatprep.mubr.f32.mxu0 %v1180_v0 }
 0x21b   : > { %1278 = vmatmul.mubr.f32.gmra.mrb[6].mxu0 %v1179_v43 }
 0x2dc   : > { %v1350_v55 = vpop.f32.mrb[0].mxu1 }
 0x2dd   : > { %v1352_v51 = vpop.f32.mrb[1].mxu1 }
 0x2e0   : > { %v1356_v47 = vpop.f32.mrb[2].mxu1 }
 0x2e1   : > { %v1358_v36 = vpop.f32.mrb[3].mxu1 }
 0x2e2   : > { %v1261_v3 = vpop.f32.mrb[0].mxu0 }
 0x2e3   : > { %v1351_v35 = vadd.f32 %v1350_v55, %v1261_v3  ;;  %v1263_v10 = vpop.f32.mrb[1].mxu0 }
 0x2e4   : > { %v1353_v1 = vadd.f32 %v1352_v51, %v1263_v10  ;;  %v1362_v29 = vpop.f32.mrb[4].mxu1 }
 0x2e5   : > { %v5187_v25 = vmax.f32 %v1351_v35, 0.0  ;;  %v1364_v58 = vpop.f32.mrb[5].mxu1 }
 0x2e6   : > { %v5189_v12 = vmax.f32 %v1353_v1, 0.0  ;;  %v1267_v15 = vpop.f32.mrb[2].mxu0 }
 0x2e7   : > { %v1357_v49 = vadd.f32 %v1356_v47, %v1267_v15  ;;  %v1269_v27 = vpop.f32.mrb[3].mxu0 }
 0x2e8   : > { %v1359_v63 = vadd.f32 %v1358_v36, %v1269_v27  ;;  %v3808_v41 = vpack.i.bf16 %v5189_v12, %v5187_v25  ;;  %v1368_v34 = vpop.f32.mrb[6].mxu1 }
 0x2e9   : > { %v5193_v8 = vmax.f32 %v1357_v49, 0.0  ;;  %v1370_v13 = vpop.f32.mrb[7].mxu1 }
 0x2ea   : > { %v5195_v11 = vmax.f32 %v1359_v63, 0.0  ;;  %3809 = vrot.lane.b32.xlu0 %v3808_v41, %s4301_s11  ;;  %v1273_v9 = vpop.f32.mrb[4].mxu0 }
 0x2eb   : > { %v1363_v33 = vadd.f32 %v1362_v29, %v1273_v9  ;;  %v1275_v5 = vpop.f32.mrb[5].mxu0  ;;  %v3893_v6 = vpack.i.bf16 %v5193_v8, %v5187_v25  ;;  %v3329_v23 = vpack.c.bf16 %v5193_v8, %v5187_v25 }
 0x2ec   : > { %v1365_v4 = vadd.f32 %v1364_v58, %v1275_v5  ;;  %v3813_v57 = vpack.i.bf16 %v5195_v11, %v5193_v8  ;;  %v3888_v50 = vpack.i.bf16 %v5195_v11, %v5189_v12  ;;  %v3327_v54 = vpack.c.bf16 %v5195_v11, %v5189_v12 }
 0x2ed   : > { %v5202_v42 = vmax.f32 %v1363_v33, 0.0 }
 0x2ee   : > { %v5206_v44 = vmax.f32 %v1365_v4, 0.0  ;;  %3814 = vrot.lane.b32.xlu1 %v3813_v57, %s4301_s11  ;;  %v1279_v24 = vpop.f32.mrb[6].mxu0 }
 0x2ef   : > { %v1369_v20 = vadd.f32 %v1368_v34, %v1279_v24  ;;  %v1281_v30 = vpop.f32.mrb[7].mxu0 }
 0x2f0   : > { %v1371_v45 = vadd.f32 %v1370_v13, %v1281_v30  ;;  %v3818_v56 = vpack.i.bf16 %v5206_v44, %v5202_v42 }
 0x2f1   : > { %v5215_v61 = vmax.f32 %v1369_v20, 0.0 }
 0x2f2   : > { %v5217_v37 = vmax.f32 %v1371_v45, 0.0  ;;  %3819 = vrot.lane.b32.xlu0 %v3818_v56, %s4301_s11 }
 0x2f3   : > { %v3898_v52 = vpack.i.bf16 %v5215_v61, %v5202_v42  ;;  %v3333_v7 = vpack.c.bf16 %v5215_v61, %v5202_v42 }
 0x2f4   : > { %v3828_v19 = vpack.i.bf16 %v5217_v37, %v5215_v61  ;;  %v3903_v22 = vpack.i.bf16 %v5217_v37, %v5206_v44  ;;  %v3331_v53 = vpack.c.bf16 %v5217_v37, %v5206_v44 }
 0x2f6   : > { %3824 = vrot.lane.b32.xlu0 %v3808_v41, %s4311_s16  ;;  %3829 = vrot.lane.b32.xlu1 %v3828_v19, %s4301_s11 }
 0x2fa   : > { %3839 = vrot.lane.b32.xlu0 %v3818_v56, %s4311_s16  ;;  %3834 = vrot.lane.b32.xlu1 %v3813_v57, %s4311_s16 }
 0x2fe   : > { %3844 = vrot.lane.b32.xlu0 %v3808_v41, %s4302_s12  ;;  %3849 = vrot.lane.b32.xlu1 %v3828_v19, %s4311_s16 }
 0x302   : > { %3859 = vrot.lane.b32.xlu0 %v3818_v56, %s4302_s12  ;;  %3854 = vrot.lane.b32.xlu1 %v3813_v57, %s4302_s12 }
 0x306   : > { %3864 = vrot.lane.b32.xlu0 %v3808_v41, %s4304_s13  ;;  %3869 = vrot.lane.b32.xlu1 %v3828_v19, %s4302_s12 }
 0x30a   : > { %3879 = vrot.lane.b32.xlu0 %v3818_v56, %s4304_s13  ;;  %3874 = vrot.lane.b32.xlu1 %v3813_v57, %s4304_s13 }
 0x30e   : > { %3889 = vrot.lane.b32.xlu0 %v3888_v50, %s4306_s14  ;;  %3884 = vrot.lane.b32.xlu1 %v3828_v19, %s4304_s13 }
 0x312   : > { %3904 = vrot.lane.b32.xlu0 %v3903_v22, %s4306_s14  ;;  %3894 = vrot.lane.b32.xlu1 %v3893_v6, %s4306_s14 }
 0x316   : > { %3909 = vrot.lane.b32.xlu0 %v3888_v50, %s4309_s15  ;;  %3899 = vrot.lane.b32.xlu1 %v3898_v52, %s4306_s14 }
 0x31a   : > { %3924 = vrot.lane.b32.xlu0 %v3903_v22, %s4309_s15  ;;  %3914 = vrot.lane.b32.xlu1 %v3893_v6, %s4309_s15 }
 0x31e   : > { %3929 = vrot.lane.b32.xlu0 %v3888_v50, %s4313_s18  ;;  %3919 = vrot.lane.b32.xlu1 %v3898_v52, %s4309_s15 }
 0x322   : > { %3939 = vrot.lane.b32.xlu0 %v3903_v22, %s4313_s18  ;;  %3934 = vrot.lane.b32.xlu1 %v3893_v6, %s4313_s18 }
 0x326   : > { %3949 = vrot.lane.b32.xlu0 %v3888_v50, %s4312_s17  ;;  %3944 = vrot.lane.b32.xlu1 %v3898_v52, %s4313_s18 }
 0x32a   : > { %3959 = vrot.lane.b32.xlu0 %v3903_v22, %s4312_s17  ;;  %3954 = vrot.lane.b32.xlu1 %v3893_v6, %s4312_s17 }
 0x32e   : > { %3964 = vrot.lane.b32.xlu1 %v3898_v52, %s4312_s17 }
 0x35c   : > { %v3810_v40 = vpop.permute.xlu0 %3809 }
 0x35d   : > { %v3812_v59 = vunpack.i.h.bf16 %v3810_v40  ;;  %v3811_v16 = vunpack.i.l.bf16 %v3810_v40 }
 0x35f   : > { %v1405_v51 = vsel %vm297_vm0, %v6032_v39, %v3811_v16  ;;  %v1406_v47 = vsel %vm297_vm0, %v3811_v16, %v3812_v59 }
 0x360   : > { %v3815_v0 = vpop.permute.xlu1 %3814 }
 0x361   : > { %v3817_v43 = vunpack.i.h.bf16 %v3815_v0  ;;  %v3816_v55 = vunpack.i.l.bf16 %v3815_v0 }
 0x363   : > { %v1407_v36 = vsel %vm297_vm0, %v6032_v39, %v3816_v55  ;;  %v1408_v3 = vsel %vm297_vm0, %v3816_v55, %v3817_v43 }
 0x364   : > { %v3283_v35 = vpack.c.bf16 %v1408_v3, %v1406_v47  ;;  %v3286_v10 = vpack.c.bf16 %v1407_v36, %v1405_v51  ;;  %v3820_v1 = vpop.permute.xlu0 %3819 }
 0x365   : > { %v3822_v29 = vunpack.i.h.bf16 %v3820_v1  ;;  %v3821_v58 = vunpack.i.l.bf16 %v3820_v1 }
 0x366   : > { %3285 = vmatprep.subr.msk.bf16.mxu1 %vm4959_vm12, %v3283_v35 }
 0x367   : > { %3288 = vmatpush1.bf16.msk.msra.mxu1 %vm4972_vm13, %v3286_v10  ;;  %v1409_v13 = vsel %vm297_vm0, %v6032_v39, %v3821_v58  ;;  %v1410_v9 = vsel %vm297_vm0, %v3821_v58, %v3822_v29 }
 0x368   : > { %v3825_v15 = vpop.permute.xlu0 %3824  ;;  %v3830_v49 = vpop.permute.xlu1 %3829 }
 0x369   : > { %v3832_v27 = vunpack.i.h.bf16 %v3830_v49  ;;  %v3831_v63 = vunpack.i.l.bf16 %v3830_v49  ;;  %v3827_v41 = vunpack.i.h.bf16 %v3825_v15  ;;  %v3826_v34 = vunpack.i.l.bf16 %v3825_v15 }
 0x36b   : > { %v1411_v33 = vsel %vm297_vm0, %v6032_v39, %v3831_v63  ;;  %v1412_v5 = vsel %vm297_vm0, %v3831_v63, %v3832_v27  ;;  %v1645_v30 = vsel %vm492_vm7, %v4986_v32, %v3826_v34  ;;  %v1646_v45 = vsel %vm492_vm7, %v3826_v34, %v3827_v41 }
 0x36c   : > { %v3289_v6 = vpack.c.bf16 %v1412_v5, %v1410_v9  ;;  %v3292_v4 = vpack.c.bf16 %v1411_v33, %v1409_v13  ;;  %v3840_v57 = vpop.permute.xlu0 %3839  ;;  %v3835_v50 = vpop.permute.xlu1 %3834 }
 0x36d   : > { %v3837_v24 = vunpack.i.h.bf16 %v3835_v50  ;;  %v3836_v20 = vunpack.i.l.bf16 %v3835_v50  ;;  %v3842_v56 = vunpack.i.h.bf16 %v3840_v57  ;;  %v3841_v52 = vunpack.i.l.bf16 %v3840_v57 }
 0x36e   : > { %3291 = vmatprep.subr.msk.bf16.mxu1 %vm4959_vm12, %v3289_v6 }
 0x36f   : > { %v1647_v19 = vsel %vm492_vm7, %v4986_v32, %v3836_v20  ;;  %3294 = vmatpush1.bf16.msk.msra.mxu1 %vm4972_vm13, %v3292_v4  ;;  %v1648_v22 = vsel %vm492_vm7, %v3836_v20, %v3837_v24  ;;  %v1649_v47 = vsel %vm492_vm7, %v4986_v32, %v3841_v52  ;;  %v1650_v3 = vsel %vm492_vm7, %v3841_v52, %v3842_v56 }
 0x370   : > { %v3297_v17 = vpack.c.bf16 %v1647_v19, %v1645_v30  ;;  %v3845_v40 = vpop.permute.xlu0 %3844  ;;  %v3850_v59 = vpop.permute.xlu1 %3849  ;;  %v3295_v16 = vpack.c.bf16 %v1648_v22, %v1646_v45 }
 0x371   : > { %v3852_v0 = vunpack.i.h.bf16 %v3850_v59  ;;  %v3851_v43 = vunpack.i.l.bf16 %v3850_v59  ;;  %v3847_v55 = vunpack.i.h.bf16 %v3845_v40  ;;  %v3846_v51 = vunpack.i.l.bf16 %v3845_v40 }
 0x372   : > { %3296 = vmatprep.subr.bf16.mxu1 %v3295_v16 }
 0x373   : > { %v1651_v36 = vsel %vm492_vm7, %v4986_v32, %v3851_v43  ;;  %3298 = vmatpush1.bf16.msra.mxu1 %v3297_v17  ;;  %v1652_v35 = vsel %vm492_vm7, %v3851_v43, %v3852_v0  ;;  %v1445_v27 = vsel %vm310_vm3, %v6035_v38, %v3846_v51  ;;  %v1446_v63 = vsel %vm310_vm3, %v3846_v51, %v3847_v55 }
 0x374   : > { %v3301_v10 = vpack.c.bf16 %v1651_v36, %v1649_v47  ;;  %v3860_v1 = vpop.permute.xlu0 %3859  ;;  %v3855_v29 = vpop.permute.xlu1 %3854  ;;  %v3299_v58 = vpack.c.bf16 %v1652_v35, %v1650_v3 }
 0x375   : > { %v3857_v15 = vunpack.i.h.bf16 %v3855_v29  ;;  %v3856_v49 = vunpack.i.l.bf16 %v3855_v29  ;;  %v3862_v41 = vunpack.i.h.bf16 %v3860_v1  ;;  %v3861_v34 = vunpack.i.l.bf16 %v3860_v1 }
 0x376   : > { %3300 = vmatprep.subr.bf16.mxu1 %v3299_v58 }
 0x377   : > { %v1447_v13 = vsel %vm310_vm3, %v6035_v38, %v3856_v49  ;;  %v1448_v9 = vsel %vm310_vm3, %v3856_v49, %v3857_v15  ;;  %3302 = vmatpush1.bf16.msra.mxu1 %v3301_v10  ;;  %v1449_v30 = vsel %vm310_vm3, %v6035_v38, %v3861_v34  ;;  %v1450_v45 = vsel %vm310_vm3, %v3861_v34, %v3862_v41 }
 0x378   : > { %v3303_v33 = vpack.c.bf16 %v1448_v9, %v1446_v63  ;;  %v3306_v5 = vpack.c.bf16 %v1447_v13, %v1445_v27  ;;  %v3865_v6 = vpop.permute.xlu0 %3864  ;;  %v3870_v4 = vpop.permute.xlu1 %3869 }
 0x379   : > { %v3872_v57 = vunpack.i.h.bf16 %v3870_v4  ;;  %v3871_v50 = vunpack.i.l.bf16 %v3870_v4  ;;  %v3867_v24 = vunpack.i.h.bf16 %v3865_v6  ;;  %v3866_v20 = vunpack.i.l.bf16 %v3865_v6 }
 0x37a   : > { %3305 = vmatprep.subr.msk.bf16.mxu1 %vm5010_vm14, %v3303_v33 }
 0x37b   : > { %v1451_v56 = vsel %vm310_vm3, %v6035_v38, %v3871_v50  ;;  %v1452_v52 = vsel %vm310_vm3, %v3871_v50, %v3872_v57  ;;  %3308 = vmatpush1.bf16.msk.msra.mxu1 %vm5020_vm15, %v3306_v5  ;;  %v1485_v0 = vsel %vm323_vm6, %v6040_v21, %v3866_v20  ;;  %v1486_v43 = vsel %vm323_vm6, %v3866_v20, %v3867_v24 }
 0x37c   : > { %v3309_v19 = vpack.c.bf16 %v1452_v52, %v1450_v45  ;;  %v3312_v22 = vpack.c.bf16 %v1451_v56, %v1449_v30  ;;  %v3880_v17 = vpop.permute.xlu0 %3879  ;;  %v3875_v40 = vpop.permute.xlu1 %3874 }
 0x37d   : > { %v3877_v59 = vunpack.i.h.bf16 %v3875_v40  ;;  %v3876_v16 = vunpack.i.l.bf16 %v3875_v40  ;;  %v3882_v55 = vunpack.i.h.bf16 %v3880_v17  ;;  %v3881_v51 = vunpack.i.l.bf16 %v3880_v17 }
 0x37e   : > { %3311 = vmatprep.subr.msk.bf16.mxu1 %vm5010_vm14, %v3309_v19 }
 0x37f   : > { %v1487_v47 = vsel %vm323_vm6, %v6040_v21, %v3876_v16  ;;  %v1488_v36 = vsel %vm323_vm6, %v3876_v16, %v3877_v59  ;;  %3314 = vmatpush1.bf16.msk.msra.mxu1 %vm5020_vm15, %v3312_v22  ;;  %v1489_v15 = vsel %vm323_vm6, %v6040_v21, %v3881_v51  ;;  %v1490_v49 = vsel %vm323_vm6, %v3881_v51, %v3882_v55 }
 0x380   : > { %v3315_v3 = vpack.c.bf16 %v1488_v36, %v1486_v43  ;;  %v3318_v35 = vpack.c.bf16 %v1487_v47, %v1485_v0  ;;  %v3890_v10 = vpop.permute.xlu0 %3889  ;;  %v3885_v1 = vpop.permute.xlu1 %3884 }
 0x381   : > { %v3887_v29 = vunpack.i.h.bf16 %v3885_v1  ;;  %v3886_v58 = vunpack.i.l.bf16 %v3885_v1  ;;  %v3892_v33 = vunpack.i.h.bf16 %v3890_v10  ;;  %v3891_v5 = vunpack.i.l.bf16 %v3890_v10 }
 0x382   : > { %3317 = vmatprep.subr.msk.bf16.mxu1 %vm4959_vm12, %v3315_v3 }
 0x383   : > { %v1491_v27 = vsel %vm323_vm6, %v6040_v21, %v3886_v58  ;;  %v1492_v63 = vsel %vm323_vm6, %v3886_v58, %v3887_v29  ;;  %3320 = vmatpush1.bf16.msk.msra.mxu1 %vm4972_vm13, %v3318_v35  ;;  %v1528_v24 = vsel %vm336_vm8, %v3892_v33, %v4573_v28  ;;  %v1526_v20 = vsel %vm336_vm8, %v3891_v5, %v4573_v28 }
 0x384   : > { %v3321_v41 = vpack.c.bf16 %v1492_v63, %v1490_v49  ;;  %v3324_v34 = vpack.c.bf16 %v1491_v27, %v1489_v15  ;;  %v3905_v13 = vpop.permute.xlu0 %3904  ;;  %v3895_v9 = vpop.permute.xlu1 %3894  ;;  %v3335_v22 = vpack.c.bf16 %v1528_v24, %v1526_v20 }
 0x385   : > { %v3897_v57 = vunpack.i.h.bf16 %v3895_v9  ;;  %v3896_v50 = vunpack.i.l.bf16 %v3895_v9  ;;  %v3907_v30 = vunpack.i.h.bf16 %v3905_v13  ;;  %v3906_v45 = vunpack.i.l.bf16 %v3905_v13 }
 0x386   : > { %3323 = vmatprep.subr.msk.bf16.mxu1 %vm4959_vm12, %v3321_v41 }
 0x387   : > { %3326 = vmatpush1.bf16.msk.msra.mxu1 %vm4972_vm13, %v3324_v34  ;;  %v1527_v12 = vsel %vm336_vm8, %v3897_v57, %v3892_v33  ;;  %v1525_v11 = vsel %vm336_vm8, %v3896_v50, %v3891_v5  ;;  %v1532_v17 = vsel %vm336_vm8, %v3907_v30, %v4573_v28  ;;  %v1530_v25 = vsel %vm336_vm8, %v3906_v45, %v4573_v28 }
 0x388   : > { %v3910_v6 = vpop.permute.xlu0 %3909  ;;  %v3900_v4 = vpop.permute.xlu1 %3899  ;;  %3328 = vmatprep.subr.bf16.mxu1 %v3327_v54  ;;  %v3338_v44 = vpack.c.bf16 %v1527_v12, %v1525_v11  ;;  %v3341_v43 = vpack.c.bf16 %v1532_v17, %v1530_v25 }
 0x389   : > { %v3902_v54 = vunpack.i.h.bf16 %v3900_v4  ;;  %v3901_v19 = vunpack.i.l.bf16 %v3900_v4  ;;  %v3912_v8 = vunpack.i.h.bf16 %v3910_v6 }
 0x38b   : > { %3330 = vmatpush1.bf16.msra.mxu1 %v3329_v23  ;;  %v3911_v23 = vunpack.i.l.bf16 %v3910_v6  ;;  %v1531_v40 = vsel %vm336_vm8, %v3902_v54, %v3907_v30  ;;  %v1529_v59 = vsel %vm336_vm8, %v3901_v19, %v3906_v45  ;;  %v1568_v55 = vsel %vm349_vm9, %v3912_v8, %v6041_v2 }
 0x38c   : > { %v3925_v56 = vpop.permute.xlu0 %3924  ;;  %v3915_v52 = vpop.permute.xlu1 %3914  ;;  %3332 = vmatprep.subr.bf16.mxu1 %v3331_v53  ;;  %v3344_v51 = vpack.c.bf16 %v1531_v40, %v1529_v59 }
 0x38d   : > { %v3917_v16 = vunpack.i.h.bf16 %v3915_v52  ;;  %v3916_v0 = vunpack.i.l.bf16 %v3915_v52  ;;  %v1566_v42 = vsel %vm349_vm9, %v3911_v23, %v6041_v2  ;;  %v3927_v61 = vunpack.i.h.bf16 %v3925_v56 }
 0x38e   : > { %v3347_v15 = vpack.c.bf16 %v1568_v55, %v1566_v42 }
 0x38f   : > { %3334 = vmatpush1.bf16.msra.mxu1 %v3333_v7  ;;  %v3926_v7 = vunpack.i.l.bf16 %v3925_v56  ;;  %v1567_v10 = vsel %vm349_vm9, %v3917_v16, %v3912_v8  ;;  %v1565_v1 = vsel %vm349_vm9, %v3916_v0, %v3911_v23  ;;  %v1572_v49 = vsel %vm349_vm9, %v3927_v61, %v6041_v2 }
 0x390   : > { %v3930_v37 = vpop.permute.xlu0 %3929  ;;  %v3920_v53 = vpop.permute.xlu1 %3919  ;;  %3337 = vmatprep.subr.msk.bf16.mxu1 %vm5010_vm14, %v3335_v22  ;;  %v3350_v63 = vpack.c.bf16 %v1567_v10, %v1565_v1  ;;  %v1693_v10 = vld [vmem:[%s5986_s3] sm:$0xff] }
 0x391   : > { %v3922_v47 = vunpack.i.h.bf16 %v3920_v53  ;;  %v3921_v36 = vunpack.i.l.bf16 %v3920_v53  ;;  %v3932_v29 = vunpack.i.h.bf16 %v3930_v37  ;;  %v3931_v58 = vunpack.i.l.bf16 %v3930_v37  ;;  %v1697_v1 = vld [vmem:[%s5986_s3 + $0x20] sm:$0xff] }
 0x392   : > { %v1570_v27 = vsel %vm349_vm9, %v3926_v7, %v6041_v2 }
 0x393   : > { %3340 = vmatpush1.bf16.msk.msra.mxu1 %vm5020_vm15, %v3338_v44  ;;  %v1571_v41 = vsel %vm349_vm9, %v3922_v47, %v3927_v61  ;;  %v1569_v34 = vsel %vm349_vm9, %v3921_v36, %v3926_v7  ;;  %v1678_v5 = vsel %vm773_vm11, %v3931_v58, %v5096_v26  ;;  %v1680_v6 = vsel %vm773_vm11, %v3932_v29, %v5096_v26 }
 0x394   : > { %v3940_v3 = vpop.permute.xlu0 %3939  ;;  %v3935_v35 = vpop.permute.xlu1 %3934  ;;  %3343 = vmatprep.subr.msk.bf16.mxu1 %vm5010_vm14, %v3341_v43  ;;  %v3353_v4 = vpack.c.bf16 %v1572_v49, %v1570_v27  ;;  %v3356_v20 = vpack.c.bf16 %v1571_v41, %v1569_v34  ;;  %v3359_v30 = vpack.c.bf16 %v1680_v6, %v1678_v5  ;;  %v1696_v27 = vld [vmem:[%s5986_s3 + $0x18] sm:$0xff]  ;;  %v1699_v34 = vld [vmem:[%s5986_s3 + $0x30] sm:$0xff]  ;;  %v1698_v5 = vld [vmem:[%s5986_s3 + $0x28] sm:$0xff] }
 0x395   : > { %v3937_v9 = vunpack.i.h.bf16 %v3935_v35  ;;  %v3936_v33 = vunpack.i.l.bf16 %v3935_v35  ;;  %v3942_v57 = vunpack.i.h.bf16 %v3940_v3  ;;  %v3941_v50 = vunpack.i.l.bf16 %v3940_v3  ;;  %v1701_v6 = vld [vmem:[%s5986_s3 + $0x40] sm:$0xff] }
 0x397   : > { %3346 = vmatpush1.bf16.msk.msra.mxu1 %vm5020_vm15, %v3344_v51  ;;  %v1679_v45 = vsel %vm773_vm11, %v3937_v9, %v3932_v29  ;;  %v1677_v56 = vsel %vm773_vm11, %v3936_v33, %v3931_v58  ;;  %v1682_v22 = vsel %vm773_vm11, %v3941_v50, %v5096_v26  ;;  %v1684_v17 = vsel %vm773_vm11, %v3942_v57, %v5096_v26  ;;  %v1702_v9 = vld [vmem:[%s5986_s3 + $0x48] sm:$0xff]  ;;  %v1695_v33 = vld [vmem:[%s5986_s3 + $0x10] sm:$0xff] }
 0x398   : > { %v3945_v13 = vpop.permute.xlu1 %3944  ;;  %3349 = vmatprep.subr.msk.bf16.mxu1 %vm4959_vm12, %v3347_v15  ;;  %v3950_v24 = vpop.permute.xlu0 %3949  ;;  %v3361_v8 = vpack.c.bf16 %v1679_v45, %v1677_v56  ;;  %v3363_v37 = vpack.c.bf16 %v1684_v17, %v1682_v22 }
 0x399   : > { %v3952_v52 = vunpack.i.h.bf16 %v3950_v24  ;;  %v3951_v12 = vunpack.i.l.bf16 %v3950_v24  ;;  %v3947_v54 = vunpack.i.h.bf16 %v3945_v13  ;;  %v3946_v19 = vunpack.i.l.bf16 %v3945_v13  ;;  %v1703_v13 = vld [vmem:[%s5986_s3 + $0x50] sm:$0xff] }
 0x39b   : > { %3352 = vmatpush1.bf16.msk.msra.mxu1 %vm4972_vm13, %v3350_v63  ;;  %v1608_v23 = vsel %vm362_vm10, %v3952_v52, %v4734_v60  ;;  %v1606_v44 = vsel %vm362_vm10, %v3951_v12, %v4734_v60  ;;  %v1683_v53 = vsel %vm773_vm11, %v3947_v54, %v3942_v57  ;;  %v1681_v40 = vsel %vm773_vm11, %v3946_v19, %v3941_v50  ;;  %v1700_v63 = vld [vmem:[%s5986_s3 + $0x38] sm:$0xff] }
 0x39c   : > { %3355 = vmatprep.subr.msk.bf16.mxu1 %vm4959_vm12, %v3353_v4  ;;  %v3955_v11 = vpop.permute.xlu1 %3954  ;;  %v3960_v25 = vpop.permute.xlu0 %3959  ;;  %v3367_v42 = vpack.c.bf16 %v1608_v23, %v1606_v44  ;;  %v3365_v61 = vpack.c.bf16 %v1683_v53, %v1681_v40  ;;  %v1704_v4 = vld [vmem:[%s5986_s3 + $0x58] sm:$0xff] }
 0x39d   : > { %v3957_v59 = vunpack.i.h.bf16 %v3955_v11  ;;  %v3956_v16 = vunpack.i.l.bf16 %v3955_v11  ;;  %v3962_v0 = vunpack.i.h.bf16 %v3960_v25  ;;  %v3961_v43 = vunpack.i.l.bf16 %v3960_v25 }
 0x39f   : > { %3358 = vmatpush1.bf16.msk.msra.mxu1 %vm4972_vm13, %v3356_v20  ;;  %v1607_v7 = vsel %vm362_vm10, %v3957_v59, %v3952_v52  ;;  %v1605_v51 = vsel %vm362_vm10, %v3956_v16, %v3951_v12  ;;  %v1612_v3 = vsel %vm362_vm10, %v3962_v0, %v4734_v60  ;;  %v1610_v35 = vsel %vm362_vm10, %v3961_v43, %v4734_v60 }
 0x3a0   : > { %3360 = vmatprep.subr.bf16.mxu1 %v3359_v30  ;;  %v3965_v55 = vpop.permute.xlu1 %3964  ;;  %v3370_v29 = vpack.c.bf16 %v1607_v7, %v1605_v51  ;;  %v3373_v58 = vpack.c.bf16 %v1612_v3, %v1610_v35  ;;  %v2216_v7 = vld [vmem:[%s5987_s4 + $0x8] sm:$0xff] }
 0x3a1   : > { %v3967_v47 = vunpack.i.h.bf16 %v3965_v55  ;;  %v3966_v36 = vunpack.i.l.bf16 %v3965_v55  ;;  %2303 = vmatprep.mubr.f32.mxu0 %v2216_v7 }
 0x3a3   : > { %3362 = vmatpush1.bf16.msra.mxu1 %v3361_v8  ;;  %v1611_v15 = vsel %vm362_vm10, %v3967_v47, %v3962_v0  ;;  %v1609_v49 = vsel %vm362_vm10, %v3966_v36, %v3961_v43 }
 0x3a4   : > { %3364 = vmatprep.subr.bf16.mxu1 %v3363_v37  ;;  %v3376_v41 = vpack.c.bf16 %v1611_v15, %v1609_v49 }
 0x3a7   : > { %3366 = vmatpush1.bf16.msra.mxu1 %v3365_v61 }
 0x3a8   : > { %3369 = vmatprep.subr.msk.bf16.mxu1 %vm5010_vm14, %v3367_v42 }
 0x3aa   : > { %1782 = vmatmul.mubr.f32.vlgmr.msra.gmra.mrb[8].mxu1 %v1693_v10 }
 0x3ab   : > { %3372 = vmatpush1.bf16.msk.msra.mxu1 %vm5020_vm15, %v3370_v29  ;;  %1787 = vmatprep.mubr.f32.mxu1 %v1697_v1 }
 0x3ac   : > { %3375 = vmatprep.subr.msk.bf16.mxu1 %vm5010_vm14, %v3373_v58 }
 0x3ae   : > { %1788 = vmatmul.mubr.f32.gmra.mrb[10].mxu1 %v1696_v27 }
 0x3af   : > { %3378 = vmatpush1.bf16.msk.msra.mxu1 %vm5020_vm15, %v3376_v41  ;;  %1793 = vmatprep.mubr.f32.mxu1 %v1700_v63 }
 0x3b2   : > { %1794 = vmatmul.mubr.f32.gmra.mrb[12].mxu1 %v1699_v34 }
 0x3b3   : > { %1799 = vmatprep.mubr.f32.mxu1 %v1703_v13 }
 0x3b6   : > { %1800 = vmatmul.mubr.f32.gmra.mrb[14].mxu1 %v1702_v9 }
 0x3b7   : > { %1870 = vmatprep.mubr.f32.mxu1 %v6029_v48 }
 0x3ba   : > { %3080 = vmatmul.mubr.msk.f32.vlgmr.msra.gmra.mrb[8].mxu1 %vm1182_vm1, %v1695_v33 }
 0x3bb   : > { %1876 = vmatprep.mubr.f32.mxu1 %v6029_v48 }
 0x3be   : > { %3081 = vmatmul.mubr.msk.f32.gmra.mrb[10].mxu1 %vm1182_vm1, %v1698_v5 }
 0x3bf   : > { %1882 = vmatprep.mubr.f32.mxu1 %v6029_v48 }
 0x3c2   : > { %3082 = vmatmul.mubr.msk.f32.gmra.mrb[12].mxu1 %vm1182_vm1, %v1701_v6 }
 0x3c3   : > { %1888 = vmatprep.mubr.f32.mxu1 %v6029_v48 }
 0x3c6   : > { %3083 = vmatmul.mubr.msk.f32.gmra.mrb[14].mxu1 %vm1182_vm1, %v1704_v4 }
 0x48d   : > { %v1872_v57 = vpop.f32.mrb[8].mxu1 }
 0x48e   : > { %v5459_v50 = vmax.f32 %v1872_v57, 0.0  ;;  %v1874_v24 = vpop.f32.mrb[9].mxu1 }
 0x48f   : > { %v5461_v20 = vmax.f32 %v1874_v24, 0.0 }
 0x491   : > { %v1878_v30 = vpop.f32.mrb[10].mxu1  ;;  %v3968_v45 = vpack.i.bf16 %v5461_v20, %v5459_v50 }
 0x492   : > { %v5465_v56 = vmax.f32 %v1878_v30, 0.0  ;;  %v1880_v52 = vpop.f32.mrb[11].mxu1 }
 0x493   : > { %v5467_v12 = vmax.f32 %v1880_v52, 0.0  ;;  %3969 = vrot.lane.b32.xlu0 %v3968_v45, %s4301_s11 }
 0x494   : > { %v4053_v11 = vpack.i.bf16 %v5465_v56, %v5459_v50  ;;  %v3425_v44 = vpack.c.bf16 %v5465_v56, %v5459_v50 }
 0x495   : > { %v1884_v54 = vpop.f32.mrb[12].mxu1  ;;  %v3973_v19 = vpack.i.bf16 %v5467_v12, %v5465_v56  ;;  %v4048_v25 = vpack.i.bf16 %v5467_v12, %v5461_v20  ;;  %v3423_v23 = vpack.c.bf16 %v5467_v12, %v5461_v20 }
 0x496   : > { %v5474_v22 = vmax.f32 %v1884_v54, 0.0  ;;  %v1886_v17 = vpop.f32.mrb[13].mxu1 }
 0x497   : > { %v5478_v8 = vmax.f32 %v1886_v17, 0.0  ;;  %3974 = vrot.lane.b32.xlu1 %v3973_v19, %s4301_s11 }
 0x499   : > { %v1890_v37 = vpop.f32.mrb[14].mxu1  ;;  %v3978_v53 = vpack.i.bf16 %v5478_v8, %v5474_v22 }
 0x49a   : > { %v5487_v40 = vmax.f32 %v1890_v37, 0.0  ;;  %v1892_v59 = vpop.f32.mrb[15].mxu1 }
 0x49b   : > { %v5489_v16 = vmax.f32 %v1892_v59, 0.0  ;;  %3979 = vrot.lane.b32.xlu0 %v3978_v53, %s4301_s11 }
 0x49c   : > { %v4058_v0 = vpack.i.bf16 %v5487_v40, %v5474_v22  ;;  %v3429_v61 = vpack.c.bf16 %v5487_v40, %v5474_v22 }
 0x49d   : > { %v3988_v43 = vpack.i.bf16 %v5489_v16, %v5487_v40  ;;  %v4063_v55 = vpack.i.bf16 %v5489_v16, %v5478_v8  ;;  %v3427_v42 = vpack.c.bf16 %v5489_v16, %v5478_v8 }
 0x49f   : > { %3984 = vrot.lane.b32.xlu0 %v3968_v45, %s4311_s16  ;;  %3989 = vrot.lane.b32.xlu1 %v3988_v43, %s4301_s11 }
 0x4a3   : > { %3999 = vrot.lane.b32.xlu0 %v3978_v53, %s4311_s16  ;;  %3994 = vrot.lane.b32.xlu1 %v3973_v19, %s4311_s16 }
 0x4a7   : > { %4004 = vrot.lane.b32.xlu0 %v3968_v45, %s4302_s12  ;;  %4009 = vrot.lane.b32.xlu1 %v3988_v43, %s4311_s16 }
 0x4ab   : > { %4019 = vrot.lane.b32.xlu0 %v3978_v53, %s4302_s12  ;;  %4014 = vrot.lane.b32.xlu1 %v3973_v19, %s4302_s12 }
 0x4af   : > { %4024 = vrot.lane.b32.xlu0 %v3968_v45, %s4304_s13  ;;  %4029 = vrot.lane.b32.xlu1 %v3988_v43, %s4302_s12 }
 0x4b3   : > { %4039 = vrot.lane.b32.xlu0 %v3978_v53, %s4304_s13  ;;  %4034 = vrot.lane.b32.xlu1 %v3973_v19, %s4304_s13 }
 0x4b7   : > { %4049 = vrot.lane.b32.xlu0 %v4048_v25, %s4306_s14  ;;  %4044 = vrot.lane.b32.xlu1 %v3988_v43, %s4304_s13 }
 0x4bb   : > { %4064 = vrot.lane.b32.xlu0 %v4063_v55, %s4306_s14  ;;  %4054 = vrot.lane.b32.xlu1 %v4053_v11, %s4306_s14 }
 0x4bf   : > { %4069 = vrot.lane.b32.xlu0 %v4048_v25, %s4309_s15  ;;  %4059 = vrot.lane.b32.xlu1 %v4058_v0, %s4306_s14 }
 0x4c3   : > { %4084 = vrot.lane.b32.xlu0 %v4063_v55, %s4309_s15  ;;  %4074 = vrot.lane.b32.xlu1 %v4053_v11, %s4309_s15 }
 0x4c7   : > { %4089 = vrot.lane.b32.xlu0 %v4048_v25, %s4313_s18  ;;  %4079 = vrot.lane.b32.xlu1 %v4058_v0, %s4309_s15 }
 0x4cb   : > { %4099 = vrot.lane.b32.xlu0 %v4063_v55, %s4313_s18  ;;  %4094 = vrot.lane.b32.xlu1 %v4053_v11, %s4313_s18 }
 0x4cf   : > { %4109 = vrot.lane.b32.xlu0 %v4048_v25, %s4312_s17  ;;  %4104 = vrot.lane.b32.xlu1 %v4058_v0, %s4313_s18 }
 0x4d3   : > { %4119 = vrot.lane.b32.xlu0 %v4063_v55, %s4312_s17  ;;  %4114 = vrot.lane.b32.xlu1 %v4053_v11, %s4312_s17 }
 0x4d7   : > { %4124 = vrot.lane.b32.xlu1 %v4058_v0, %s4312_s17 }
 0x505   : > { %v3970_v51 = vpop.permute.xlu0 %3969 }
 0x506   : > { %v3972_v47 = vunpack.i.h.bf16 %v3970_v51  ;;  %v3971_v36 = vunpack.i.l.bf16 %v3970_v51 }
 0x508   : > { %v1927_v1 = vsel %vm297_vm0, %v6032_v39, %v3971_v36  ;;  %v1928_v29 = vsel %vm297_vm0, %v3971_v36, %v3972_v47 }
 0x509   : > { %v3975_v3 = vpop.permute.xlu1 %3974 }
 0x50a   : > { %v3977_v35 = vunpack.i.h.bf16 %v3975_v3  ;;  %v3976_v10 = vunpack.i.l.bf16 %v3975_v3 }
 0x50c   : > { %v1929_v58 = vsel %vm297_vm0, %v6032_v39, %v3976_v10  ;;  %v1930_v15 = vsel %vm297_vm0, %v3976_v10, %v3977_v35 }
 0x50d   : > { %v3379_v49 = vpack.c.bf16 %v1930_v15, %v1928_v29  ;;  %v3382_v27 = vpack.c.bf16 %v1929_v58, %v1927_v1  ;;  %v3980_v63 = vpop.permute.xlu0 %3979 }
 0x50e   : > { %v3982_v41 = vunpack.i.h.bf16 %v3980_v63  ;;  %v3981_v34 = vunpack.i.l.bf16 %v3980_v63 }
 0x50f   : > { %3381 = vmatprep.subr.msk.bf16.mxu0 %vm4959_vm12, %v3379_v49 }
 0x510   : > { %3384 = vmatpush1.bf16.msk.msra.mxu0 %vm4972_vm13, %v3382_v27  ;;  %v1931_v57 = vsel %vm297_vm0, %v6032_v39, %v3981_v34  ;;  %v1932_v24 = vsel %vm297_vm0, %v3981_v34, %v3982_v41 }
 0x511   : > { %v3985_v13 = vpop.permute.xlu0 %3984  ;;  %v3990_v9 = vpop.permute.xlu1 %3989 }
 0x512   : > { %v3992_v33 = vunpack.i.h.bf16 %v3990_v9  ;;  %v3991_v5 = vunpack.i.l.bf16 %v3990_v9  ;;  %v3987_v6 = vunpack.i.h.bf16 %v3985_v13  ;;  %v3986_v4 = vunpack.i.l.bf16 %v3985_v13 }
 0x514   : > { %v1933_v30 = vsel %vm297_vm0, %v6032_v39, %v3991_v5  ;;  %v1934_v45 = vsel %vm297_vm0, %v3991_v5, %v3992_v33  ;;  %v2167_v37 = vsel %vm492_vm7, %v4986_v32, %v3986_v4  ;;  %v2168_v53 = vsel %vm492_vm7, %v3986_v4, %v3987_v6 }
 0x515   : > { %v3385_v52 = vpack.c.bf16 %v1934_v45, %v1932_v24  ;;  %v3388_v11 = vpack.c.bf16 %v1933_v30, %v1931_v57  ;;  %v4000_v54 = vpop.permute.xlu0 %3999  ;;  %v3995_v19 = vpop.permute.xlu1 %3994 }
 0x516   : > { %v3997_v17 = vunpack.i.h.bf16 %v3995_v19  ;;  %v3996_v25 = vunpack.i.l.bf16 %v3995_v19  ;;  %v4002_v59 = vunpack.i.h.bf16 %v4000_v54  ;;  %v4001_v0 = vunpack.i.l.bf16 %v4000_v54 }
 0x517   : > { %3387 = vmatprep.subr.msk.bf16.mxu0 %vm4959_vm12, %v3385_v52 }
 0x518   : > { %v2169_v43 = vsel %vm492_vm7, %v4986_v32, %v3996_v25  ;;  %3390 = vmatpush1.bf16.msk.msra.mxu0 %vm4972_vm13, %v3388_v11  ;;  %v2170_v55 = vsel %vm492_vm7, %v3996_v25, %v3997_v17  ;;  %v2171_v29 = vsel %vm492_vm7, %v4986_v32, %v4001_v0  ;;  %v2172_v15 = vsel %vm492_vm7, %v4001_v0, %v4002_v59 }
 0x519   : > { %v3393_v7 = vpack.c.bf16 %v2169_v43, %v2167_v37  ;;  %v4005_v51 = vpop.permute.xlu0 %4004  ;;  %v4010_v47 = vpop.permute.xlu1 %4009  ;;  %v3391_v36 = vpack.c.bf16 %v2170_v55, %v2168_v53 }
 0x51a   : > { %v4012_v3 = vunpack.i.h.bf16 %v4010_v47  ;;  %v4011_v35 = vunpack.i.l.bf16 %v4010_v47  ;;  %v4007_v10 = vunpack.i.h.bf16 %v4005_v51  ;;  %v4006_v1 = vunpack.i.l.bf16 %v4005_v51 }
 0x51b   : > { %3392 = vmatprep.subr.bf16.mxu0 %v3391_v36 }
 0x51c   : > { %v2173_v58 = vsel %vm492_vm7, %v4986_v32, %v4011_v35  ;;  %3394 = vmatpush1.bf16.msra.mxu0 %v3393_v7  ;;  %v2174_v49 = vsel %vm492_vm7, %v4011_v35, %v4012_v3  ;;  %v1967_v33 = vsel %vm310_vm3, %v6035_v38, %v4006_v1  ;;  %v1968_v5 = vsel %vm310_vm3, %v4006_v1, %v4007_v10 }
 0x51d   : > { %v3397_v27 = vpack.c.bf16 %v2173_v58, %v2171_v29  ;;  %v4020_v63 = vpop.permute.xlu0 %4019  ;;  %v4015_v41 = vpop.permute.xlu1 %4014  ;;  %v3395_v34 = vpack.c.bf16 %v2174_v49, %v2172_v15 }
 0x51e   : > { %v4017_v13 = vunpack.i.h.bf16 %v4015_v41  ;;  %v4016_v9 = vunpack.i.l.bf16 %v4015_v41  ;;  %v4022_v6 = vunpack.i.h.bf16 %v4020_v63  ;;  %v4021_v4 = vunpack.i.l.bf16 %v4020_v63 }
 0x51f   : > { %3396 = vmatprep.subr.bf16.mxu0 %v3395_v34 }
 0x520   : > { %v1969_v57 = vsel %vm310_vm3, %v6035_v38, %v4016_v9  ;;  %v1970_v24 = vsel %vm310_vm3, %v4016_v9, %v4017_v13  ;;  %3398 = vmatpush1.bf16.msra.mxu0 %v3397_v27  ;;  %v1971_v37 = vsel %vm310_vm3, %v6035_v38, %v4021_v4  ;;  %v1972_v53 = vsel %vm310_vm3, %v4021_v4, %v4022_v6 }
 0x521   : > { %v3399_v30 = vpack.c.bf16 %v1970_v24, %v1968_v5  ;;  %v3402_v45 = vpack.c.bf16 %v1969_v57, %v1967_v33  ;;  %v4025_v52 = vpop.permute.xlu0 %4024  ;;  %v4030_v11 = vpop.permute.xlu1 %4029 }
 0x522   : > { %v4032_v54 = vunpack.i.h.bf16 %v4030_v11  ;;  %v4031_v19 = vunpack.i.l.bf16 %v4030_v11  ;;  %v4027_v17 = vunpack.i.h.bf16 %v4025_v52  ;;  %v4026_v25 = vunpack.i.l.bf16 %v4025_v52 }
 0x523   : > { %3401 = vmatprep.subr.msk.bf16.mxu0 %vm5010_vm14, %v3399_v30 }
 0x524   : > { %v1973_v59 = vsel %vm310_vm3, %v6035_v38, %v4031_v19  ;;  %v1974_v0 = vsel %vm310_vm3, %v4031_v19, %v4032_v54  ;;  %3404 = vmatpush1.bf16.msk.msra.mxu0 %vm5020_vm15, %v3402_v45  ;;  %v2007_v3 = vsel %vm323_vm6, %v6040_v21, %v4026_v25  ;;  %v2008_v35 = vsel %vm323_vm6, %v4026_v25, %v4027_v17 }
 0x525   : > { %v3405_v43 = vpack.c.bf16 %v1974_v0, %v1972_v53  ;;  %v3408_v55 = vpack.c.bf16 %v1973_v59, %v1971_v37  ;;  %v4040_v7 = vpop.permute.xlu0 %4039  ;;  %v4035_v51 = vpop.permute.xlu1 %4034 }
 0x526   : > { %v4037_v47 = vunpack.i.h.bf16 %v4035_v51  ;;  %v4036_v36 = vunpack.i.l.bf16 %v4035_v51  ;;  %v4042_v10 = vunpack.i.h.bf16 %v4040_v7  ;;  %v4041_v1 = vunpack.i.l.bf16 %v4040_v7 }
 0x527   : > { %3407 = vmatprep.subr.msk.bf16.mxu0 %vm5010_vm14, %v3405_v43 }
 0x528   : > { %v2009_v29 = vsel %vm323_vm6, %v6040_v21, %v4036_v36  ;;  %v2010_v58 = vsel %vm323_vm6, %v4036_v36, %v4037_v47  ;;  %3410 = vmatpush1.bf16.msk.msra.mxu0 %vm5020_vm15, %v3408_v55  ;;  %v2011_v13 = vsel %vm323_vm6, %v6040_v21, %v4041_v1  ;;  %v2012_v9 = vsel %vm323_vm6, %v4041_v1, %v4042_v10 }
 0x529   : > { %v3411_v15 = vpack.c.bf16 %v2010_v58, %v2008_v35  ;;  %v3414_v49 = vpack.c.bf16 %v2009_v29, %v2007_v3  ;;  %v4050_v27 = vpop.permute.xlu0 %4049  ;;  %v4045_v63 = vpop.permute.xlu1 %4044 }
 0x52a   : > { %v4047_v41 = vunpack.i.h.bf16 %v4045_v63  ;;  %v4046_v34 = vunpack.i.l.bf16 %v4045_v63  ;;  %v4052_v30 = vunpack.i.h.bf16 %v4050_v27  ;;  %v4051_v45 = vunpack.i.l.bf16 %v4050_v27 }
 0x52b   : > { %3413 = vmatprep.subr.msk.bf16.mxu0 %vm4959_vm12, %v3411_v15 }
 0x52c   : > { %v2013_v33 = vsel %vm323_vm6, %v6040_v21, %v4046_v34  ;;  %v2014_v5 = vsel %vm323_vm6, %v4046_v34, %v4047_v41  ;;  %3416 = vmatpush1.bf16.msk.msra.mxu0 %vm4972_vm13, %v3414_v49  ;;  %v2050_v17 = vsel %vm336_vm8, %v4052_v30, %v4573_v28  ;;  %v2048_v25 = vsel %vm336_vm8, %v4051_v45, %v4573_v28 }
 0x52d   : > { %v3417_v6 = vpack.c.bf16 %v2014_v5, %v2012_v9  ;;  %v3420_v4 = vpack.c.bf16 %v2013_v33, %v2011_v13  ;;  %v4065_v57 = vpop.permute.xlu0 %4064  ;;  %v4055_v24 = vpop.permute.xlu1 %4054  ;;  %v3431_v55 = vpack.c.bf16 %v2050_v17, %v2048_v25 }
 0x52e   : > { %v4057_v54 = vunpack.i.h.bf16 %v4055_v24  ;;  %v4056_v19 = vunpack.i.l.bf16 %v4055_v24  ;;  %v4067_v37 = vunpack.i.h.bf16 %v4065_v57  ;;  %v4066_v53 = vunpack.i.l.bf16 %v4065_v57 }
 0x52f   : > { %3419 = vmatprep.subr.msk.bf16.mxu0 %vm4959_vm12, %v3417_v6 }
 0x530   : > { %3422 = vmatpush1.bf16.msk.msra.mxu0 %vm4972_vm13, %v3420_v4  ;;  %v2049_v20 = vsel %vm336_vm8, %v4057_v54, %v4052_v30  ;;  %v2047_v12 = vsel %vm336_vm8, %v4056_v19, %v4051_v45  ;;  %v2054_v7 = vsel %vm336_vm8, %v4067_v37, %v4573_v28  ;;  %v2052_v50 = vsel %vm336_vm8, %v4066_v53, %v4573_v28 }
 0x531   : > { %v4070_v52 = vpop.permute.xlu0 %4069  ;;  %v4060_v11 = vpop.permute.xlu1 %4059  ;;  %3424 = vmatprep.subr.bf16.mxu0 %v3423_v23  ;;  %v3434_v8 = vpack.c.bf16 %v2049_v20, %v2047_v12  ;;  %v3437_v35 = vpack.c.bf16 %v2054_v7, %v2052_v50 }
 0x532   : > { %v4062_v23 = vunpack.i.h.bf16 %v4060_v11  ;;  %v4061_v43 = vunpack.i.l.bf16 %v4060_v11  ;;  %v4072_v56 = vunpack.i.h.bf16 %v4070_v52 }
 0x534   : > { %3426 = vmatpush1.bf16.msra.mxu0 %v3425_v44  ;;  %v4071_v44 = vunpack.i.l.bf16 %v4070_v52  ;;  %v2053_v51 = vsel %vm336_vm8, %v4062_v23, %v4067_v37  ;;  %v2051_v47 = vsel %vm336_vm8, %v4061_v43, %v4066_v53  ;;  %v2090_v10 = vsel %vm349_vm9, %v4072_v56, %v6041_v2 }
 0x535   : > { %v4085_v59 = vpop.permute.xlu0 %4084  ;;  %v4075_v0 = vpop.permute.xlu1 %4074  ;;  %3428 = vmatprep.subr.bf16.mxu0 %v3427_v42  ;;  %v3440_v1 = vpack.c.bf16 %v2053_v51, %v2051_v47 }
 0x536   : > { %v4077_v36 = vunpack.i.h.bf16 %v4075_v0  ;;  %v4076_v3 = vunpack.i.l.bf16 %v4075_v0  ;;  %v2088_v22 = vsel %vm349_vm9, %v4071_v44, %v6041_v2  ;;  %v4087_v40 = vunpack.i.h.bf16 %v4085_v59 }
 0x537   : > { %v3443_v13 = vpack.c.bf16 %v2090_v10, %v2088_v22 }
 0x538   : > { %3430 = vmatpush1.bf16.msra.mxu0 %v3429_v61  ;;  %v4086_v61 = vunpack.i.l.bf16 %v4085_v59  ;;  %v2089_v27 = vsel %vm349_vm9, %v4077_v36, %v4072_v56  ;;  %v2087_v63 = vsel %vm349_vm9, %v4076_v3, %v4071_v44  ;;  %v2094_v9 = vsel %vm349_vm9, %v4087_v40, %v6041_v2 }
 0x539   : > { %v4090_v16 = vpop.permute.xlu0 %4089  ;;  %v4080_v42 = vpop.permute.xlu1 %4079  ;;  %3433 = vmatprep.subr.msk.bf16.mxu0 %vm5010_vm14, %v3431_v55  ;;  %v3446_v5 = vpack.c.bf16 %v2089_v27, %v2087_v63  ;;  %v2215_v27 = vld [vmem:[%s5987_s4] sm:$0xff] }
 0x53a   : > { %v4082_v29 = vunpack.i.h.bf16 %v4080_v42  ;;  %v4081_v58 = vunpack.i.l.bf16 %v4080_v42  ;;  %v4092_v41 = vunpack.i.h.bf16 %v4090_v16  ;;  %v4091_v34 = vunpack.i.l.bf16 %v4090_v16  ;;  %v2219_v63 = vld [vmem:[%s5987_s4 + $0x20] sm:$0xff] }
 0x53b   : > { %v2092_v33 = vsel %vm349_vm9, %v4086_v61, %v6041_v2 }
 0x53c   : > { %3436 = vmatpush1.bf16.msk.msra.mxu0 %vm5020_vm15, %v3434_v8  ;;  %v2093_v6 = vsel %vm349_vm9, %v4082_v29, %v4087_v40  ;;  %v2091_v4 = vsel %vm349_vm9, %v4081_v58, %v4086_v61  ;;  %v2200_v45 = vsel %vm773_vm11, %v4091_v34, %v5096_v26  ;;  %v2202_v52 = vsel %vm773_vm11, %v4092_v41, %v5096_v26 }
 0x53d   : > { %v4100_v15 = vpop.permute.xlu0 %4099  ;;  %v4095_v49 = vpop.permute.xlu1 %4094  ;;  %3439 = vmatprep.subr.msk.bf16.mxu0 %vm5010_vm14, %v3437_v35  ;;  %v3449_v11 = vpack.c.bf16 %v2094_v9, %v2092_v33  ;;  %v3452_v25 = vpack.c.bf16 %v2093_v6, %v2091_v4  ;;  %v3455_v37 = vpack.c.bf16 %v2202_v52, %v2200_v45  ;;  %v2218_v33 = vld [vmem:[%s5987_s4 + $0x18] sm:$0xff]  ;;  %v2221_v4 = vld [vmem:[%s5987_s4 + $0x30] sm:$0xff]  ;;  %v2220_v45 = vld [vmem:[%s5987_s4 + $0x28] sm:$0xff] }
 0x53e   : > { %v4097_v24 = vunpack.i.h.bf16 %v4095_v49  ;;  %v4096_v30 = vunpack.i.l.bf16 %v4095_v49  ;;  %v4102_v54 = vunpack.i.h.bf16 %v4100_v15  ;;  %v4101_v19 = vunpack.i.l.bf16 %v4100_v15  ;;  %v2223_v52 = vld [vmem:[%s5987_s4 + $0x40] sm:$0xff] }
 0x540   : > { %3442 = vmatpush1.bf16.msk.msra.mxu0 %vm5020_vm15, %v3440_v1  ;;  %v2201_v53 = vsel %vm773_vm11, %v4097_v24, %v4092_v41  ;;  %v2199_v59 = vsel %vm773_vm11, %v4096_v30, %v4091_v34  ;;  %v2204_v55 = vsel %vm773_vm11, %v4101_v19, %v5096_v26  ;;  %v2206_v7 = vsel %vm773_vm11, %v4102_v54, %v5096_v26  ;;  %v2224_v24 = vld [vmem:[%s5987_s4 + $0x48] sm:$0xff]  ;;  %v2217_v30 = vld [vmem:[%s5987_s4 + $0x10] sm:$0xff] }
 0x541   : > { %v4105_v57 = vpop.permute.xlu1 %4104  ;;  %3445 = vmatprep.subr.msk.bf16.mxu0 %vm4959_vm12, %v3443_v13  ;;  %v4110_v17 = vpop.permute.xlu0 %4109  ;;  %v3457_v56 = vpack.c.bf16 %v2201_v53, %v2199_v59  ;;  %v3459_v16 = vpack.c.bf16 %v2206_v7, %v2204_v55 }
 0x542   : > { %v4112_v0 = vunpack.i.h.bf16 %v4110_v17  ;;  %v4111_v20 = vunpack.i.l.bf16 %v4110_v17  ;;  %v4107_v23 = vunpack.i.h.bf16 %v4105_v57  ;;  %v4106_v43 = vunpack.i.l.bf16 %v4105_v57  ;;  %v2225_v57 = vld [vmem:[%s5987_s4 + $0x50] sm:$0xff] }
 0x544   : > { %3448 = vmatpush1.bf16.msk.msra.mxu0 %vm4972_vm13, %v3446_v5  ;;  %v2130_v44 = vsel %vm362_vm10, %v4112_v0, %v4734_v60  ;;  %v2128_v8 = vsel %vm362_vm10, %v4111_v20, %v4734_v60  ;;  %v2205_v42 = vsel %vm773_vm11, %v4107_v23, %v4102_v54  ;;  %v2203_v51 = vsel %vm773_vm11, %v4106_v43, %v4101_v19  ;;  %v2222_v5 = vld [vmem:[%s5987_s4 + $0x38] sm:$0xff] }
 0x545   : > { %3451 = vmatprep.subr.msk.bf16.mxu0 %vm4959_vm12, %v3449_v11  ;;  %v4115_v12 = vpop.permute.xlu1 %4114  ;;  %v4120_v50 = vpop.permute.xlu0 %4119  ;;  %v3463_v22 = vpack.c.bf16 %v2130_v44, %v2128_v8  ;;  %v3461_v40 = vpack.c.bf16 %v2205_v42, %v2203_v51  ;;  %v2226_v11 = vld [vmem:[%s5987_s4 + $0x58] sm:$0xff] }
 0x546   : > { %v4117_v47 = vunpack.i.h.bf16 %v4115_v12  ;;  %v4116_v36 = vunpack.i.l.bf16 %v4115_v12  ;;  %v4122_v3 = vunpack.i.h.bf16 %v4120_v50  ;;  %v4121_v35 = vunpack.i.l.bf16 %v4120_v50 }
 0x548   : > { %3454 = vmatpush1.bf16.msk.msra.mxu0 %vm4972_vm13, %v3452_v25  ;;  %v2129_v61 = vsel %vm362_vm10, %v4117_v47, %v4112_v0  ;;  %v2127_v1 = vsel %vm362_vm10, %v4116_v36, %v4111_v20  ;;  %v2134_v15 = vsel %vm362_vm10, %v4122_v3, %v4734_v60  ;;  %v2132_v49 = vsel %vm362_vm10, %v4121_v35, %v4734_v60 }
 0x549   : > { %3456 = vmatprep.subr.bf16.mxu0 %v3455_v37  ;;  %v4125_v10 = vpop.permute.xlu1 %4124  ;;  %v3466_v41 = vpack.c.bf16 %v2129_v61, %v2127_v1  ;;  %v3469_v34 = vpack.c.bf16 %v2134_v15, %v2132_v49  ;;  %v5803_v61 = vld [vmem:[%s5988_s5] sm:$0x7] }
 0x54a   : > { %v4127_v29 = vunpack.i.h.bf16 %v4125_v10  ;;  %v4126_v58 = vunpack.i.l.bf16 %v4125_v10  ;;  %v6042_v1 = vld [vmem:[#allocation2_spill] sm:$0xff] }
 0x54c   : > { %3458 = vmatpush1.bf16.msra.mxu0 %v3457_v56  ;;  %v2133_v13 = vsel %vm362_vm10, %v4127_v29, %v4122_v3  ;;  %v2131_v9 = vsel %vm362_vm10, %v4126_v58, %v4121_v35  ;;  %v6043_v29 = vsub.s32 1, %v6042_v1 }
 0x54d   : > { %3460 = vmatprep.subr.bf16.mxu0 %v3459_v16  ;;  %v3472_v6 = vpack.c.bf16 %v2133_v13, %v2131_v9 }
 0x54e   : > { %v2746_v58 = vrot.slane %v5803_v61, %v6043_v29 }
 0x550   : > { %3462 = vmatpush1.bf16.msra.mxu0 %v3461_v40  ;;  %2819 = vmatprep.mubr.f32.mxu1 %v2746_v58 }
 0x551   : > { %3465 = vmatprep.subr.msk.bf16.mxu0 %vm5010_vm14, %v3463_v22 }
 0x553   : > { %2304 = vmatmul.mubr.f32.vlgmr.msra.gmra.mrb[8].mxu0 %v2215_v27 }
 0x554   : > { %3468 = vmatpush1.bf16.msk.msra.mxu0 %vm5020_vm15, %v3466_v41  ;;  %2309 = vmatprep.mubr.f32.mxu0 %v2219_v63 }
 0x555   : > { %3471 = vmatprep.subr.msk.bf16.mxu0 %vm5010_vm14, %v3469_v34 }
 0x557   : > { %2310 = vmatmul.mubr.f32.gmra.mrb[10].mxu0 %v2218_v33 }
 0x558   : > { %3474 = vmatpush1.bf16.msk.msra.mxu0 %vm5020_vm15, %v3472_v6  ;;  %2315 = vmatprep.mubr.f32.mxu0 %v2222_v5 }
 0x55b   : > { %2316 = vmatmul.mubr.f32.gmra.mrb[12].mxu0 %v2221_v4 }
 0x55c   : > { %2321 = vmatprep.mubr.f32.mxu0 %v2225_v57 }
 0x55f   : > { %2322 = vmatmul.mubr.f32.gmra.mrb[14].mxu0 %v2224_v24 }
 0x560   : > { %2392 = vmatprep.mubr.f32.mxu0 %v6029_v48 }
 0x563   : > { %3132 = vmatmul.mubr.msk.f32.vlgmr.msra.gmra.mrb[8].mxu0 %vm1182_vm1, %v2217_v30 }
 0x564   : > { %2398 = vmatprep.mubr.f32.mxu0 %v6029_v48 }
 0x567   : > { %3133 = vmatmul.mubr.msk.f32.gmra.mrb[10].mxu0 %vm1182_vm1, %v2220_v45 }
 0x568   : > { %2404 = vmatprep.mubr.f32.mxu0 %v6029_v48 }
 0x56b   : > { %3134 = vmatmul.mubr.msk.f32.gmra.mrb[12].mxu0 %vm1182_vm1, %v2223_v52 }
 0x56c   : > { %2410 = vmatprep.mubr.f32.mxu0 %v6029_v48 }
 0x56f   : > { %3135 = vmatmul.mubr.msk.f32.gmra.mrb[14].mxu0 %vm1182_vm1, %v2226_v11 }
 0x636   : > { %v2394_v54 = vpop.f32.mrb[8].mxu0 }
 0x637   : > { %v5731_v19 = vmax.f32 %v2394_v54, 0.0  ;;  %v2396_v17 = vpop.f32.mrb[9].mxu0 }
 0x638   : > { %v5733_v25 = vmax.f32 %v2396_v17, 0.0 }
 0x63a   : > { %v2400_v37 = vpop.f32.mrb[10].mxu0  ;;  %v4128_v53 = vpack.i.bf16 %v5733_v25, %v5731_v19 }
 0x63b   : > { %v5737_v59 = vmax.f32 %v2400_v37, 0.0  ;;  %v2402_v0 = vpop.f32.mrb[11].mxu0 }
 0x63c   : > { %v5739_v20 = vmax.f32 %v2402_v0, 0.0  ;;  %4129 = vrot.lane.b32.xlu0 %v4128_v53, %s4301_s11 }
 0x63d   : > { %v4213_v12 = vpack.i.bf16 %v5737_v59, %v5731_v19  ;;  %v3521_v8 = vpack.c.bf16 %v5737_v59, %v5731_v19 }
 0x63e   : > { %v2406_v23 = vpop.f32.mrb[12].mxu0  ;;  %v4133_v43 = vpack.i.bf16 %v5739_v20, %v5737_v59  ;;  %v4208_v50 = vpack.i.bf16 %v5739_v20, %v5733_v25  ;;  %v3519_v44 = vpack.c.bf16 %v5739_v20, %v5733_v25 }
 0x63f   : > { %v5746_v55 = vmax.f32 %v2406_v23, 0.0  ;;  %v2408_v7 = vpop.f32.mrb[13].mxu0 }
 0x640   : > { %v5750_v56 = vmax.f32 %v2408_v7, 0.0  ;;  %4134 = vrot.lane.b32.xlu1 %v4133_v43, %s4301_s11 }
 0x642   : > { %v2412_v16 = vpop.f32.mrb[14].mxu0  ;;  %v4138_v42 = vpack.i.bf16 %v5750_v56, %v5746_v55 }
 0x643   : > { %v5759_v51 = vmax.f32 %v2412_v16, 0.0  ;;  %v2414_v47 = vpop.f32.mrb[15].mxu0 }
 0x644   : > { %v5761_v36 = vmax.f32 %v2414_v47, 0.0  ;;  %4139 = vrot.lane.b32.xlu0 %v4138_v42, %s4301_s11 }
 0x645   : > { %v4218_v3 = vpack.i.bf16 %v5759_v51, %v5746_v55  ;;  %v3525_v40 = vpack.c.bf16 %v5759_v51, %v5746_v55 }
 0x646   : > { %v4148_v35 = vpack.i.bf16 %v5761_v36, %v5759_v51  ;;  %v4223_v10 = vpack.i.bf16 %v5761_v36, %v5750_v56  ;;  %v3523_v22 = vpack.c.bf16 %v5761_v36, %v5750_v56 }
 0x648   : > { %4144 = vrot.lane.b32.xlu0 %v4128_v53, %s4311_s16  ;;  %4149 = vrot.lane.b32.xlu1 %v4148_v35, %s4301_s11 }
 0x64c   : > { %4159 = vrot.lane.b32.xlu0 %v4138_v42, %s4311_s16  ;;  %4154 = vrot.lane.b32.xlu1 %v4133_v43, %s4311_s16 }
 0x650   : > { %4164 = vrot.lane.b32.xlu0 %v4128_v53, %s4302_s12  ;;  %4169 = vrot.lane.b32.xlu1 %v4148_v35, %s4311_s16 }
 0x654   : > { %4179 = vrot.lane.b32.xlu0 %v4138_v42, %s4302_s12  ;;  %4174 = vrot.lane.b32.xlu1 %v4133_v43, %s4302_s12 }
 0x658   : > { %4184 = vrot.lane.b32.xlu0 %v4128_v53, %s4304_s13  ;;  %4189 = vrot.lane.b32.xlu1 %v4148_v35, %s4302_s12 }
 0x65c   : > { %4199 = vrot.lane.b32.xlu0 %v4138_v42, %s4304_s13  ;;  %4194 = vrot.lane.b32.xlu1 %v4133_v43, %s4304_s13 }
 0x660   : > { %4209 = vrot.lane.b32.xlu0 %v4208_v50, %s4306_s14  ;;  %4204 = vrot.lane.b32.xlu1 %v4148_v35, %s4304_s13 }
 0x664   : > { %4224 = vrot.lane.b32.xlu0 %v4223_v10, %s4306_s14  ;;  %4214 = vrot.lane.b32.xlu1 %v4213_v12, %s4306_s14 }
 0x668   : > { %4229 = vrot.lane.b32.xlu0 %v4208_v50, %s4309_s15  ;;  %4219 = vrot.lane.b32.xlu1 %v4218_v3, %s4306_s14 }
 0x66c   : > { %4244 = vrot.lane.b32.xlu0 %v4223_v10, %s4309_s15  ;;  %4234 = vrot.lane.b32.xlu1 %v4213_v12, %s4309_s15 }
 0x670   : > { %4249 = vrot.lane.b32.xlu0 %v4208_v50, %s4313_s18  ;;  %4239 = vrot.lane.b32.xlu1 %v4218_v3, %s4309_s15  ;;  %s246_s15 = scalar_lea.vmem %s5989_s6, %s2978_s7 }
 0x674   : > { %4264 = vrot.lane.b32.xlu0 %v4223_v10, %s4313_s18  ;;  %4254 = vrot.lane.b32.xlu1 %v4213_v12, %s4313_s18 }
 0x678   : > { %4269 = vrot.lane.b32.xlu0 %v4208_v50, %s4312_s17  ;;  %4259 = vrot.lane.b32.xlu1 %v4218_v3, %s4313_s18 }
 0x67c   : > { %4279 = vrot.lane.b32.xlu0 %v4223_v10, %s4312_s17  ;;  %4274 = vrot.lane.b32.xlu1 %v4213_v12, %s4312_s17 }
 0x680   : > { %4284 = vrot.lane.b32.xlu1 %v4218_v3, %s4312_s17 }
 0x6ae   : > { %v4130_v15 = vpop.permute.xlu0 %4129 }
 0x6af   : > { %v4132_v49 = vunpack.i.h.bf16 %v4130_v15  ;;  %v4131_v27 = vunpack.i.l.bf16 %v4130_v15 }
 0x6b1   : > { %v2449_v13 = vsel %vm297_vm0, %v6032_v39, %v4131_v27  ;;  %v2450_v9 = vsel %vm297_vm0, %v4131_v27, %v4132_v49 }
 0x6b2   : > { %v4135_v63 = vpop.permute.xlu1 %4134 }
 0x6b3   : > { %v4137_v41 = vunpack.i.h.bf16 %v4135_v63  ;;  %v4136_v34 = vunpack.i.l.bf16 %v4135_v63 }
 0x6b5   : > { %v2451_v33 = vsel %vm297_vm0, %v6032_v39, %v4136_v34  ;;  %v2452_v5 = vsel %vm297_vm0, %v4136_v34, %v4137_v41 }
 0x6b6   : > { %v3475_v6 = vpack.c.bf16 %v2452_v5, %v2450_v9  ;;  %v3478_v4 = vpack.c.bf16 %v2451_v33, %v2449_v13  ;;  %v4140_v57 = vpop.permute.xlu0 %4139 }
 0x6b7   : > { %v4142_v24 = vunpack.i.h.bf16 %v4140_v57  ;;  %v4141_v30 = vunpack.i.l.bf16 %v4140_v57 }
 0x6b8   : > { %3477 = vmatprep.subr.msk.bf16.mxu1 %vm4959_vm12, %v3475_v6 }
 0x6b9   : > { %3480 = vmatpush1.bf16.msk.msra.mxu1 %vm4972_vm13, %v3478_v4  ;;  %v2453_v53 = vsel %vm297_vm0, %v6032_v39, %v4141_v30  ;;  %v2454_v0 = vsel %vm297_vm0, %v4141_v30, %v4142_v24 }
 0x6ba   : > { %v4145_v45 = vpop.permute.xlu0 %4144  ;;  %v4150_v52 = vpop.permute.xlu1 %4149 }
 0x6bb   : > { %v4152_v11 = vunpack.i.h.bf16 %v4150_v52  ;;  %v4151_v54 = vunpack.i.l.bf16 %v4150_v52  ;;  %v4147_v17 = vunpack.i.h.bf16 %v4145_v45  ;;  %v4146_v37 = vunpack.i.l.bf16 %v4145_v45 }
 0x6bd   : > { %v2455_v12 = vsel %vm297_vm0, %v6032_v39, %v4151_v54  ;;  %v2456_v23 = vsel %vm297_vm0, %v4151_v54, %v4152_v11  ;;  %v2689_v3 = vsel %vm492_vm7, %v4986_v32, %v4146_v37  ;;  %v2690_v35 = vsel %vm492_vm7, %v4146_v37, %v4147_v17 }
 0x6be   : > { %v3481_v43 = vpack.c.bf16 %v2456_v23, %v2454_v0  ;;  %v3484_v7 = vpack.c.bf16 %v2455_v12, %v2453_v53  ;;  %v4160_v50 = vpop.permute.xlu0 %4159  ;;  %v4155_v16 = vpop.permute.xlu1 %4154  ;;  %vm2917_vm0 = vcmp.lt.s32.totalorder %v6044_v18, 256 }
 0x6bf   : > { %v4157_v42 = vunpack.i.h.bf16 %v4155_v16  ;;  %v4156_v47 = vunpack.i.l.bf16 %v4155_v16  ;;  %v4162_v10 = vunpack.i.h.bf16 %v4160_v50  ;;  %v4161_v29 = vunpack.i.l.bf16 %v4160_v50 }
 0x6c0   : > { %3483 = vmatprep.subr.msk.bf16.mxu1 %vm4959_vm12, %v3481_v43 }
 0x6c1   : > { %v2691_v39 = vsel %vm492_vm7, %v4986_v32, %v4156_v47  ;;  %3486 = vmatpush1.bf16.msk.msra.mxu1 %vm4972_vm13, %v3484_v7  ;;  %v2692_v58 = vsel %vm492_vm7, %v4156_v47, %v4157_v42  ;;  %v2693_v33 = vsel %vm492_vm7, %v4986_v32, %v4161_v29  ;;  %v2694_v6 = vsel %vm492_vm7, %v4161_v29, %v4162_v10 }
 0x6c2   : > { %v3489_v15 = vpack.c.bf16 %v2691_v39, %v2689_v3  ;;  %v4165_v49 = vpop.permute.xlu0 %4164  ;;  %v4170_v27 = vpop.permute.xlu1 %4169  ;;  %v3487_v63 = vpack.c.bf16 %v2692_v58, %v2690_v35 }
 0x6c3   : > { %v4172_v41 = vunpack.i.h.bf16 %v4170_v27  ;;  %v4171_v34 = vunpack.i.l.bf16 %v4170_v27  ;;  %v4167_v13 = vunpack.i.h.bf16 %v4165_v49  ;;  %v4166_v9 = vunpack.i.l.bf16 %v4165_v49 }
 0x6c4   : > { %3488 = vmatprep.subr.bf16.mxu1 %v3487_v63 }
 0x6c5   : > { %v2695_v5 = vsel %vm492_vm7, %v4986_v32, %v4171_v34  ;;  %3490 = vmatpush1.bf16.msra.mxu1 %v3489_v15  ;;  %v2696_v4 = vsel %vm492_vm7, %v4171_v34, %v4172_v41  ;;  %v2489_v54 = vsel %vm310_vm3, %v6035_v38, %v4166_v9  ;;  %v2490_v17 = vsel %vm310_vm3, %v4166_v9, %v4167_v13 }
 0x6c6   : > { %v3493_v57 = vpack.c.bf16 %v2695_v5, %v2693_v33  ;;  %v4180_v24 = vpop.permute.xlu0 %4179  ;;  %v4175_v30 = vpop.permute.xlu1 %4174  ;;  %v3491_v45 = vpack.c.bf16 %v2696_v4, %v2694_v6 }
 0x6c7   : > { %v4177_v52 = vunpack.i.h.bf16 %v4175_v30  ;;  %v4176_v11 = vunpack.i.l.bf16 %v4175_v30  ;;  %v4182_v37 = vunpack.i.h.bf16 %v4180_v24  ;;  %v4181_v53 = vunpack.i.l.bf16 %v4180_v24 }
 0x6c8   : > { %3492 = vmatprep.subr.bf16.mxu1 %v3491_v45 }
 0x6c9   : > { %v2491_v32 = vsel %vm310_vm3, %v6035_v38, %v4176_v11  ;;  %v2492_v0 = vsel %vm310_vm3, %v4176_v11, %v4177_v52  ;;  %3494 = vmatpush1.bf16.msra.mxu1 %v3493_v57  ;;  %v2493_v3 = vsel %vm310_vm3, %v6035_v38, %v4181_v53  ;;  %v2494_v35 = vsel %vm310_vm3, %v4181_v53, %v4182_v37 }
 0x6ca   : > { %v3495_v12 = vpack.c.bf16 %v2492_v0, %v2490_v17  ;;  %v3498_v23 = vpack.c.bf16 %v2491_v32, %v2489_v54  ;;  %v4185_v43 = vpop.permute.xlu0 %4184  ;;  %v4190_v7 = vpop.permute.xlu1 %4189 }
 0x6cb   : > { %v4192_v50 = vunpack.i.h.bf16 %v4190_v7  ;;  %v4191_v16 = vunpack.i.l.bf16 %v4190_v7  ;;  %v4187_v42 = vunpack.i.h.bf16 %v4185_v43  ;;  %v4186_v47 = vunpack.i.l.bf16 %v4185_v43 }
 0x6cc   : > { %3497 = vmatprep.subr.msk.bf16.mxu1 %vm5010_vm14, %v3495_v12 }
 0x6cd   : > { %v2495_v10 = vsel %vm310_vm3, %v6035_v38, %v4191_v16  ;;  %v2496_v29 = vsel %vm310_vm3, %v4191_v16, %v4192_v50  ;;  %3500 = vmatpush1.bf16.msk.msra.mxu1 %vm5020_vm15, %v3498_v23  ;;  %v2529_v41 = vsel %vm323_vm6, %v6040_v21, %v4186_v47  ;;  %v2530_v34 = vsel %vm323_vm6, %v4186_v47, %v4187_v42 }
 0x6ce   : > { %v3501_v39 = vpack.c.bf16 %v2496_v29, %v2494_v35  ;;  %v3504_v58 = vpack.c.bf16 %v2495_v10, %v2493_v3  ;;  %v4200_v15 = vpop.permute.xlu0 %4199  ;;  %v4195_v49 = vpop.permute.xlu1 %4194 }
 0x6cf   : > { %v4197_v27 = vunpack.i.h.bf16 %v4195_v49  ;;  %v4196_v63 = vunpack.i.l.bf16 %v4195_v49  ;;  %v4202_v38 = vunpack.i.h.bf16 %v4200_v15  ;;  %v4201_v13 = vunpack.i.l.bf16 %v4200_v15 }
 0x6d0   : > { %3503 = vmatprep.subr.msk.bf16.mxu1 %vm5010_vm14, %v3501_v39 }
 0x6d1   : > { %v2531_v9 = vsel %vm323_vm6, %v6040_v21, %v4196_v63  ;;  %v2532_v33 = vsel %vm323_vm6, %v4196_v63, %v4197_v27  ;;  %3506 = vmatpush1.bf16.msk.msra.mxu1 %vm5020_vm15, %v3504_v58  ;;  %v2533_v45 = vsel %vm323_vm6, %v6040_v21, %v4201_v13  ;;  %v2534_v52 = vsel %vm323_vm6, %v4201_v13, %v4202_v38 }
 0x6d2   : > { %v3507_v5 = vpack.c.bf16 %v2532_v33, %v2530_v34  ;;  %v3510_v6 = vpack.c.bf16 %v2531_v9, %v2529_v41  ;;  %v4210_v4 = vpop.permute.xlu0 %4209  ;;  %v4205_v57 = vpop.permute.xlu1 %4204 }
 0x6d3   : > { %v4207_v24 = vunpack.i.h.bf16 %v4205_v57  ;;  %v4206_v30 = vunpack.i.l.bf16 %v4205_v57  ;;  %v4212_v0 = vunpack.i.h.bf16 %v4210_v4  ;;  %v4211_v12 = vunpack.i.l.bf16 %v4210_v4 }
 0x6d4   : > { %3509 = vmatprep.subr.msk.bf16.mxu1 %vm4959_vm12, %v3507_v5 }
 0x6d5   : > { %v2535_v11 = vsel %vm323_vm6, %v6040_v21, %v4206_v30  ;;  %v2536_v54 = vsel %vm323_vm6, %v4206_v30, %v4207_v24  ;;  %3512 = vmatpush1.bf16.msk.msra.mxu1 %vm4972_vm13, %v3510_v6  ;;  %v2572_v50 = vsel %vm336_vm8, %v4212_v0, %v4573_v28  ;;  %v2570_v16 = vsel %vm336_vm8, %v4211_v12, %v4573_v28 }
 0x6d6   : > { %v3513_v17 = vpack.c.bf16 %v2536_v54, %v2534_v52  ;;  %v3516_v37 = vpack.c.bf16 %v2535_v11, %v2533_v45  ;;  %v4225_v53 = vpop.permute.xlu0 %4224  ;;  %v4215_v32 = vpop.permute.xlu1 %4214  ;;  %v3527_v29 = vpack.c.bf16 %v2572_v50, %v2570_v16 }
 0x6d7   : > { %v4217_v21 = vunpack.i.h.bf16 %v4215_v32  ;;  %v4216_v7 = vunpack.i.l.bf16 %v4215_v32  ;;  %v4227_v42 = vunpack.i.h.bf16 %v4225_v53  ;;  %v4226_v47 = vunpack.i.l.bf16 %v4225_v53 }
 0x6d8   : > { %3515 = vmatprep.subr.msk.bf16.mxu1 %vm4959_vm12, %v3513_v17 }
 0x6d9   : > { %3518 = vmatpush1.bf16.msk.msra.mxu1 %vm4972_vm13, %v3516_v37  ;;  %v2571_v25 = vsel %vm336_vm8, %v4217_v21, %v4212_v0  ;;  %v2569_v20 = vsel %vm336_vm8, %v4216_v7, %v4211_v12  ;;  %v2576_v39 = vsel %vm336_vm8, %v4227_v42, %v4573_v28  ;;  %v2574_v19 = vsel %vm336_vm8, %v4226_v47, %v4573_v28 }
 0x6da   : > { %v4230_v23 = vpop.permute.xlu0 %4229  ;;  %v4220_v43 = vpop.permute.xlu1 %4219  ;;  %3520 = vmatprep.subr.bf16.mxu1 %v3519_v44  ;;  %v3530_v56 = vpack.c.bf16 %v2571_v25, %v2569_v20  ;;  %v3533_v63 = vpack.c.bf16 %v2576_v39, %v2574_v19 }
 0x6db   : > { %v4222_v44 = vunpack.i.h.bf16 %v4220_v43  ;;  %v4221_v10 = vunpack.i.l.bf16 %v4220_v43  ;;  %v4232_v59 = vunpack.i.h.bf16 %v4230_v23 }
 0x6dd   : > { %3522 = vmatpush1.bf16.msra.mxu1 %v3521_v8  ;;  %v4231_v8 = vunpack.i.l.bf16 %v4230_v23  ;;  %v2575_v58 = vsel %vm336_vm8, %v4222_v44, %v4227_v42  ;;  %v2573_v15 = vsel %vm336_vm8, %v4221_v10, %v4226_v47  ;;  %v2612_v28 = vsel %vm349_vm9, %v4232_v59, %v6041_v2 }
 0x6de   : > { %v4245_v3 = vpop.permute.xlu0 %4244  ;;  %v4235_v35 = vpop.permute.xlu1 %4234  ;;  %3524 = vmatprep.subr.bf16.mxu1 %v3523_v22  ;;  %v3536_v41 = vpack.c.bf16 %v2575_v58, %v2573_v15  ;;  %v2742_v15 = vrot.slane %v5803_v61, %v4409_v14 }
 0x6df   : > { %v4237_v49 = vunpack.i.h.bf16 %v4235_v35  ;;  %v4236_v27 = vunpack.i.l.bf16 %v4235_v35  ;;  %v2610_v55 = vsel %vm349_vm9, %v4231_v8, %v6041_v2  ;;  %v4247_v51 = vunpack.i.h.bf16 %v4245_v3 }
 0x6e0   : > { %v3539_v57 = vpack.c.bf16 %v2612_v28, %v2610_v55 }
 0x6e1   : > { %3526 = vmatpush1.bf16.msra.mxu1 %v3525_v40  ;;  %v4246_v40 = vunpack.i.l.bf16 %v4245_v3  ;;  %v2611_v33 = vsel %vm349_vm9, %v4237_v49, %v4232_v59  ;;  %v2609_v5 = vsel %vm349_vm9, %v4236_v27, %v4231_v8  ;;  %v2616_v24 = vsel %vm349_vm9, %v4247_v51, %v6041_v2 }
 0x6e2   : > { %v4250_v36 = vpop.permute.xlu0 %4249  ;;  %v4240_v22 = vpop.permute.xlu1 %4239  ;;  %3529 = vmatprep.subr.msk.bf16.mxu1 %vm5010_vm14, %v3527_v29  ;;  %v3542_v45 = vpack.c.bf16 %v2611_v33, %v2609_v5 }
 0x6e3   : > { %v4242_v34 = vunpack.i.h.bf16 %v4240_v22  ;;  %v4241_v38 = vunpack.i.l.bf16 %v4240_v22  ;;  %v4252_v6 = vunpack.i.h.bf16 %v4250_v36  ;;  %v4251_v4 = vunpack.i.l.bf16 %v4250_v36 }
 0x6e4   : > { %v2614_v30 = vsel %vm349_vm9, %v4246_v40, %v6041_v2 }
 0x6e5   : > { %3532 = vmatpush1.bf16.msk.msra.mxu1 %vm5020_vm15, %v3530_v56  ;;  %v2615_v52 = vsel %vm349_vm9, %v4242_v34, %v4247_v51  ;;  %v2613_v11 = vsel %vm349_vm9, %v4241_v38, %v4246_v40  ;;  %v2722_v53 = vsel %vm773_vm11, %v4251_v4, %v5096_v26  ;;  %v2724_v2 = vsel %vm773_vm11, %v4252_v6, %v5096_v26 }
 0x6e6   : > { %v4265_v13 = vpop.permute.xlu0 %4264  ;;  %v4255_v9 = vpop.permute.xlu1 %4254  ;;  %3535 = vmatprep.subr.msk.bf16.mxu1 %vm5010_vm14, %v3533_v63  ;;  %v3545_v32 = vpack.c.bf16 %v2616_v24, %v2614_v30  ;;  %v3548_v43 = vpack.c.bf16 %v2615_v52, %v2613_v11  ;;  %v3551_v21 = vpack.c.bf16 %v2724_v2, %v2722_v53  ;;  %v2749_v38 = vsub.s32 2, %v6042_v1 }
 0x6e7   : > { %v4257_v17 = vunpack.i.h.bf16 %v4255_v9  ;;  %v4256_v37 = vunpack.i.l.bf16 %v4255_v9  ;;  %v4267_v0 = vunpack.i.h.bf16 %v4265_v13  ;;  %v4266_v12 = vunpack.i.l.bf16 %v4265_v13 }
 0x6e8   : > { %v2750_v13 = vrot.slane %v5803_v61, %v2749_v38  ;;  %v4314_v9 = vmov 1966171168  }
 0x6e9   : > { %3538 = vmatpush1.bf16.msk.msra.mxu1 %vm5020_vm15, %v3536_v41  ;;  %v2723_v7 = vsel %vm773_vm11, %v4257_v17, %v4252_v6  ;;  %v2721_v50 = vsel %vm773_vm11, %v4256_v37, %v4251_v4  ;;  %v2726_v25 = vsel %vm773_vm11, %v4266_v12, %v5096_v26  ;;  %v2728_v20 = vsel %vm773_vm11, %v4267_v0, %v5096_v26 }
 0x6ea   : > { %v4260_v54 = vpop.permute.xlu1 %4259  ;;  %3541 = vmatprep.subr.msk.bf16.mxu1 %vm4959_vm12, %v3539_v57  ;;  %v4270_v23 = vpop.permute.xlu0 %4269  ;;  %v3553_v44 = vpack.c.bf16 %v2723_v7, %v2721_v50  ;;  %v3555_v39 = vpack.c.bf16 %v2728_v20, %v2726_v25  ;;  %v2901_v33 = vunpack.c.l.s4 %v4314_v9 }
 0x6eb   : > { %v4272_v16 = vunpack.i.h.bf16 %v4270_v23  ;;  %v4271_v42 = vunpack.i.l.bf16 %v4270_v23  ;;  %v4262_v3 = vunpack.i.h.bf16 %v4260_v54  ;;  %v4261_v35 = vunpack.i.l.bf16 %v4260_v54 }
 0x6ec   : > { %v2902_v5 = vunpack.c.0.s8 %v2901_v33 }
 0x6ed   : > { %3544 = vmatpush1.bf16.msk.msra.mxu1 %vm4972_vm13, %v3542_v45  ;;  %v2652_v10 = vsel %vm362_vm10, %v4272_v16, %v4734_v60  ;;  %v2650_v29 = vsel %vm362_vm10, %v4271_v42, %v4734_v60  ;;  %v2727_v19 = vsel %vm773_vm11, %v4262_v3, %v4267_v0  ;;  %v2725_v59 = vsel %vm773_vm11, %v4261_v35, %v4266_v12 }
 0x6ee   : > { %3547 = vmatprep.subr.msk.bf16.mxu1 %vm4959_vm12, %v3545_v32  ;;  %v4275_v47 = vpop.permute.xlu1 %4274  ;;  %v4280_v31 = vpop.permute.xlu0 %4279  ;;  %v3559_v22 = vpack.c.bf16 %v2652_v10, %v2650_v29  ;;  %v3557_v58 = vpack.c.bf16 %v2727_v19, %v2725_v59  ;;  %v2905_v4 = vsub.s32 %v2902_v5, %v6042_v1 }
 0x6ef   : > { %v4277_v8 = vunpack.i.h.bf16 %v4275_v47  ;;  %v4276_v56 = vunpack.i.l.bf16 %v4275_v47  ;;  %v4282_v26 = vunpack.i.h.bf16 %v4280_v31  ;;  %v4281_v36 = vunpack.i.l.bf16 %v4280_v31 }
 0x6f1   : > { %3550 = vmatpush1.bf16.msk.msra.mxu1 %vm4972_vm13, %v3548_v43  ;;  %v2651_v49 = vsel %vm362_vm10, %v4277_v8, %v4272_v16  ;;  %v2649_v27 = vsel %vm362_vm10, %v4276_v56, %v4271_v42  ;;  %v2656_v55 = vsel %vm362_vm10, %v4282_v26, %v4734_v60  ;;  %v2654_v51 = vsel %vm362_vm10, %v4281_v36, %v4734_v60 }
 0x6f2   : > { %3552 = vmatprep.subr.bf16.mxu1 %v3551_v21  ;;  %v4285_v62 = vpop.permute.xlu1 %4284  ;;  %v3562_v40 = vpack.c.bf16 %v2651_v49, %v2649_v27  ;;  %v3565_v41 = vpack.c.bf16 %v2656_v55, %v2654_v51 }
 0x6f3   : > { %v4287_v63 = vunpack.i.h.bf16 %v4285_v62  ;;  %v4286_v28 = vunpack.i.l.bf16 %v4285_v62 }
 0x6f5   : > { %3554 = vmatpush1.bf16.msra.mxu1 %v3553_v44  ;;  %v2655_v14 = vsel %vm362_vm10, %v4287_v63, %v4282_v26  ;;  %v2653_v34 = vsel %vm362_vm10, %v4286_v28, %v4281_v36 }
 0x6f6   : > { %3556 = vmatprep.subr.bf16.mxu1 %v3555_v39  ;;  %v3568_v60 = vpack.c.bf16 %v2655_v14, %v2653_v34 }
 0x6f9   : > { %3558 = vmatpush1.bf16.msra.mxu1 %v3557_v58 }
 0x6fa   : > { %3561 = vmatprep.subr.msk.bf16.mxu1 %vm5010_vm14, %v3559_v22 }
 0x6fc   : > { %2820 = vmatmul.mubr.f32.vlgmr.msra.gmra.mrb[16].mxu1 %v2742_v15 }
 0x6fd   : > { %3564 = vmatpush1.bf16.msk.msra.mxu1 %vm5020_vm15, %v3562_v40  ;;  %2890 = vmatprep.mubr.f32.mxu1 %v6029_v48 }
 0x6fe   : > { %3567 = vmatprep.subr.msk.bf16.mxu1 %vm5010_vm14, %v3565_v41 }
 0x701   : > { %3570 = vmatpush1.bf16.msk.msra.mxu1 %vm5020_vm15, %v3568_v60 }
 0x704   : > { %3184 = vmatmul.mubr.msk.f32.vlgmr.msra.gmra.mrb[16].mxu1 %vm1182_vm1, %v2750_v13 }
 0x7d7   : > { %v2892_v6 = vpop.f32.mrb[16].mxu1 }
 0x7d8   : > { %v2894_v57 = vpop.f32.mrb[17].mxu1 }
 0x7d9   : > { %v2899_v24 = vcombine.low %v2892_v6, %v2894_v57 }
 0x7db   : > { %v2906_v48 = vrot.slane %v2899_v24, %v2905_v4 }
 0x7dd   : > { %v2913_v46 = vrot.slane %v2906_v48, %v2905_v4 }
 0x7df   : > { %2919 = vst.msk [vmem:[%s246_s15] sm:$0x3] %vm2917_vm0, %v2913_v46 }
 0x7e0 PF: > { %s16_s21 = sadd.s32 1, %s4294_s21  }
 0x7e1   : > { %p13_p4 = scmp.ge.s32.totalorder %s16_s21, 4  }
 0x7e3   :  { %15 = sbr.rel (!%p13_p4) target bundleno = 1 (0x1), region = 74 }

</bundles_post_ra>
